<compile_context>
chip_gen: v7x
topology: tpu7x:2x2x1
jax: 0.10.0
libtpu: 0.0.40
codegen_flags: <defaults>
</compile_context>

<pallas_src>
import math
import jax
import jax.numpy as jnp
from jax import lax
from jax.experimental import pallas as pl
from jax.experimental.pallas import tpu as pltpu


# -----------------------------------------------------------------------------
# Fused kernel: biLSTM1 + LSTM2 + max over time + MLP head, one batch tile.
# -----------------------------------------------------------------------------
def _fused_lstm_kernel(x_ref,
                       w1_ref, b1_ref, whhf_ref, whhb_ref,
                       w2_ref, whh2_ref, b2_ref,
                       fc1w_ref, fc1b_ref, fc2w_ref, fc2b_ref,
                       out_ref,
                       hf_scr, hb_scr):
    T, B, E = x_ref.shape
    H1 = whhf_ref.shape[0]          # 128  (lstm1 hidden per direction)
    H2 = whh2_ref.shape[0]          # 64   (lstm2 hidden, natural width)
    G1 = 4 * H1                     # 512
    G2 = 4 * H2                     # 256

    # Full unroll only when the working set is small; otherwise partial unroll
    # keeps LLO scheduling visibility without code / vreg blowup.
    unroll = True if (T * B) <= 4096 else 4

    def cell(p, h, c, whh_ref, hd):
        # gates = P[t] + h @ W_hh ; gate order [i, f, g, o].
        gates = p.astype(jnp.float32) + jnp.dot(
            h.astype(jnp.bfloat16), whh_ref[...],
            preferred_element_type=jnp.float32)
        i_g = jax.nn.sigmoid(gates[:, 0 * hd:1 * hd])
        f_g = jax.nn.sigmoid(gates[:, 1 * hd:2 * hd])
        g_g = jnp.tanh(gates[:, 2 * hd:3 * hd])
        o_g = jax.nn.sigmoid(gates[:, 3 * hd:4 * hd])
        c_new = f_g * c + i_g * g_g
        h_new = o_g * jnp.tanh(c_new)
        return h_new, c_new

    # ---- Phase 1: hoisted LSTM1 projections + interleaved fwd/bwd recurrence
    def phase1(pf_scr, pb_scr):
        x2 = x_ref[...].reshape(T * B, E)
        # Single fused (T*B, E) @ (E, 8*H1) matmul for both directions;
        # biases pre-summed host-side.
        p_all = (jnp.dot(x2, w1_ref[...], preferred_element_type=jnp.float32)
                 + b1_ref[...]).reshape(T, B, 2 * G1)
        pf_scr[...] = p_all[:, :, :G1].astype(pf_scr.dtype)
        pb_scr[...] = p_all[:, :, G1:].astype(pb_scr.dtype)

        zeros = jnp.zeros((B, H1), jnp.float32)

        def body(t, carry):
            hf, cf, hb, cb = carry
            tt = T - 1 - t
            # Two independent dependence chains advanced per iteration so the
            # MXU push/drain of one hides the EUP/VPU latency of the other.
            hf, cf = cell(pf_scr[t], hf, cf, whhf_ref, H1)
            hb, cb = cell(pb_scr[tt], hb, cb, whhb_ref, H1)
            hf_scr[t] = hf.astype(hf_scr.dtype)
            hb_scr[tt] = hb.astype(hb_scr.dtype)
            return (hf, cf, hb, cb)

        lax.fori_loop(0, T, body, (zeros, zeros, zeros, zeros), unroll=unroll)

    pl.run_scoped(phase1,
                  pltpu.VMEM((T, B, G1), jnp.bfloat16),
                  pltpu.VMEM((T, B, G1), jnp.bfloat16))

    # ---- Phase 2: LSTM2 projection (K=256), recurrence + running max, head --
    def phase2(p2_scr):
        h12 = jnp.concatenate(
            [hf_scr[...].reshape(T * B, H1), hb_scr[...].reshape(T * B, H1)],
            axis=-1)                                      # (T*B, 2*H1) bf16
        p2_scr[...] = (jnp.dot(h12, w2_ref[...],
                               preferred_element_type=jnp.float32)
                       + b2_ref[...]).reshape(T, B, G2)

        zeros2 = jnp.zeros((B, H2), jnp.float32)
        neg_big = jnp.full((B, H2), -1e30, jnp.float32)

        def body(t, carry):
            h, c, mx = carry
            h, c = cell(p2_scr[t], h, c, whh2_ref, H2)
            return (h, c, jnp.maximum(mx, h))

        _, _, mx = lax.fori_loop(0, T, body, (zeros2, zeros2, neg_big),
                                 unroll=unroll)

        # Head: fc1 + ReLU + fc2 + sigmoid.
        z = jnp.dot(mx.astype(jnp.bfloat16), fc1w_ref[...],
                    preferred_element_type=jnp.float32) + fc1b_ref[...]
        z = jnp.maximum(z, 0.0)
        y = jnp.dot(z.astype(jnp.bfloat16), fc2w_ref[...],
                    preferred_element_type=jnp.float32) + fc2b_ref[...]
        out_ref[...] = jax.nn.sigmoid(y)

    pl.run_scoped(phase2, pltpu.VMEM((T, B, G2), jnp.float32))


# -----------------------------------------------------------------------------
# pallas_call wrapper: batch-tiled grid, weights resident in VMEM.
# -----------------------------------------------------------------------------
def fused_forward(x, w1, b1, whh_f, whh_b, w2, whh2, b2,
                  fc1w, fc1b, fc2w, fc2b, *, b_tile, vmem_limit_bytes):
    """x: (T, B, E) bf16 time-major embedded input; B multiple of b_tile."""
    T, B, E = x.shape
    assert B % b_tile == 0 and b_tile % 8 == 0
    H1 = whh_f.shape[0]

    def _full_spec(a):
        nd = a.ndim

        def imap(i):
            return (0,) * nd

        return pl.BlockSpec(a.shape, imap)

    weights = (w1, b1, whh_f, whh_b, w2, whh2, b2, fc1w, fc1b, fc2w, fc2b)

    return pl.pallas_call(
        _fused_lstm_kernel,
        out_shape=jax.ShapeDtypeStruct((B, 1), jnp.float32),
        grid=(B // b_tile,),
        in_specs=[pl.BlockSpec((T, b_tile, E), lambda i: (0, i, 0))]
                 + [_full_spec(w) for w in weights],
        out_specs=pl.BlockSpec((b_tile, 1), lambda i: (i, 0)),
        scratch_shapes=[
            pltpu.VMEM((T, b_tile, H1), jnp.bfloat16),   # h fwd sequence
            pltpu.VMEM((T, b_tile, H1), jnp.bfloat16),   # h bwd sequence
        ],
        compiler_params=pltpu.CompilerParams(
            dimension_semantics=("parallel",),           # megacore on v7x
            vmem_limit_bytes=int(vmem_limit_bytes)),
    )(x, *weights)


# -----------------------------------------------------------------------------
# VMEM footprint estimate (per tile) -> B_TILE picker + vmem limit.
# -----------------------------------------------------------------------------
def _vmem_bytes_estimate(T, bt, E, H1, H2):
    G1, G2 = 4 * H1, 4 * H2
    w_bytes = ((E * 2 * G1 + 2 * H1 * G1 + 2 * H1 * G2 + H2 * G2
                + H2 * 32 + 32) * 2                      # bf16 weights
               + (2 * G1 + G2 + 32 + 1) * 4)             # f32 biases
    x_blk = 2 * T * bt * E * 2                           # double-buffered in
    out_blk = 2 * bt * 4
    h_seq = 2 * T * bt * H1 * 2                          # hf + hb (bf16)
    p1 = 2 * T * bt * G1 * 2                             # scope-1 (bf16)
    p2 = T * bt * G2 * 4                                 # scope-2 (f32)
    return w_bytes + x_blk + out_blk + h_seq + max(p1, p2)


# -----------------------------------------------------------------------------
# Parameter construction (deterministic, PyTorch-like uniform init).
# -----------------------------------------------------------------------------
def _uniform(key, shape, bound):
    return jax.random.uniform(key, shape, jnp.float32, -bound, bound)


def init_params(key, vocab_size, embedding_dim=64, lstm_units=128):
    ks = jax.random.split(key, 16)
    p = {}

    # Embedding (vocab_size+1, embedding_dim), padding_idx=0 -> zero row 0.
    emb = jax.random.normal(ks[0], (vocab_size + 1, embedding_dim), jnp.float32)
    p["emb"] = emb.at[0].set(0.0)

    def lstm_params(k, in_dim, hid):
        k1, k2, k3, k4 = jax.random.split(k, 4)
        b = 1.0 / math.sqrt(hid)
        return {
            "wih": _uniform(k1, (in_dim, 4 * hid), b),   # stored transposed
            "whh": _uniform(k2, (hid, 4 * hid), b),
            "bih": _uniform(k3, (1, 4 * hid), b),
            "bhh": _uniform(k4, (1, 4 * hid), b),
        }

    p["lstm1_fwd"] = lstm_params(ks[1], embedding_dim, lstm_units)
    p["lstm1_bwd"] = lstm_params(ks[2], embedding_dim, lstm_units)
    p["lstm2"] = lstm_params(ks[3], 2 * lstm_units, 64)

    b1 = 1.0 / math.sqrt(64)
    p["fc1_w"] = _uniform(ks[4], (64, 32), b1)
    p["fc1_b"] = _uniform(ks[5], (1, 32), b1)
    b2 = 1.0 / math.sqrt(32)
    p["fc2_w"] = _uniform(ks[6], (32, 1), b2)
    p["fc2_b"] = _uniform(ks[7], (1, 1), b2)
    return p


# -----------------------------------------------------------------------------
# Full forward pass (embedding gather + weight prep are plain-JAX glue).
# -----------------------------------------------------------------------------
def syscall_lstm_classifier_forward(params, x_tokens,
                                    vmem_budget_bytes=40 * 1024 * 1024,
                                    max_b_tile=256):
    """x_tokens: int32 (B, T) syscall ids.  Returns (B, 1) sigmoid scores."""
    B0, T = x_tokens.shape
    pf, pb, p2 = params["lstm1_fwd"], params["lstm1_bwd"], params["lstm2"]
    E = params["emb"].shape[1]
    H1 = pf["whh"].shape[0]                  # 128
    H2 = p2["whh"].shape[0]                  # 64

    # Batch tile: largest candidate that fits the per-tile VMEM budget
    # (budget sized for v7x's 64 MiB physical VMEM), clamped to the batch.
    b_tile = 8
    for cand in (256, 128, 64, 32, 16, 8):
        if cand <= max_b_tile and _vmem_bytes_estimate(T, cand, E, H1, H2) <= vmem_budget_bytes:
            b_tile = cand
            break
    b_tile = min(b_tile, ((B0 + 7) // 8) * 8)
    B = ((B0 + b_tile - 1) // b_tile) * b_tile
    if B != B0:
        # padded rows use token 0 -> zero embedding row; results sliced off.
        x_tokens = jnp.pad(x_tokens, ((0, B - B0), (0, 0)))

    # Embedding lookup + time-major transpose (plain-JAX glue).
    # TODO(synk): embedding gather stays outside the kernel; a scalar-prefetch
    # row-gather would remove one HBM pass but is low value at these sizes.
    emb = jnp.take(params["emb"], x_tokens, axis=0)              # (B, T, E)
    x = jnp.transpose(emb, (1, 0, 2)).astype(jnp.bfloat16)       # (T, B, E)

    # bf16 matmul weights (MXU-native); biases stay f32 and are pre-summed.
    w1 = jnp.concatenate([pf["wih"], pb["wih"]], axis=1).astype(jnp.bfloat16)
    b1 = jnp.concatenate([pf["bih"] + pf["bhh"], pb["bih"] + pb["bhh"]], axis=1)
    whh_f = pf["whh"].astype(jnp.bfloat16)
    whh_b = pb["whh"].astype(jnp.bfloat16)
    w2 = p2["wih"].astype(jnp.bfloat16)                          # (256, 256)
    whh2 = p2["whh"].astype(jnp.bfloat16)                        # (64, 256)
    b2 = p2["bih"] + p2["bhh"]                                   # (1, 256)
    fc1w = params["fc1_w"].astype(jnp.bfloat16)
    fc2w = params["fc2_w"].astype(jnp.bfloat16)

    est = _vmem_bytes_estimate(T, b_tile, E, H1, H2)
    vmem_limit = int(min(128 * 1024 * 1024, max(2 * est, 8 * 1024 * 1024)))

    out = fused_forward(x, w1, b1, whh_f, whh_b, w2, whh2, b2,
                        fc1w, params["fc1_b"], fc2w, params["fc2_b"],
                        b_tile=b_tile, vmem_limit_bytes=vmem_limit)
    return out[:B0]


# -----------------------------------------------------------------------------
# Pure-JAX f32 reference (correctness check in __main__).
# -----------------------------------------------------------------------------
def _reference_forward(params, x_tokens):
    hp = lax.Precision.HIGHEST
    emb = jnp.take(params["emb"], x_tokens, axis=0).astype(jnp.float32)
    x = jnp.transpose(emb, (1, 0, 2))                            # (T, B, E)

    def run(x_seq, p, reverse=False):
        T_, B_, _ = x_seq.shape
        H = p["whh"].shape[0]
        h = jnp.zeros((B_, H), jnp.float32)
        c = jnp.zeros((B_, H), jnp.float32)
        outs = [None] * T_
        order = range(T_ - 1, -1, -1) if reverse else range(T_)
        for t in order:
            g = (jnp.dot(x_seq[t], p["wih"], precision=hp)
                 + jnp.dot(h, p["whh"], precision=hp) + p["bih"] + p["bhh"])
            i = jax.nn.sigmoid(g[:, 0 * H:1 * H])
            f = jax.nn.sigmoid(g[:, 1 * H:2 * H])
            gg = jnp.tanh(g[:, 2 * H:3 * H])
            o = jax.nn.sigmoid(g[:, 3 * H:4 * H])
            c = f * c + i * gg
            h = o * jnp.tanh(c)
            outs[t] = h
        return jnp.stack(outs, axis=0)

    hf = run(x, params["lstm1_fwd"])
    hb = run(x, params["lstm1_bwd"], reverse=True)
    h1 = jnp.concatenate([hf, hb], axis=-1)
    h2 = run(h1, params["lstm2"])
    m = jnp.max(h2, axis=0)
    z = jnp.maximum(jnp.dot(m, params["fc1_w"], precision=hp) + params["fc1_b"], 0.0)
    y = jnp.dot(z, params["fc2_w"], precision=hp) + params["fc2_b"]
    return jax.nn.sigmoid(y)


if __name__ == "__main__":
    key = jax.random.PRNGKey(0)
    k_param, k_data = jax.random.split(key)

    vocab_size = 20
    T = 8
    params = init_params(k_param, vocab_size, embedding_dim=64, lstm_units=128)

    # Case 1: tiny batch (single grid tile, batch padded to 8).
    B1 = 2
    x1 = jax.random.randint(k_data, (B1, T), 0, vocab_size + 1, jnp.int32)
    out1 = jax.block_until_ready(syscall_lstm_classifier_forward(params, x1))
    assert out1.shape == (B1, 1)
    assert bool(jnp.all(jnp.isfinite(out1)))
    assert bool(jnp.all((out1 >= 0.0) & (out1 <= 1.0)))
    ref1 = _reference_forward(params, x1)
    err1 = float(jnp.max(jnp.abs(out1 - ref1)))
    assert err1 < 2e-2, f"single-tile mismatch: {err1}"

    # Case 2: multi-tile batch grid (B=20 -> padded to 24, 3 tiles of 8).
    B2 = 20
    x2 = jax.random.randint(jax.random.fold_in(k_data, 1), (B2, T), 0,
                            vocab_size + 1, jnp.int32)
    out2 = jax.block_until_ready(
        syscall_lstm_classifier_forward(params, x2, max_b_tile=8))
    assert out2.shape == (B2, 1)
    assert bool(jnp.all(jnp.isfinite(out2)))
    ref2 = _reference_forward(params, x2)
    err2 = float(jnp.max(jnp.abs(out2 - ref2)))
    assert err2 < 2e-2, f"multi-tile mismatch: {err2}"

    print("KERNEL_OK")
</pallas_src>

<mosaic_0001>
module attributes {stable_mosaic.version = 11 : i64} {
  func.func @_fused_lstm_kernel(%arg0: i32, %arg1: memref<8x8x64xbf16, #tpu.memory_space<vmem>>, %arg2: memref<64x1024xbf16, #tpu.memory_space<vmem>>, %arg3: memref<1x1024xf32, #tpu.memory_space<vmem>>, %arg4: memref<128x512xbf16, #tpu.memory_space<vmem>>, %arg5: memref<128x512xbf16, #tpu.memory_space<vmem>>, %arg6: memref<256x256xbf16, #tpu.memory_space<vmem>>, %arg7: memref<64x256xbf16, #tpu.memory_space<vmem>>, %arg8: memref<1x256xf32, #tpu.memory_space<vmem>>, %arg9: memref<64x32xbf16, #tpu.memory_space<vmem>>, %arg10: memref<1x32xf32, #tpu.memory_space<vmem>>, %arg11: memref<32x1xbf16, #tpu.memory_space<vmem>>, %arg12: memref<1x1xf32, #tpu.memory_space<vmem>>, %arg13: memref<8x1xf32, #tpu.memory_space<vmem>>, %arg14: memref<8x8x128xbf16, #tpu.memory_space<vmem>>, %arg15: memref<8x8x128xbf16, #tpu.memory_space<vmem>>) attributes {dimension_semantics = [#tpu.dimension_semantics<parallel>], iteration_bounds = array<i64: 1>, scalar_prefetch = 0 : i64, scratch_operands = 2 : i64, tpu.core_type = #tpu.core_type<tc>, window_params = [{transform_indices = @transform_0, window_bounds = array<i64: 8, 8, 64>}, {pipeline_mode = #tpu.pipeline_mode<synchronous>, transform_indices = @transform_1, window_bounds = array<i64: 64, 1024>}, {pipeline_mode = #tpu.pipeline_mode<synchronous>, transform_indices = @transform_2, window_bounds = array<i64: 1, 1024>}, {pipeline_mode = #tpu.pipeline_mode<synchronous>, transform_indices = @transform_3, window_bounds = array<i64: 128, 512>}, {pipeline_mode = #tpu.pipeline_mode<synchronous>, transform_indices = @transform_4, window_bounds = array<i64: 128, 512>}, {pipeline_mode = #tpu.pipeline_mode<synchronous>, transform_indices = @transform_5, window_bounds = array<i64: 256, 256>}, {pipeline_mode = #tpu.pipeline_mode<synchronous>, transform_indices = @transform_6, window_bounds = array<i64: 64, 256>}, {pipeline_mode = #tpu.pipeline_mode<synchronous>, transform_indices = @transform_7, window_bounds = array<i64: 1, 256>}, {pipeline_mode = #tpu.pipeline_mode<synchronous>, transform_indices = @transform_8, window_bounds = array<i64: 64, 32>}, {pipeline_mode = #tpu.pipeline_mode<synchronous>, transform_indices = @transform_9, window_bounds = array<i64: 1, 32>}, {pipeline_mode = #tpu.pipeline_mode<synchronous>, transform_indices = @transform_10, window_bounds = array<i64: 32, 1>}, {pipeline_mode = #tpu.pipeline_mode<synchronous>, transform_indices = @transform_11, window_bounds = array<i64: 1, 1>}, {transform_indices = @transform_12, window_bounds = array<i64: 8, 1>}]} {
    "tpu.region"() ({
      %alloca = memref.alloca() : memref<8x8x512xbf16, #tpu.memory_space<vmem>>
      %alloca_0 = memref.alloca() : memref<8x8x512xbf16, #tpu.memory_space<vmem>>
      %c0 = arith.constant 0 : index
      %c0_1 = arith.constant 0 : index
      %c0_2 = arith.constant 0 : index
      %0 = vector.load %arg1[%c0, %c0_1, %c0_2] : memref<8x8x64xbf16, #tpu.memory_space<vmem>>, vector<8x8x64xbf16>
      %1 = vector.shape_cast %0 : vector<8x8x64xbf16> to vector<64x64xbf16>
      %c0_3 = arith.constant 0 : index
      %c0_4 = arith.constant 0 : index
      %2 = vector.load %arg2[%c0_3, %c0_4] : memref<64x1024xbf16, #tpu.memory_space<vmem>>, vector<64x1024xbf16>
      %cst = arith.constant dense<0.000000e+00> : vector<64x1024xf32>
      %3 = tpu.matmul %1, %2, %cst {dimension_numbers = #tpu.dot_dimension_numbers<[1], [0], [0], [1], [0, 0, 1, 1], [], []>} : vector<64x64xbf16>, vector<64x1024xbf16>, vector<64x1024xf32> -> vector<64x1024xf32>
      %c0_5 = arith.constant 0 : index
      %c0_6 = arith.constant 0 : index
      %4 = vector.load %arg3[%c0_5, %c0_6] : memref<1x1024xf32, #tpu.memory_space<vmem>>, vector<1x1024xf32>
      %5 = vector.broadcast %4 : vector<1x1024xf32> to vector<64x1024xf32>
      %6 = arith.addf %3, %5 : vector<64x1024xf32>
      %7 = vector.shape_cast %6 : vector<64x1024xf32> to vector<8x8x1024xf32>
      %8 = vector.extract_strided_slice %7 {offsets = [0, 0, 0], sizes = [8, 8, 512], strides = [1, 1, 1]} : vector<8x8x1024xf32> to vector<8x8x512xf32>
      %9 = arith.truncf %8 : vector<8x8x512xf32> to vector<8x8x512xbf16>
      %c0_7 = arith.constant 0 : index
      %c0_8 = arith.constant 0 : index
      %c0_9 = arith.constant 0 : index
      %10 = vector.load %alloca[%c0_7, %c0_8, %c0_9] : memref<8x8x512xbf16, #tpu.memory_space<vmem>>, vector<8x8x512xbf16>
      tpu.vector_store %alloca[%c0_7, %c0_8, %c0_9], %9 {strides = array<i32>} : memref<8x8x512xbf16, #tpu.memory_space<vmem>>, vector<8x8x512xbf16>,
      %11 = vector.extract_strided_slice %7 {offsets = [0, 0, 512], sizes = [8, 8, 512], strides = [1, 1, 1]} : vector<8x8x1024xf32> to vector<8x8x512xf32>
      %12 = arith.truncf %11 : vector<8x8x512xf32> to vector<8x8x512xbf16>
      %c0_10 = arith.constant 0 : index
      %c0_11 = arith.constant 0 : index
      %c0_12 = arith.constant 0 : index
      %13 = vector.load %alloca_0[%c0_10, %c0_11, %c0_12] : memref<8x8x512xbf16, #tpu.memory_space<vmem>>, vector<8x8x512xbf16>
      tpu.vector_store %alloca_0[%c0_10, %c0_11, %c0_12], %12 {strides = array<i32>} : memref<8x8x512xbf16, #tpu.memory_space<vmem>>, vector<8x8x512xbf16>,
      %cst_13 = arith.constant 0.000000e+00 : f32
      %14 = vector.broadcast %cst_13 : f32 to vector<8x128xf32>
      %c0_i32 = arith.constant 0 : i32
      %c7_i32 = arith.constant 7 : i32
      %15 = arith.subi %c7_i32, %c0_i32 : i32
      %16 = arith.index_cast %c0_i32 : i32 to index
      %c0_14 = arith.constant 0 : index
      %c0_15 = arith.constant 0 : index
      %17 = vector.load %alloca[%16, %c0_14, %c0_15] : memref<8x8x512xbf16, #tpu.memory_space<vmem>>, vector<1x8x512xbf16>
      %18 = vector.shape_cast %17 : vector<1x8x512xbf16> to vector<8x512xbf16>
      %19 = arith.extf %18 : vector<8x512xbf16> to vector<8x512xf32>
      %20 = arith.truncf %14 : vector<8x128xf32> to vector<8x128xbf16>
      %c0_16 = arith.constant 0 : index
      %c0_17 = arith.constant 0 : index
      %21 = vector.load %arg4[%c0_16, %c0_17] : memref<128x512xbf16, #tpu.memory_space<vmem>>, vector<128x512xbf16>
      %cst_18 = arith.constant dense<0.000000e+00> : vector<8x512xf32>
      %22 = tpu.matmul %20, %21, %cst_18 {dimension_numbers = #tpu.dot_dimension_numbers<[1], [0], [0], [1], [0, 0, 1, 1], [], []>} : vector<8x128xbf16>, vector<128x512xbf16>, vector<8x512xf32> -> vector<8x512xf32>
      %23 = arith.addf %19, %22 : vector<8x512xf32>
      %24 = vector.extract_strided_slice %23 {offsets = [0, 0], sizes = [8, 128], strides = [1, 1]} : vector<8x512xf32> to vector<8x128xf32>
      %25 = arith.negf %24 : vector<8x128xf32>
      %26 = math.exp %25 : vector<8x128xf32>
      %cst_19 = arith.constant 1.000000e+00 : f32
      %27 = vector.broadcast %cst_19 : f32 to vector<8x128xf32>
      %28 = arith.addf %27, %26 : vector<8x128xf32>
      %29 = arith.divf %27, %28 : vector<8x128xf32>
      %30 = vector.extract_strided_slice %23 {offsets = [0, 128], sizes = [8, 128], strides = [1, 1]} : vector<8x512xf32> to vector<8x128xf32>
      %31 = arith.negf %30 : vector<8x128xf32>
      %32 = math.exp %31 : vector<8x128xf32>
      %cst_20 = arith.constant 1.000000e+00 : f32
      %33 = vector.broadcast %cst_20 : f32 to vector<8x128xf32>
      %34 = arith.addf %33, %32 : vector<8x128xf32>
      %35 = arith.divf %33, %34 : vector<8x128xf32>
      %36 = vector.extract_strided_slice %23 {offsets = [0, 256], sizes = [8, 128], strides = [1, 1]} : vector<8x512xf32> to vector<8x128xf32>
      %37 = math.tanh %36 : vector<8x128xf32>
      %38 = vector.extract_strided_slice %23 {offsets = [0, 384], sizes = [8, 128], strides = [1, 1]} : vector<8x512xf32> to vector<8x128xf32>
      %39 = arith.negf %38 : vector<8x128xf32>
      %40 = math.exp %39 : vector<8x128xf32>
      %cst_21 = arith.constant 1.000000e+00 : f32
      %41 = vector.broadcast %cst_21 : f32 to vector<8x128xf32>
      %42 = arith.addf %41, %40 : vector<8x128xf32>
      %43 = arith.divf %41, %42 : vector<8x128xf32>
      %44 = arith.mulf %35, %14 : vector<8x128xf32>
      %45 = arith.mulf %29, %37 : vector<8x128xf32>
      %46 = arith.addf %44, %45 : vector<8x128xf32>
      %47 = math.tanh %46 : vector<8x128xf32>
      %48 = arith.mulf %43, %47 : vector<8x128xf32>
      %49 = arith.index_cast %15 : i32 to index
      %c0_22 = arith.constant 0 : index
      %c0_23 = arith.constant 0 : index
      %50 = vector.load %alloca_0[%49, %c0_22, %c0_23] : memref<8x8x512xbf16, #tpu.memory_space<vmem>>, vector<1x8x512xbf16>
      %51 = vector.shape_cast %50 : vector<1x8x512xbf16> to vector<8x512xbf16>
      %52 = arith.extf %51 : vector<8x512xbf16> to vector<8x512xf32>
      %53 = arith.truncf %14 : vector<8x128xf32> to vector<8x128xbf16>
      %c0_24 = arith.constant 0 : index
      %c0_25 = arith.constant 0 : index
      %54 = vector.load %arg5[%c0_24, %c0_25] : memref<128x512xbf16, #tpu.memory_space<vmem>>, vector<128x512xbf16>
      %cst_26 = arith.constant dense<0.000000e+00> : vector<8x512xf32>
      %55 = tpu.matmul %53, %54, %cst_26 {dimension_numbers = #tpu.dot_dimension_numbers<[1], [0], [0], [1], [0, 0, 1, 1], [], []>} : vector<8x128xbf16>, vector<128x512xbf16>, vector<8x512xf32> -> vector<8x512xf32>
      %56 = arith.addf %52, %55 : vector<8x512xf32>
      %57 = vector.extract_strided_slice %56 {offsets = [0, 0], sizes = [8, 128], strides = [1, 1]} : vector<8x512xf32> to vector<8x128xf32>
      %58 = arith.negf %57 : vector<8x128xf32>
      %59 = math.exp %58 : vector<8x128xf32>
      %cst_27 = arith.constant 1.000000e+00 : f32
      %60 = vector.broadcast %cst_27 : f32 to vector<8x128xf32>
      %61 = arith.addf %60, %59 : vector<8x128xf32>
      %62 = arith.divf %60, %61 : vector<8x128xf32>
      %63 = vector.extract_strided_slice %56 {offsets = [0, 128], sizes = [8, 128], strides = [1, 1]} : vector<8x512xf32> to vector<8x128xf32>
      %64 = arith.negf %63 : vector<8x128xf32>
      %65 = math.exp %64 : vector<8x128xf32>
      %cst_28 = arith.constant 1.000000e+00 : f32
      %66 = vector.broadcast %cst_28 : f32 to vector<8x128xf32>
      %67 = arith.addf %66, %65 : vector<8x128xf32>
      %68 = arith.divf %66, %67 : vector<8x128xf32>
      %69 = vector.extract_strided_slice %56 {offsets = [0, 256], sizes = [8, 128], strides = [1, 1]} : vector<8x512xf32> to vector<8x128xf32>
      %70 = math.tanh %69 : vector<8x128xf32>
      %71 = vector.extract_strided_slice %56 {offsets = [0, 384], sizes = [8, 128], strides = [1, 1]} : vector<8x512xf32> to vector<8x128xf32>
      %72 = arith.negf %71 : vector<8x128xf32>
      %73 = math.exp %72 : vector<8x128xf32>
      %cst_29 = arith.constant 1.000000e+00 : f32
      %74 = vector.broadcast %cst_29 : f32 to vector<8x128xf32>
      %75 = arith.addf %74, %73 : vector<8x128xf32>
      %76 = arith.divf %74, %75 : vector<8x128xf32>
      %77 = arith.mulf %68, %14 : vector<8x128xf32>
      %78 = arith.mulf %62, %70 : vector<8x128xf32>
      %79 = arith.addf %77, %78 : vector<8x128xf32>
      %80 = math.tanh %79 : vector<8x128xf32>
      %81 = arith.mulf %76, %80 : vector<8x128xf32>
      %82 = arith.truncf %48 : vector<8x128xf32> to vector<8x128xbf16>
      %83 = arith.index_cast %c0_i32 : i32 to index
      %c0_30 = arith.constant 0 : index
      %c0_31 = arith.constant 0 : index
      %84 = vector.load %arg14[%83, %c0_30, %c0_31] : memref<8x8x128xbf16, #tpu.memory_space<vmem>>, vector<1x8x128xbf16>
      %85 = vector.shape_cast %84 : vector<1x8x128xbf16> to vector<8x128xbf16>
      %86 = vector.shape_cast %82 : vector<8x128xbf16> to vector<1x8x128xbf16>
      tpu.vector_store %arg14[%83, %c0_30, %c0_31], %86 {strides = array<i32>} : memref<8x8x128xbf16, #tpu.memory_space<vmem>>, vector<1x8x128xbf16>,
      %87 = arith.truncf %81 : vector<8x128xf32> to vector<8x128xbf16>
      %88 = arith.index_cast %15 : i32 to index
      %c0_32 = arith.constant 0 : index
      %c0_33 = arith.constant 0 : index
      %89 = vector.load %arg15[%88, %c0_32, %c0_33] : memref<8x8x128xbf16, #tpu.memory_space<vmem>>, vector<1x8x128xbf16>
      %90 = vector.shape_cast %89 : vector<1x8x128xbf16> to vector<8x128xbf16>
      %91 = vector.shape_cast %87 : vector<8x128xbf16> to vector<1x8x128xbf16>
      tpu.vector_store %arg15[%88, %c0_32, %c0_33], %91 {strides = array<i32>} : memref<8x8x128xbf16, #tpu.memory_space<vmem>>, vector<1x8x128xbf16>,
      %c1_i32 = arith.constant 1 : i32
      %c7_i32_34 = arith.constant 7 : i32
      %92 = arith.subi %c7_i32_34, %c1_i32 : i32
      %93 = arith.index_cast %c1_i32 : i32 to index
      %c0_35 = arith.constant 0 : index
      %c0_36 = arith.constant 0 : index
      %94 = vector.load %alloca[%93, %c0_35, %c0_36] : memref<8x8x512xbf16, #tpu.memory_space<vmem>>, vector<1x8x512xbf16>
      %95 = vector.shape_cast %94 : vector<1x8x512xbf16> to vector<8x512xbf16>
      %96 = arith.extf %95 : vector<8x512xbf16> to vector<8x512xf32>
      %97 = arith.truncf %48 : vector<8x128xf32> to vector<8x128xbf16>
      %c0_37 = arith.constant 0 : index
      %c0_38 = arith.constant 0 : index
      %98 = vector.load %arg4[%c0_37, %c0_38] : memref<128x512xbf16, #tpu.memory_space<vmem>>, vector<128x512xbf16>
      %cst_39 = arith.constant dense<0.000000e+00> : vector<8x512xf32>
      %99 = tpu.matmul %97, %98, %cst_39 {dimension_numbers = #tpu.dot_dimension_numbers<[1], [0], [0], [1], [0, 0, 1, 1], [], []>} : vector<8x128xbf16>, vector<128x512xbf16>, vector<8x512xf32> -> vector<8x512xf32>
      %100 = arith.addf %96, %99 : vector<8x512xf32>
      %101 = vector.extract_strided_slice %100 {offsets = [0, 0], sizes = [8, 128], strides = [1, 1]} : vector<8x512xf32> to vector<8x128xf32>
      %102 = arith.negf %101 : vector<8x128xf32>
      %103 = math.exp %102 : vector<8x128xf32>
      %cst_40 = arith.constant 1.000000e+00 : f32
      %104 = vector.broadcast %cst_40 : f32 to vector<8x128xf32>
      %105 = arith.addf %104, %103 : vector<8x128xf32>
      %106 = arith.divf %104, %105 : vector<8x128xf32>
      %107 = vector.extract_strided_slice %100 {offsets = [0, 128], sizes = [8, 128], strides = [1, 1]} : vector<8x512xf32> to vector<8x128xf32>
      %108 = arith.negf %107 : vector<8x128xf32>
      %109 = math.exp %108 : vector<8x128xf32>
      %cst_41 = arith.constant 1.000000e+00 : f32
      %110 = vector.broadcast %cst_41 : f32 to vector<8x128xf32>
      %111 = arith.addf %110, %109 : vector<8x128xf32>
      %112 = arith.divf %110, %111 : vector<8x128xf32>
      %113 = vector.extract_strided_slice %100 {offsets = [0, 256], sizes = [8, 128], strides = [1, 1]} : vector<8x512xf32> to vector<8x128xf32>
      %114 = math.tanh %113 : vector<8x128xf32>
      %115 = vector.extract_strided_slice %100 {offsets = [0, 384], sizes = [8, 128], strides = [1, 1]} : vector<8x512xf32> to vector<8x128xf32>
      %116 = arith.negf %115 : vector<8x128xf32>
      %117 = math.exp %116 : vector<8x128xf32>
      %cst_42 = arith.constant 1.000000e+00 : f32
      %118 = vector.broadcast %cst_42 : f32 to vector<8x128xf32>
      %119 = arith.addf %118, %117 : vector<8x128xf32>
      %120 = arith.divf %118, %119 : vector<8x128xf32>
      %121 = arith.mulf %112, %46 : vector<8x128xf32>
      %122 = arith.mulf %106, %114 : vector<8x128xf32>
      %123 = arith.addf %121, %122 : vector<8x128xf32>
      %124 = math.tanh %123 : vector<8x128xf32>
      %125 = arith.mulf %120, %124 : vector<8x128xf32>
      %126 = arith.index_cast %92 : i32 to index
      %c0_43 = arith.constant 0 : index
      %c0_44 = arith.constant 0 : index
      %127 = vector.load %alloca_0[%126, %c0_43, %c0_44] : memref<8x8x512xbf16, #tpu.memory_space<vmem>>, vector<1x8x512xbf16>
      %128 = vector.shape_cast %127 : vector<1x8x512xbf16> to vector<8x512xbf16>
      %129 = arith.extf %128 : vector<8x512xbf16> to vector<8x512xf32>
      %130 = arith.truncf %81 : vector<8x128xf32> to vector<8x128xbf16>
      %c0_45 = arith.constant 0 : index
      %c0_46 = arith.constant 0 : index
      %131 = vector.load %arg5[%c0_45, %c0_46] : memref<128x512xbf16, #tpu.memory_space<vmem>>, vector<128x512xbf16>
      %cst_47 = arith.constant dense<0.000000e+00> : vector<8x512xf32>
      %132 = tpu.matmul %130, %131, %cst_47 {dimension_numbers = #tpu.dot_dimension_numbers<[1], [0], [0], [1], [0, 0, 1, 1], [], []>} : vector<8x128xbf16>, vector<128x512xbf16>, vector<8x512xf32> -> vector<8x512xf32>
      %133 = arith.addf %129, %132 : vector<8x512xf32>
      %134 = vector.extract_strided_slice %133 {offsets = [0, 0], sizes = [8, 128], strides = [1, 1]} : vector<8x512xf32> to vector<8x128xf32>
      %135 = arith.negf %134 : vector<8x128xf32>
      %136 = math.exp %135 : vector<8x128xf32>
      %cst_48 = arith.constant 1.000000e+00 : f32
      %137 = vector.broadcast %cst_48 : f32 to vector<8x128xf32>
      %138 = arith.addf %137, %136 : vector<8x128xf32>
      %139 = arith.divf %137, %138 : vector<8x128xf32>
      %140 = vector.extract_strided_slice %133 {offsets = [0, 128], sizes = [8, 128], strides = [1, 1]} : vector<8x512xf32> to vector<8x128xf32>
      %141 = arith.negf %140 : vector<8x128xf32>
      %142 = math.exp %141 : vector<8x128xf32>
      %cst_49 = arith.constant 1.000000e+00 : f32
      %143 = vector.broadcast %cst_49 : f32 to vector<8x128xf32>
      %144 = arith.addf %143, %142 : vector<8x128xf32>
      %145 = arith.divf %143, %144 : vector<8x128xf32>
      %146 = vector.extract_strided_slice %133 {offsets = [0, 256], sizes = [8, 128], strides = [1, 1]} : vector<8x512xf32> to vector<8x128xf32>
      %147 = math.tanh %146 : vector<8x128xf32>
      %148 = vector.extract_strided_slice %133 {offsets = [0, 384], sizes = [8, 128], strides = [1, 1]} : vector<8x512xf32> to vector<8x128xf32>
      %149 = arith.negf %148 : vector<8x128xf32>
      %150 = math.exp %149 : vector<8x128xf32>
      %cst_50 = arith.constant 1.000000e+00 : f32
      %151 = vector.broadcast %cst_50 : f32 to vector<8x128xf32>
      %152 = arith.addf %151, %150 : vector<8x128xf32>
      %153 = arith.divf %151, %152 : vector<8x128xf32>
      %154 = arith.mulf %145, %79 : vector<8x128xf32>
      %155 = arith.mulf %139, %147 : vector<8x128xf32>
      %156 = arith.addf %154, %155 : vector<8x128xf32>
      %157 = math.tanh %156 : vector<8x128xf32>
      %158 = arith.mulf %153, %157 : vector<8x128xf32>
      %159 = arith.truncf %125 : vector<8x128xf32> to vector<8x128xbf16>
      %160 = arith.index_cast %c1_i32 : i32 to index
      %c0_51 = arith.constant 0 : index
      %c0_52 = arith.constant 0 : index
      %161 = vector.load %arg14[%160, %c0_51, %c0_52] : memref<8x8x128xbf16, #tpu.memory_space<vmem>>, vector<1x8x128xbf16>
      %162 = vector.shape_cast %161 : vector<1x8x128xbf16> to vector<8x128xbf16>
      %163 = vector.shape_cast %159 : vector<8x128xbf16> to vector<1x8x128xbf16>
      tpu.vector_store %arg14[%160, %c0_51, %c0_52], %163 {strides = array<i32>} : memref<8x8x128xbf16, #tpu.memory_space<vmem>>, vector<1x8x128xbf16>,
      %164 = arith.truncf %158 : vector<8x128xf32> to vector<8x128xbf16>
      %165 = arith.index_cast %92 : i32 to index
      %c0_53 = arith.constant 0 : index
      %c0_54 = arith.constant 0 : index
      %166 = vector.load %arg15[%165, %c0_53, %c0_54] : memref<8x8x128xbf16, #tpu.memory_space<vmem>>, vector<1x8x128xbf16>
      %167 = vector.shape_cast %166 : vector<1x8x128xbf16> to vector<8x128xbf16>
      %168 = vector.shape_cast %164 : vector<8x128xbf16> to vector<1x8x128xbf16>
      tpu.vector_store %arg15[%165, %c0_53, %c0_54], %168 {strides = array<i32>} : memref<8x8x128xbf16, #tpu.memory_space<vmem>>, vector<1x8x128xbf16>,
      %c2_i32 = arith.constant 2 : i32
      %c7_i32_55 = arith.constant 7 : i32
      %169 = arith.subi %c7_i32_55, %c2_i32 : i32
      %170 = arith.index_cast %c2_i32 : i32 to index
      %c0_56 = arith.constant 0 : index
      %c0_57 = arith.constant 0 : index
      %171 = vector.load %alloca[%170, %c0_56, %c0_57] : memref<8x8x512xbf16, #tpu.memory_space<vmem>>, vector<1x8x512xbf16>
      %172 = vector.shape_cast %171 : vector<1x8x512xbf16> to vector<8x512xbf16>
      %173 = arith.extf %172 : vector<8x512xbf16> to vector<8x512xf32>
      %174 = arith.truncf %125 : vector<8x128xf32> to vector<8x128xbf16>
      %c0_58 = arith.constant 0 : index
      %c0_59 = arith.constant 0 : index
      %175 = vector.load %arg4[%c0_58, %c0_59] : memref<128x512xbf16, #tpu.memory_space<vmem>>, vector<128x512xbf16>
      %cst_60 = arith.constant dense<0.000000e+00> : vector<8x512xf32>
      %176 = tpu.matmul %174, %175, %cst_60 {dimension_numbers = #tpu.dot_dimension_numbers<[1], [0], [0], [1], [0, 0, 1, 1], [], []>} : vector<8x128xbf16>, vector<128x512xbf16>, vector<8x512xf32> -> vector<8x512xf32>
      %177 = arith.addf %173, %176 : vector<8x512xf32>
      %178 = vector.extract_strided_slice %177 {offsets = [0, 0], sizes = [8, 128], strides = [1, 1]} : vector<8x512xf32> to vector<8x128xf32>
      %179 = arith.negf %178 : vector<8x128xf32>
      %180 = math.exp %179 : vector<8x128xf32>
      %cst_61 = arith.constant 1.000000e+00 : f32
      %181 = vector.broadcast %cst_61 : f32 to vector<8x128xf32>
      %182 = arith.addf %181, %180 : vector<8x128xf32>
      %183 = arith.divf %181, %182 : vector<8x128xf32>
      %184 = vector.extract_strided_slice %177 {offsets = [0, 128], sizes = [8, 128], strides = [1, 1]} : vector<8x512xf32> to vector<8x128xf32>
      %185 = arith.negf %184 : vector<8x128xf32>
      %186 = math.exp %185 : vector<8x128xf32>
      %cst_62 = arith.constant 1.000000e+00 : f32
      %187 = vector.broadcast %cst_62 : f32 to vector<8x128xf32>
      %188 = arith.addf %187, %186 : vector<8x128xf32>
      %189 = arith.divf %187, %188 : vector<8x128xf32>
      %190 = vector.extract_strided_slice %177 {offsets = [0, 256], sizes = [8, 128], strides = [1, 1]} : vector<8x512xf32> to vector<8x128xf32>
      %191 = math.tanh %190 : vector<8x128xf32>
      %192 = vector.extract_strided_slice %177 {offsets = [0, 384], sizes = [8, 128], strides = [1, 1]} : vector<8x512xf32> to vector<8x128xf32>
      %193 = arith.negf %192 : vector<8x128xf32>
      %194 = math.exp %193 : vector<8x128xf32>
      %cst_63 = arith.constant 1.000000e+00 : f32
      %195 = vector.broadcast %cst_63 : f32 to vector<8x128xf32>
      %196 = arith.addf %195, %194 : vector<8x128xf32>
      %197 = arith.divf %195, %196 : vector<8x128xf32>
      %198 = arith.mulf %189, %123 : vector<8x128xf32>
      %199 = arith.mulf %183, %191 : vector<8x128xf32>
      %200 = arith.addf %198, %199 : vector<8x128xf32>
      %201 = math.tanh %200 : vector<8x128xf32>
      %202 = arith.mulf %197, %201 : vector<8x128xf32>
      %203 = arith.index_cast %169 : i32 to index
      %c0_64 = arith.constant 0 : index
      %c0_65 = arith.constant 0 : index
      %204 = vector.load %alloca_0[%203, %c0_64, %c0_65] : memref<8x8x512xbf16, #tpu.memory_space<vmem>>, vector<1x8x512xbf16>
      %205 = vector.shape_cast %204 : vector<1x8x512xbf16> to vector<8x512xbf16>
      %206 = arith.extf %205 : vector<8x512xbf16> to vector<8x512xf32>
      %207 = arith.truncf %158 : vector<8x128xf32> to vector<8x128xbf16>
      %c0_66 = arith.constant 0 : index
      %c0_67 = arith.constant 0 : index
      %208 = vector.load %arg5[%c0_66, %c0_67] : memref<128x512xbf16, #tpu.memory_space<vmem>>, vector<128x512xbf16>
      %cst_68 = arith.constant dense<0.000000e+00> : vector<8x512xf32>
      %209 = tpu.matmul %207, %208, %cst_68 {dimension_numbers = #tpu.dot_dimension_numbers<[1], [0], [0], [1], [0, 0, 1, 1], [], []>} : vector<8x128xbf16>, vector<128x512xbf16>, vector<8x512xf32> -> vector<8x512xf32>
      %210 = arith.addf %206, %209 : vector<8x512xf32>
      %211 = vector.extract_strided_slice %210 {offsets = [0, 0], sizes = [8, 128], strides = [1, 1]} : vector<8x512xf32> to vector<8x128xf32>
      %212 = arith.negf %211 : vector<8x128xf32>
      %213 = math.exp %212 : vector<8x128xf32>
      %cst_69 = arith.constant 1.000000e+00 : f32
      %214 = vector.broadcast %cst_69 : f32 to vector<8x128xf32>
      %215 = arith.addf %214, %213 : vector<8x128xf32>
      %216 = arith.divf %214, %215 : vector<8x128xf32>
      %217 = vector.extract_strided_slice %210 {offsets = [0, 128], sizes = [8, 128], strides = [1, 1]} : vector<8x512xf32> to vector<8x128xf32>
      %218 = arith.negf %217 : vector<8x128xf32>
      %219 = math.exp %218 : vector<8x128xf32>
      %cst_70 = arith.constant 1.000000e+00 : f32
      %220 = vector.broadcast %cst_70 : f32 to vector<8x128xf32>
      %221 = arith.addf %220, %219 : vector<8x128xf32>
      %222 = arith.divf %220, %221 : vector<8x128xf32>
      %223 = vector.extract_strided_slice %210 {offsets = [0, 256], sizes = [8, 128], strides = [1, 1]} : vector<8x512xf32> to vector<8x128xf32>
      %224 = math.tanh %223 : vector<8x128xf32>
      %225 = vector.extract_strided_slice %210 {offsets = [0, 384], sizes = [8, 128], strides = [1, 1]} : vector<8x512xf32> to vector<8x128xf32>
      %226 = arith.negf %225 : vector<8x128xf32>
      %227 = math.exp %226 : vector<8x128xf32>
      %cst_71 = arith.constant 1.000000e+00 : f32
      %228 = vector.broadcast %cst_71 : f32 to vector<8x128xf32>
      %229 = arith.addf %228, %227 : vector<8x128xf32>
      %230 = arith.divf %228, %229 : vector<8x128xf32>
      %231 = arith.mulf %222, %156 : vector<8x128xf32>
      %232 = arith.mulf %216, %224 : vector<8x128xf32>
      %233 = arith.addf %231, %232 : vector<8x128xf32>
      %234 = math.tanh %233 : vector<8x128xf32>
      %235 = arith.mulf %230, %234 : vector<8x128xf32>
      %236 = arith.truncf %202 : vector<8x128xf32> to vector<8x128xbf16>
      %237 = arith.index_cast %c2_i32 : i32 to index
      %c0_72 = arith.constant 0 : index
      %c0_73 = arith.constant 0 : index
      %238 = vector.load %arg14[%237, %c0_72, %c0_73] : memref<8x8x128xbf16, #tpu.memory_space<vmem>>, vector<1x8x128xbf16>
      %239 = vector.shape_cast %238 : vector<1x8x128xbf16> to vector<8x128xbf16>
      %240 = vector.shape_cast %236 : vector<8x128xbf16> to vector<1x8x128xbf16>
      tpu.vector_store %arg14[%237, %c0_72, %c0_73], %240 {strides = array<i32>} : memref<8x8x128xbf16, #tpu.memory_space<vmem>>, vector<1x8x128xbf16>,
      %241 = arith.truncf %235 : vector<8x128xf32> to vector<8x128xbf16>
      %242 = arith.index_cast %169 : i32 to index
      %c0_74 = arith.constant 0 : index
      %c0_75 = arith.constant 0 : index
      %243 = vector.load %arg15[%242, %c0_74, %c0_75] : memref<8x8x128xbf16, #tpu.memory_space<vmem>>, vector<1x8x128xbf16>
      %244 = vector.shape_cast %243 : vector<1x8x128xbf16> to vector<8x128xbf16>
      %245 = vector.shape_cast %241 : vector<8x128xbf16> to vector<1x8x128xbf16>
      tpu.vector_store %arg15[%242, %c0_74, %c0_75], %245 {strides = array<i32>} : memref<8x8x128xbf16, #tpu.memory_space<vmem>>, vector<1x8x128xbf16>,
      %c3_i32 = arith.constant 3 : i32
      %c7_i32_76 = arith.constant 7 : i32
      %246 = arith.subi %c7_i32_76, %c3_i32 : i32
      %247 = arith.index_cast %c3_i32 : i32 to index
      %c0_77 = arith.constant 0 : index
      %c0_78 = arith.constant 0 : index
      %248 = vector.load %alloca[%247, %c0_77, %c0_78] : memref<8x8x512xbf16, #tpu.memory_space<vmem>>, vector<1x8x512xbf16>
      %249 = vector.shape_cast %248 : vector<1x8x512xbf16> to vector<8x512xbf16>
      %250 = arith.extf %249 : vector<8x512xbf16> to vector<8x512xf32>
      %251 = arith.truncf %202 : vector<8x128xf32> to vector<8x128xbf16>
      %c0_79 = arith.constant 0 : index
      %c0_80 = arith.constant 0 : index
      %252 = vector.load %arg4[%c0_79, %c0_80] : memref<128x512xbf16, #tpu.memory_space<vmem>>, vector<128x512xbf16>
      %cst_81 = arith.constant dense<0.000000e+00> : vector<8x512xf32>
      %253 = tpu.matmul %251, %252, %cst_81 {dimension_numbers = #tpu.dot_dimension_numbers<[1], [0], [0], [1], [0, 0, 1, 1], [], []>} : vector<8x128xbf16>, vector<128x512xbf16>, vector<8x512xf32> -> vector<8x512xf32>
      %254 = arith.addf %250, %253 : vector<8x512xf32>
      %255 = vector.extract_strided_slice %254 {offsets = [0, 0], sizes = [8, 128], strides = [1, 1]} : vector<8x512xf32> to vector<8x128xf32>
      %256 = arith.negf %255 : vector<8x128xf32>
      %257 = math.exp %256 : vector<8x128xf32>
      %cst_82 = arith.constant 1.000000e+00 : f32
      %258 = vector.broadcast %cst_82 : f32 to vector<8x128xf32>
      %259 = arith.addf %258, %257 : vector<8x128xf32>
      %260 = arith.divf %258, %259 : vector<8x128xf32>
      %261 = vector.extract_strided_slice %254 {offsets = [0, 128], sizes = [8, 128], strides = [1, 1]} : vector<8x512xf32> to vector<8x128xf32>
      %262 = arith.negf %261 : vector<8x128xf32>
      %263 = math.exp %262 : vector<8x128xf32>
      %cst_83 = arith.constant 1.000000e+00 : f32
      %264 = vector.broadcast %cst_83 : f32 to vector<8x128xf32>
      %265 = arith.addf %264, %263 : vector<8x128xf32>
      %266 = arith.divf %264, %265 : vector<8x128xf32>
      %267 = vector.extract_strided_slice %254 {offsets = [0, 256], sizes = [8, 128], strides = [1, 1]} : vector<8x512xf32> to vector<8x128xf32>
      %268 = math.tanh %267 : vector<8x128xf32>
      %269 = vector.extract_strided_slice %254 {offsets = [0, 384], sizes = [8, 128], strides = [1, 1]} : vector<8x512xf32> to vector<8x128xf32>
      %270 = arith.negf %269 : vector<8x128xf32>
      %271 = math.exp %270 : vector<8x128xf32>
      %cst_84 = arith.constant 1.000000e+00 : f32
      %272 = vector.broadcast %cst_84 : f32 to vector<8x128xf32>
      %273 = arith.addf %272, %271 : vector<8x128xf32>
      %274 = arith.divf %272, %273 : vector<8x128xf32>
      %275 = arith.mulf %266, %200 : vector<8x128xf32>
      %276 = arith.mulf %260, %268 : vector<8x128xf32>
      %277 = arith.addf %275, %276 : vector<8x128xf32>
      %278 = math.tanh %277 : vector<8x128xf32>
      %279 = arith.mulf %274, %278 : vector<8x128xf32>
      %280 = arith.index_cast %246 : i32 to index
      %c0_85 = arith.constant 0 : index
      %c0_86 = arith.constant 0 : index
      %281 = vector.load %alloca_0[%280, %c0_85, %c0_86] : memref<8x8x512xbf16, #tpu.memory_space<vmem>>, vector<1x8x512xbf16>
      %282 = vector.shape_cast %281 : vector<1x8x512xbf16> to vector<8x512xbf16>
      %283 = arith.extf %282 : vector<8x512xbf16> to vector<8x512xf32>
      %284 = arith.truncf %235 : vector<8x128xf32> to vector<8x128xbf16>
      %c0_87 = arith.constant 0 : index
      %c0_88 = arith.constant 0 : index
      %285 = vector.load %arg5[%c0_87, %c0_88] : memref<128x512xbf16, #tpu.memory_space<vmem>>, vector<128x512xbf16>
      %cst_89 = arith.constant dense<0.000000e+00> : vector<8x512xf32>
      %286 = tpu.matmul %284, %285, %cst_89 {dimension_numbers = #tpu.dot_dimension_numbers<[1], [0], [0], [1], [0, 0, 1, 1], [], []>} : vector<8x128xbf16>, vector<128x512xbf16>, vector<8x512xf32> -> vector<8x512xf32>
      %287 = arith.addf %283, %286 : vector<8x512xf32>
      %288 = vector.extract_strided_slice %287 {offsets = [0, 0], sizes = [8, 128], strides = [1, 1]} : vector<8x512xf32> to vector<8x128xf32>
      %289 = arith.negf %288 : vector<8x128xf32>
      %290 = math.exp %289 : vector<8x128xf32>
      %cst_90 = arith.constant 1.000000e+00 : f32
      %291 = vector.broadcast %cst_90 : f32 to vector<8x128xf32>
      %292 = arith.addf %291, %290 : vector<8x128xf32>
      %293 = arith.divf %291, %292 : vector<8x128xf32>
      %294 = vector.extract_strided_slice %287 {offsets = [0, 128], sizes = [8, 128], strides = [1, 1]} : vector<8x512xf32> to vector<8x128xf32>
      %295 = arith.negf %294 : vector<8x128xf32>
      %296 = math.exp %295 : vector<8x128xf32>
      %cst_91 = arith.constant 1.000000e+00 : f32
      %297 = vector.broadcast %cst_91 : f32 to vector<8x128xf32>
      %298 = arith.addf %297, %296 : vector<8x128xf32>
      %299 = arith.divf %297, %298 : vector<8x128xf32>
      %300 = vector.extract_strided_slice %287 {offsets = [0, 256], sizes = [8, 128], strides = [1, 1]} : vector<8x512xf32> to vector<8x128xf32>
      %301 = math.tanh %300 : vector<8x128xf32>
      %302 = vector.extract_strided_slice %287 {offsets = [0, 384], sizes = [8, 128], strides = [1, 1]} : vector<8x512xf32> to vector<8x128xf32>
      %303 = arith.negf %302 : vector<8x128xf32>
      %304 = math.exp %303 : vector<8x128xf32>
      %cst_92 = arith.constant 1.000000e+00 : f32
      %305 = vector.broadcast %cst_92 : f32 to vector<8x128xf32>
      %306 = arith.addf %305, %304 : vector<8x128xf32>
      %307 = arith.divf %305, %306 : vector<8x128xf32>
      %308 = arith.mulf %299, %233 : vector<8x128xf32>
      %309 = arith.mulf %293, %301 : vector<8x128xf32>
      %310 = arith.addf %308, %309 : vector<8x128xf32>
      %311 = math.tanh %310 : vector<8x128xf32>
      %312 = arith.mulf %307, %311 : vector<8x128xf32>
      %313 = arith.truncf %279 : vector<8x128xf32> to vector<8x128xbf16>
      %314 = arith.index_cast %c3_i32 : i32 to index
      %c0_93 = arith.constant 0 : index
      %c0_94 = arith.constant 0 : index
      %315 = vector.load %arg14[%314, %c0_93, %c0_94] : memref<8x8x128xbf16, #tpu.memory_space<vmem>>, vector<1x8x128xbf16>
      %316 = vector.shape_cast %315 : vector<1x8x128xbf16> to vector<8x128xbf16>
      %317 = vector.shape_cast %313 : vector<8x128xbf16> to vector<1x8x128xbf16>
      tpu.vector_store %arg14[%314, %c0_93, %c0_94], %317 {strides = array<i32>} : memref<8x8x128xbf16, #tpu.memory_space<vmem>>, vector<1x8x128xbf16>,
      %318 = arith.truncf %312 : vector<8x128xf32> to vector<8x128xbf16>
      %319 = arith.index_cast %246 : i32 to index
      %c0_95 = arith.constant 0 : index
      %c0_96 = arith.constant 0 : index
      %320 = vector.load %arg15[%319, %c0_95, %c0_96] : memref<8x8x128xbf16, #tpu.memory_space<vmem>>, vector<1x8x128xbf16>
      %321 = vector.shape_cast %320 : vector<1x8x128xbf16> to vector<8x128xbf16>
      %322 = vector.shape_cast %318 : vector<8x128xbf16> to vector<1x8x128xbf16>
      tpu.vector_store %arg15[%319, %c0_95, %c0_96], %322 {strides = array<i32>} : memref<8x8x128xbf16, #tpu.memory_space<vmem>>, vector<1x8x128xbf16>,
      %c4_i32 = arith.constant 4 : i32
      %c7_i32_97 = arith.constant 7 : i32
      %323 = arith.subi %c7_i32_97, %c4_i32 : i32
      %324 = arith.index_cast %c4_i32 : i32 to index
      %c0_98 = arith.constant 0 : index
      %c0_99 = arith.constant 0 : index
      %325 = vector.load %alloca[%324, %c0_98, %c0_99] : memref<8x8x512xbf16, #tpu.memory_space<vmem>>, vector<1x8x512xbf16>
      %326 = vector.shape_cast %325 : vector<1x8x512xbf16> to vector<8x512xbf16>
      %327 = arith.extf %326 : vector<8x512xbf16> to vector<8x512xf32>
      %328 = arith.truncf %279 : vector<8x128xf32> to vector<8x128xbf16>
      %c0_100 = arith.constant 0 : index
      %c0_101 = arith.constant 0 : index
      %329 = vector.load %arg4[%c0_100, %c0_101] : memref<128x512xbf16, #tpu.memory_space<vmem>>, vector<128x512xbf16>
      %cst_102 = arith.constant dense<0.000000e+00> : vector<8x512xf32>
      %330 = tpu.matmul %328, %329, %cst_102 {dimension_numbers = #tpu.dot_dimension_numbers<[1], [0], [0], [1], [0, 0, 1, 1], [], []>} : vector<8x128xbf16>, vector<128x512xbf16>, vector<8x512xf32> -> vector<8x512xf32>
      %331 = arith.addf %327, %330 : vector<8x512xf32>
      %332 = vector.extract_strided_slice %331 {offsets = [0, 0], sizes = [8, 128], strides = [1, 1]} : vector<8x512xf32> to vector<8x128xf32>
      %333 = arith.negf %332 : vector<8x128xf32>
      %334 = math.exp %333 : vector<8x128xf32>
      %cst_103 = arith.constant 1.000000e+00 : f32
      %335 = vector.broadcast %cst_103 : f32 to vector<8x128xf32>
      %336 = arith.addf %335, %334 : vector<8x128xf32>
      %337 = arith.divf %335, %336 : vector<8x128xf32>
      %338 = vector.extract_strided_slice %331 {offsets = [0, 128], sizes = [8, 128], strides = [1, 1]} : vector<8x512xf32> to vector<8x128xf32>
      %339 = arith.negf %338 : vector<8x128xf32>
      %340 = math.exp %339 : vector<8x128xf32>
      %cst_104 = arith.constant 1.000000e+00 : f32
      %341 = vector.broadcast %cst_104 : f32 to vector<8x128xf32>
      %342 = arith.addf %341, %340 : vector<8x128xf32>
      %343 = arith.divf %341, %342 : vector<8x128xf32>
      %344 = vector.extract_strided_slice %331 {offsets = [0, 256], sizes = [8, 128], strides = [1, 1]} : vector<8x512xf32> to vector<8x128xf32>
      %345 = math.tanh %344 : vector<8x128xf32>
      %346 = vector.extract_strided_slice %331 {offsets = [0, 384], sizes = [8, 128], strides = [1, 1]} : vector<8x512xf32> to vector<8x128xf32>
      %347 = arith.negf %346 : vector<8x128xf32>
      %348 = math.exp %347 : vector<8x128xf32>
      %cst_105 = arith.constant 1.000000e+00 : f32
      %349 = vector.broadcast %cst_105 : f32 to vector<8x128xf32>
      %350 = arith.addf %349, %348 : vector<8x128xf32>
      %351 = arith.divf %349, %350 : vector<8x128xf32>
      %352 = arith.mulf %343, %277 : vector<8x128xf32>
      %353 = arith.mulf %337, %345 : vector<8x128xf32>
      %354 = arith.addf %352, %353 : vector<8x128xf32>
      %355 = math.tanh %354 : vector<8x128xf32>
      %356 = arith.mulf %351, %355 : vector<8x128xf32>
      %357 = arith.index_cast %323 : i32 to index
      %c0_106 = arith.constant 0 : index
      %c0_107 = arith.constant 0 : index
      %358 = vector.load %alloca_0[%357, %c0_106, %c0_107] : memref<8x8x512xbf16, #tpu.memory_space<vmem>>, vector<1x8x512xbf16>
      %359 = vector.shape_cast %358 : vector<1x8x512xbf16> to vector<8x512xbf16>
      %360 = arith.extf %359 : vector<8x512xbf16> to vector<8x512xf32>
      %361 = arith.truncf %312 : vector<8x128xf32> to vector<8x128xbf16>
      %c0_108 = arith.constant 0 : index
      %c0_109 = arith.constant 0 : index
      %362 = vector.load %arg5[%c0_108, %c0_109] : memref<128x512xbf16, #tpu.memory_space<vmem>>, vector<128x512xbf16>
      %cst_110 = arith.constant dense<0.000000e+00> : vector<8x512xf32>
      %363 = tpu.matmul %361, %362, %cst_110 {dimension_numbers = #tpu.dot_dimension_numbers<[1], [0], [0], [1], [0, 0, 1, 1], [], []>} : vector<8x128xbf16>, vector<128x512xbf16>, vector<8x512xf32> -> vector<8x512xf32>
      %364 = arith.addf %360, %363 : vector<8x512xf32>
      %365 = vector.extract_strided_slice %364 {offsets = [0, 0], sizes = [8, 128], strides = [1, 1]} : vector<8x512xf32> to vector<8x128xf32>
      %366 = arith.negf %365 : vector<8x128xf32>
      %367 = math.exp %366 : vector<8x128xf32>
      %cst_111 = arith.constant 1.000000e+00 : f32
      %368 = vector.broadcast %cst_111 : f32 to vector<8x128xf32>
      %369 = arith.addf %368, %367 : vector<8x128xf32>
      %370 = arith.divf %368, %369 : vector<8x128xf32>
      %371 = vector.extract_strided_slice %364 {offsets = [0, 128], sizes = [8, 128], strides = [1, 1]} : vector<8x512xf32> to vector<8x128xf32>
      %372 = arith.negf %371 : vector<8x128xf32>
      %373 = math.exp %372 : vector<8x128xf32>
      %cst_112 = arith.constant 1.000000e+00 : f32
      %374 = vector.broadcast %cst_112 : f32 to vector<8x128xf32>
      %375 = arith.addf %374, %373 : vector<8x128xf32>
      %376 = arith.divf %374, %375 : vector<8x128xf32>
      %377 = vector.extract_strided_slice %364 {offsets = [0, 256], sizes = [8, 128], strides = [1, 1]} : vector<8x512xf32> to vector<8x128xf32>
      %378 = math.tanh %377 : vector<8x128xf32>
      %379 = vector.extract_strided_slice %364 {offsets = [0, 384], sizes = [8, 128], strides = [1, 1]} : vector<8x512xf32> to vector<8x128xf32>
      %380 = arith.negf %379 : vector<8x128xf32>
      %381 = math.exp %380 : vector<8x128xf32>
      %cst_113 = arith.constant 1.000000e+00 : f32
      %382 = vector.broadcast %cst_113 : f32 to vector<8x128xf32>
      %383 = arith.addf %382, %381 : vector<8x128xf32>
      %384 = arith.divf %382, %383 : vector<8x128xf32>
      %385 = arith.mulf %376, %310 : vector<8x128xf32>
      %386 = arith.mulf %370, %378 : vector<8x128xf32>
      %387 = arith.addf %385, %386 : vector<8x128xf32>
      %388 = math.tanh %387 : vector<8x128xf32>
      %389 = arith.mulf %384, %388 : vector<8x128xf32>
      %390 = arith.truncf %356 : vector<8x128xf32> to vector<8x128xbf16>
      %391 = arith.index_cast %c4_i32 : i32 to index
      %c0_114 = arith.constant 0 : index
      %c0_115 = arith.constant 0 : index
      %392 = vector.load %arg14[%391, %c0_114, %c0_115] : memref<8x8x128xbf16, #tpu.memory_space<vmem>>, vector<1x8x128xbf16>
      %393 = vector.shape_cast %392 : vector<1x8x128xbf16> to vector<8x128xbf16>
      %394 = vector.shape_cast %390 : vector<8x128xbf16> to vector<1x8x128xbf16>
      tpu.vector_store %arg14[%391, %c0_114, %c0_115], %394 {strides = array<i32>} : memref<8x8x128xbf16, #tpu.memory_space<vmem>>, vector<1x8x128xbf16>,
      %395 = arith.truncf %389 : vector<8x128xf32> to vector<8x128xbf16>
      %396 = arith.index_cast %323 : i32 to index
      %c0_116 = arith.constant 0 : index
      %c0_117 = arith.constant 0 : index
      %397 = vector.load %arg15[%396, %c0_116, %c0_117] : memref<8x8x128xbf16, #tpu.memory_space<vmem>>, vector<1x8x128xbf16>
      %398 = vector.shape_cast %397 : vector<1x8x128xbf16> to vector<8x128xbf16>
      %399 = vector.shape_cast %395 : vector<8x128xbf16> to vector<1x8x128xbf16>
      tpu.vector_store %arg15[%396, %c0_116, %c0_117], %399 {strides = array<i32>} : memref<8x8x128xbf16, #tpu.memory_space<vmem>>, vector<1x8x128xbf16>,
      %c5_i32 = arith.constant 5 : i32
      %c7_i32_118 = arith.constant 7 : i32
      %400 = arith.subi %c7_i32_118, %c5_i32 : i32
      %401 = arith.index_cast %c5_i32 : i32 to index
      %c0_119 = arith.constant 0 : index
      %c0_120 = arith.constant 0 : index
      %402 = vector.load %alloca[%401, %c0_119, %c0_120] : memref<8x8x512xbf16, #tpu.memory_space<vmem>>, vector<1x8x512xbf16>
      %403 = vector.shape_cast %402 : vector<1x8x512xbf16> to vector<8x512xbf16>
      %404 = arith.extf %403 : vector<8x512xbf16> to vector<8x512xf32>
      %405 = arith.truncf %356 : vector<8x128xf32> to vector<8x128xbf16>
      %c0_121 = arith.constant 0 : index
      %c0_122 = arith.constant 0 : index
      %406 = vector.load %arg4[%c0_121, %c0_122] : memref<128x512xbf16, #tpu.memory_space<vmem>>, vector<128x512xbf16>
      %cst_123 = arith.constant dense<0.000000e+00> : vector<8x512xf32>
      %407 = tpu.matmul %405, %406, %cst_123 {dimension_numbers = #tpu.dot_dimension_numbers<[1], [0], [0], [1], [0, 0, 1, 1], [], []>} : vector<8x128xbf16>, vector<128x512xbf16>, vector<8x512xf32> -> vector<8x512xf32>
      %408 = arith.addf %404, %407 : vector<8x512xf32>
      %409 = vector.extract_strided_slice %408 {offsets = [0, 0], sizes = [8, 128], strides = [1, 1]} : vector<8x512xf32> to vector<8x128xf32>
      %410 = arith.negf %409 : vector<8x128xf32>
      %411 = math.exp %410 : vector<8x128xf32>
      %cst_124 = arith.constant 1.000000e+00 : f32
      %412 = vector.broadcast %cst_124 : f32 to vector<8x128xf32>
      %413 = arith.addf %412, %411 : vector<8x128xf32>
      %414 = arith.divf %412, %413 : vector<8x128xf32>
      %415 = vector.extract_strided_slice %408 {offsets = [0, 128], sizes = [8, 128], strides = [1, 1]} : vector<8x512xf32> to vector<8x128xf32>
      %416 = arith.negf %415 : vector<8x128xf32>
      %417 = math.exp %416 : vector<8x128xf32>
      %cst_125 = arith.constant 1.000000e+00 : f32
      %418 = vector.broadcast %cst_125 : f32 to vector<8x128xf32>
      %419 = arith.addf %418, %417 : vector<8x128xf32>
      %420 = arith.divf %418, %419 : vector<8x128xf32>
      %421 = vector.extract_strided_slice %408 {offsets = [0, 256], sizes = [8, 128], strides = [1, 1]} : vector<8x512xf32> to vector<8x128xf32>
      %422 = math.tanh %421 : vector<8x128xf32>
      %423 = vector.extract_strided_slice %408 {offsets = [0, 384], sizes = [8, 128], strides = [1, 1]} : vector<8x512xf32> to vector<8x128xf32>
      %424 = arith.negf %423 : vector<8x128xf32>
      %425 = math.exp %424 : vector<8x128xf32>
      %cst_126 = arith.constant 1.000000e+00 : f32
      %426 = vector.broadcast %cst_126 : f32 to vector<8x128xf32>
      %427 = arith.addf %426, %425 : vector<8x128xf32>
      %428 = arith.divf %426, %427 : vector<8x128xf32>
      %429 = arith.mulf %420, %354 : vector<8x128xf32>
      %430 = arith.mulf %414, %422 : vector<8x128xf32>
      %431 = arith.addf %429, %430 : vector<8x128xf32>
      %432 = math.tanh %431 : vector<8x128xf32>
      %433 = arith.mulf %428, %432 : vector<8x128xf32>
      %434 = arith.index_cast %400 : i32 to index
      %c0_127 = arith.constant 0 : index
      %c0_128 = arith.constant 0 : index
      %435 = vector.load %alloca_0[%434, %c0_127, %c0_128] : memref<8x8x512xbf16, #tpu.memory_space<vmem>>, vector<1x8x512xbf16>
      %436 = vector.shape_cast %435 : vector<1x8x512xbf16> to vector<8x512xbf16>
      %437 = arith.extf %436 : vector<8x512xbf16> to vector<8x512xf32>
      %438 = arith.truncf %389 : vector<8x128xf32> to vector<8x128xbf16>
      %c0_129 = arith.constant 0 : index
      %c0_130 = arith.constant 0 : index
      %439 = vector.load %arg5[%c0_129, %c0_130] : memref<128x512xbf16, #tpu.memory_space<vmem>>, vector<128x512xbf16>
      %cst_131 = arith.constant dense<0.000000e+00> : vector<8x512xf32>
      %440 = tpu.matmul %438, %439, %cst_131 {dimension_numbers = #tpu.dot_dimension_numbers<[1], [0], [0], [1], [0, 0, 1, 1], [], []>} : vector<8x128xbf16>, vector<128x512xbf16>, vector<8x512xf32> -> vector<8x512xf32>
      %441 = arith.addf %437, %440 : vector<8x512xf32>
      %442 = vector.extract_strided_slice %441 {offsets = [0, 0], sizes = [8, 128], strides = [1, 1]} : vector<8x512xf32> to vector<8x128xf32>
      %443 = arith.negf %442 : vector<8x128xf32>
      %444 = math.exp %443 : vector<8x128xf32>
      %cst_132 = arith.constant 1.000000e+00 : f32
      %445 = vector.broadcast %cst_132 : f32 to vector<8x128xf32>
      %446 = arith.addf %445, %444 : vector<8x128xf32>
      %447 = arith.divf %445, %446 : vector<8x128xf32>
      %448 = vector.extract_strided_slice %441 {offsets = [0, 128], sizes = [8, 128], strides = [1, 1]} : vector<8x512xf32> to vector<8x128xf32>
      %449 = arith.negf %448 : vector<8x128xf32>
      %450 = math.exp %449 : vector<8x128xf32>
      %cst_133 = arith.constant 1.000000e+00 : f32
      %451 = vector.broadcast %cst_133 : f32 to vector<8x128xf32>
      %452 = arith.addf %451, %450 : vector<8x128xf32>
      %453 = arith.divf %451, %452 : vector<8x128xf32>
      %454 = vector.extract_strided_slice %441 {offsets = [0, 256], sizes = [8, 128], strides = [1, 1]} : vector<8x512xf32> to vector<8x128xf32>
      %455 = math.tanh %454 : vector<8x128xf32>
      %456 = vector.extract_strided_slice %441 {offsets = [0, 384], sizes = [8, 128], strides = [1, 1]} : vector<8x512xf32> to vector<8x128xf32>
      %457 = arith.negf %456 : vector<8x128xf32>
      %458 = math.exp %457 : vector<8x128xf32>
      %cst_134 = arith.constant 1.000000e+00 : f32
      %459 = vector.broadcast %cst_134 : f32 to vector<8x128xf32>
      %460 = arith.addf %459, %458 : vector<8x128xf32>
      %461 = arith.divf %459, %460 : vector<8x128xf32>
      %462 = arith.mulf %453, %387 : vector<8x128xf32>
      %463 = arith.mulf %447, %455 : vector<8x128xf32>
      %464 = arith.addf %462, %463 : vector<8x128xf32>
      %465 = math.tanh %464 : vector<8x128xf32>
      %466 = arith.mulf %461, %465 : vector<8x128xf32>
      %467 = arith.truncf %433 : vector<8x128xf32> to vector<8x128xbf16>
      %468 = arith.index_cast %c5_i32 : i32 to index
      %c0_135 = arith.constant 0 : index
      %c0_136 = arith.constant 0 : index
      %469 = vector.load %arg14[%468, %c0_135, %c0_136] : memref<8x8x128xbf16, #tpu.memory_space<vmem>>, vector<1x8x128xbf16>
      %470 = vector.shape_cast %469 : vector<1x8x128xbf16> to vector<8x128xbf16>
      %471 = vector.shape_cast %467 : vector<8x128xbf16> to vector<1x8x128xbf16>
      tpu.vector_store %arg14[%468, %c0_135, %c0_136], %471 {strides = array<i32>} : memref<8x8x128xbf16, #tpu.memory_space<vmem>>, vector<1x8x128xbf16>,
      %472 = arith.truncf %466 : vector<8x128xf32> to vector<8x128xbf16>
      %473 = arith.index_cast %400 : i32 to index
      %c0_137 = arith.constant 0 : index
      %c0_138 = arith.constant 0 : index
      %474 = vector.load %arg15[%473, %c0_137, %c0_138] : memref<8x8x128xbf16, #tpu.memory_space<vmem>>, vector<1x8x128xbf16>
      %475 = vector.shape_cast %474 : vector<1x8x128xbf16> to vector<8x128xbf16>
      %476 = vector.shape_cast %472 : vector<8x128xbf16> to vector<1x8x128xbf16>
      tpu.vector_store %arg15[%473, %c0_137, %c0_138], %476 {strides = array<i32>} : memref<8x8x128xbf16, #tpu.memory_space<vmem>>, vector<1x8x128xbf16>,
      %c6_i32 = arith.constant 6 : i32
      %c7_i32_139 = arith.constant 7 : i32
      %477 = arith.subi %c7_i32_139, %c6_i32 : i32
      %478 = arith.index_cast %c6_i32 : i32 to index
      %c0_140 = arith.constant 0 : index
      %c0_141 = arith.constant 0 : index
      %479 = vector.load %alloca[%478, %c0_140, %c0_141] : memref<8x8x512xbf16, #tpu.memory_space<vmem>>, vector<1x8x512xbf16>
      %480 = vector.shape_cast %479 : vector<1x8x512xbf16> to vector<8x512xbf16>
      %481 = arith.extf %480 : vector<8x512xbf16> to vector<8x512xf32>
      %482 = arith.truncf %433 : vector<8x128xf32> to vector<8x128xbf16>
      %c0_142 = arith.constant 0 : index
      %c0_143 = arith.constant 0 : index
      %483 = vector.load %arg4[%c0_142, %c0_143] : memref<128x512xbf16, #tpu.memory_space<vmem>>, vector<128x512xbf16>
      %cst_144 = arith.constant dense<0.000000e+00> : vector<8x512xf32>
      %484 = tpu.matmul %482, %483, %cst_144 {dimension_numbers = #tpu.dot_dimension_numbers<[1], [0], [0], [1], [0, 0, 1, 1], [], []>} : vector<8x128xbf16>, vector<128x512xbf16>, vector<8x512xf32> -> vector<8x512xf32>
      %485 = arith.addf %481, %484 : vector<8x512xf32>
      %486 = vector.extract_strided_slice %485 {offsets = [0, 0], sizes = [8, 128], strides = [1, 1]} : vector<8x512xf32> to vector<8x128xf32>
      %487 = arith.negf %486 : vector<8x128xf32>
      %488 = math.exp %487 : vector<8x128xf32>
      %cst_145 = arith.constant 1.000000e+00 : f32
      %489 = vector.broadcast %cst_145 : f32 to vector<8x128xf32>
      %490 = arith.addf %489, %488 : vector<8x128xf32>
      %491 = arith.divf %489, %490 : vector<8x128xf32>
      %492 = vector.extract_strided_slice %485 {offsets = [0, 128], sizes = [8, 128], strides = [1, 1]} : vector<8x512xf32> to vector<8x128xf32>
      %493 = arith.negf %492 : vector<8x128xf32>
      %494 = math.exp %493 : vector<8x128xf32>
      %cst_146 = arith.constant 1.000000e+00 : f32
      %495 = vector.broadcast %cst_146 : f32 to vector<8x128xf32>
      %496 = arith.addf %495, %494 : vector<8x128xf32>
      %497 = arith.divf %495, %496 : vector<8x128xf32>
      %498 = vector.extract_strided_slice %485 {offsets = [0, 256], sizes = [8, 128], strides = [1, 1]} : vector<8x512xf32> to vector<8x128xf32>
      %499 = math.tanh %498 : vector<8x128xf32>
      %500 = vector.extract_strided_slice %485 {offsets = [0, 384], sizes = [8, 128], strides = [1, 1]} : vector<8x512xf32> to vector<8x128xf32>
      %501 = arith.negf %500 : vector<8x128xf32>
      %502 = math.exp %501 : vector<8x128xf32>
      %cst_147 = arith.constant 1.000000e+00 : f32
      %503 = vector.broadcast %cst_147 : f32 to vector<8x128xf32>
      %504 = arith.addf %503, %502 : vector<8x128xf32>
      %505 = arith.divf %503, %504 : vector<8x128xf32>
      %506 = arith.mulf %497, %431 : vector<8x128xf32>
      %507 = arith.mulf %491, %499 : vector<8x128xf32>
      %508 = arith.addf %506, %507 : vector<8x128xf32>
      %509 = math.tanh %508 : vector<8x128xf32>
      %510 = arith.mulf %505, %509 : vector<8x128xf32>
      %511 = arith.index_cast %477 : i32 to index
      %c0_148 = arith.constant 0 : index
      %c0_149 = arith.constant 0 : index
      %512 = vector.load %alloca_0[%511, %c0_148, %c0_149] : memref<8x8x512xbf16, #tpu.memory_space<vmem>>, vector<1x8x512xbf16>
      %513 = vector.shape_cast %512 : vector<1x8x512xbf16> to vector<8x512xbf16>
      %514 = arith.extf %513 : vector<8x512xbf16> to vector<8x512xf32>
      %515 = arith.truncf %466 : vector<8x128xf32> to vector<8x128xbf16>
      %c0_150 = arith.constant 0 : index
      %c0_151 = arith.constant 0 : index
      %516 = vector.load %arg5[%c0_150, %c0_151] : memref<128x512xbf16, #tpu.memory_space<vmem>>, vector<128x512xbf16>
      %cst_152 = arith.constant dense<0.000000e+00> : vector<8x512xf32>
      %517 = tpu.matmul %515, %516, %cst_152 {dimension_numbers = #tpu.dot_dimension_numbers<[1], [0], [0], [1], [0, 0, 1, 1], [], []>} : vector<8x128xbf16>, vector<128x512xbf16>, vector<8x512xf32> -> vector<8x512xf32>
      %518 = arith.addf %514, %517 : vector<8x512xf32>
      %519 = vector.extract_strided_slice %518 {offsets = [0, 0], sizes = [8, 128], strides = [1, 1]} : vector<8x512xf32> to vector<8x128xf32>
      %520 = arith.negf %519 : vector<8x128xf32>
      %521 = math.exp %520 : vector<8x128xf32>
      %cst_153 = arith.constant 1.000000e+00 : f32
      %522 = vector.broadcast %cst_153 : f32 to vector<8x128xf32>
      %523 = arith.addf %522, %521 : vector<8x128xf32>
      %524 = arith.divf %522, %523 : vector<8x128xf32>
      %525 = vector.extract_strided_slice %518 {offsets = [0, 128], sizes = [8, 128], strides = [1, 1]} : vector<8x512xf32> to vector<8x128xf32>
      %526 = arith.negf %525 : vector<8x128xf32>
      %527 = math.exp %526 : vector<8x128xf32>
      %cst_154 = arith.constant 1.000000e+00 : f32
      %528 = vector.broadcast %cst_154 : f32 to vector<8x128xf32>
      %529 = arith.addf %528, %527 : vector<8x128xf32>
      %530 = arith.divf %528, %529 : vector<8x128xf32>
      %531 = vector.extract_strided_slice %518 {offsets = [0, 256], sizes = [8, 128], strides = [1, 1]} : vector<8x512xf32> to vector<8x128xf32>
      %532 = math.tanh %531 : vector<8x128xf32>
      %533 = vector.extract_strided_slice %518 {offsets = [0, 384], sizes = [8, 128], strides = [1, 1]} : vector<8x512xf32> to vector<8x128xf32>
      %534 = arith.negf %533 : vector<8x128xf32>
      %535 = math.exp %534 : vector<8x128xf32>
      %cst_155 = arith.constant 1.000000e+00 : f32
      %536 = vector.broadcast %cst_155 : f32 to vector<8x128xf32>
      %537 = arith.addf %536, %535 : vector<8x128xf32>
      %538 = arith.divf %536, %537 : vector<8x128xf32>
      %539 = arith.mulf %530, %464 : vector<8x128xf32>
      %540 = arith.mulf %524, %532 : vector<8x128xf32>
      %541 = arith.addf %539, %540 : vector<8x128xf32>
      %542 = math.tanh %541 : vector<8x128xf32>
      %543 = arith.mulf %538, %542 : vector<8x128xf32>
      %544 = arith.truncf %510 : vector<8x128xf32> to vector<8x128xbf16>
      %545 = arith.index_cast %c6_i32 : i32 to index
      %c0_156 = arith.constant 0 : index
      %c0_157 = arith.constant 0 : index
      %546 = vector.load %arg14[%545, %c0_156, %c0_157] : memref<8x8x128xbf16, #tpu.memory_space<vmem>>, vector<1x8x128xbf16>
      %547 = vector.shape_cast %546 : vector<1x8x128xbf16> to vector<8x128xbf16>
      %548 = vector.shape_cast %544 : vector<8x128xbf16> to vector<1x8x128xbf16>
      tpu.vector_store %arg14[%545, %c0_156, %c0_157], %548 {strides = array<i32>} : memref<8x8x128xbf16, #tpu.memory_space<vmem>>, vector<1x8x128xbf16>,
      %549 = arith.truncf %543 : vector<8x128xf32> to vector<8x128xbf16>
      %550 = arith.index_cast %477 : i32 to index
      %c0_158 = arith.constant 0 : index
      %c0_159 = arith.constant 0 : index
      %551 = vector.load %arg15[%550, %c0_158, %c0_159] : memref<8x8x128xbf16, #tpu.memory_space<vmem>>, vector<1x8x128xbf16>
      %552 = vector.shape_cast %551 : vector<1x8x128xbf16> to vector<8x128xbf16>
      %553 = vector.shape_cast %549 : vector<8x128xbf16> to vector<1x8x128xbf16>
      tpu.vector_store %arg15[%550, %c0_158, %c0_159], %553 {strides = array<i32>} : memref<8x8x128xbf16, #tpu.memory_space<vmem>>, vector<1x8x128xbf16>,
      %c7_i32_160 = arith.constant 7 : i32
      %c7_i32_161 = arith.constant 7 : i32
      %554 = arith.subi %c7_i32_161, %c7_i32_160 : i32
      %555 = arith.index_cast %c7_i32_160 : i32 to index
      %c0_162 = arith.constant 0 : index
      %c0_163 = arith.constant 0 : index
      %556 = vector.load %alloca[%555, %c0_162, %c0_163] : memref<8x8x512xbf16, #tpu.memory_space<vmem>>, vector<1x8x512xbf16>
      %557 = vector.shape_cast %556 : vector<1x8x512xbf16> to vector<8x512xbf16>
      %558 = arith.extf %557 : vector<8x512xbf16> to vector<8x512xf32>
      %559 = arith.truncf %510 : vector<8x128xf32> to vector<8x128xbf16>
      %c0_164 = arith.constant 0 : index
      %c0_165 = arith.constant 0 : index
      %560 = vector.load %arg4[%c0_164, %c0_165] : memref<128x512xbf16, #tpu.memory_space<vmem>>, vector<128x512xbf16>
      %cst_166 = arith.constant dense<0.000000e+00> : vector<8x512xf32>
      %561 = tpu.matmul %559, %560, %cst_166 {dimension_numbers = #tpu.dot_dimension_numbers<[1], [0], [0], [1], [0, 0, 1, 1], [], []>} : vector<8x128xbf16>, vector<128x512xbf16>, vector<8x512xf32> -> vector<8x512xf32>
      %562 = arith.addf %558, %561 : vector<8x512xf32>
      %563 = vector.extract_strided_slice %562 {offsets = [0, 0], sizes = [8, 128], strides = [1, 1]} : vector<8x512xf32> to vector<8x128xf32>
      %564 = arith.negf %563 : vector<8x128xf32>
      %565 = math.exp %564 : vector<8x128xf32>
      %cst_167 = arith.constant 1.000000e+00 : f32
      %566 = vector.broadcast %cst_167 : f32 to vector<8x128xf32>
      %567 = arith.addf %566, %565 : vector<8x128xf32>
      %568 = arith.divf %566, %567 : vector<8x128xf32>
      %569 = vector.extract_strided_slice %562 {offsets = [0, 128], sizes = [8, 128], strides = [1, 1]} : vector<8x512xf32> to vector<8x128xf32>
      %570 = arith.negf %569 : vector<8x128xf32>
      %571 = math.exp %570 : vector<8x128xf32>
      %cst_168 = arith.constant 1.000000e+00 : f32
      %572 = vector.broadcast %cst_168 : f32 to vector<8x128xf32>
      %573 = arith.addf %572, %571 : vector<8x128xf32>
      %574 = arith.divf %572, %573 : vector<8x128xf32>
      %575 = vector.extract_strided_slice %562 {offsets = [0, 256], sizes = [8, 128], strides = [1, 1]} : vector<8x512xf32> to vector<8x128xf32>
      %576 = math.tanh %575 : vector<8x128xf32>
      %577 = vector.extract_strided_slice %562 {offsets = [0, 384], sizes = [8, 128], strides = [1, 1]} : vector<8x512xf32> to vector<8x128xf32>
      %578 = arith.negf %577 : vector<8x128xf32>
      %579 = math.exp %578 : vector<8x128xf32>
      %cst_169 = arith.constant 1.000000e+00 : f32
      %580 = vector.broadcast %cst_169 : f32 to vector<8x128xf32>
      %581 = arith.addf %580, %579 : vector<8x128xf32>
      %582 = arith.divf %580, %581 : vector<8x128xf32>
      %583 = arith.mulf %574, %508 : vector<8x128xf32>
      %584 = arith.mulf %568, %576 : vector<8x128xf32>
      %585 = arith.addf %583, %584 : vector<8x128xf32>
      %586 = math.tanh %585 : vector<8x128xf32>
      %587 = arith.mulf %582, %586 : vector<8x128xf32>
      %588 = arith.index_cast %554 : i32 to index
      %c0_170 = arith.constant 0 : index
      %c0_171 = arith.constant 0 : index
      %589 = vector.load %alloca_0[%588, %c0_170, %c0_171] : memref<8x8x512xbf16, #tpu.memory_space<vmem>>, vector<1x8x512xbf16>
      %590 = vector.shape_cast %589 : vector<1x8x512xbf16> to vector<8x512xbf16>
      %591 = arith.extf %590 : vector<8x512xbf16> to vector<8x512xf32>
      %592 = arith.truncf %543 : vector<8x128xf32> to vector<8x128xbf16>
      %c0_172 = arith.constant 0 : index
      %c0_173 = arith.constant 0 : index
      %593 = vector.load %arg5[%c0_172, %c0_173] : memref<128x512xbf16, #tpu.memory_space<vmem>>, vector<128x512xbf16>
      %cst_174 = arith.constant dense<0.000000e+00> : vector<8x512xf32>
      %594 = tpu.matmul %592, %593, %cst_174 {dimension_numbers = #tpu.dot_dimension_numbers<[1], [0], [0], [1], [0, 0, 1, 1], [], []>} : vector<8x128xbf16>, vector<128x512xbf16>, vector<8x512xf32> -> vector<8x512xf32>
      %595 = arith.addf %591, %594 : vector<8x512xf32>
      %596 = vector.extract_strided_slice %595 {offsets = [0, 0], sizes = [8, 128], strides = [1, 1]} : vector<8x512xf32> to vector<8x128xf32>
      %597 = arith.negf %596 : vector<8x128xf32>
      %598 = math.exp %597 : vector<8x128xf32>
      %cst_175 = arith.constant 1.000000e+00 : f32
      %599 = vector.broadcast %cst_175 : f32 to vector<8x128xf32>
      %600 = arith.addf %599, %598 : vector<8x128xf32>
      %601 = arith.divf %599, %600 : vector<8x128xf32>
      %602 = vector.extract_strided_slice %595 {offsets = [0, 128], sizes = [8, 128], strides = [1, 1]} : vector<8x512xf32> to vector<8x128xf32>
      %603 = arith.negf %602 : vector<8x128xf32>
      %604 = math.exp %603 : vector<8x128xf32>
      %cst_176 = arith.constant 1.000000e+00 : f32
      %605 = vector.broadcast %cst_176 : f32 to vector<8x128xf32>
      %606 = arith.addf %605, %604 : vector<8x128xf32>
      %607 = arith.divf %605, %606 : vector<8x128xf32>
      %608 = vector.extract_strided_slice %595 {offsets = [0, 256], sizes = [8, 128], strides = [1, 1]} : vector<8x512xf32> to vector<8x128xf32>
      %609 = math.tanh %608 : vector<8x128xf32>
      %610 = vector.extract_strided_slice %595 {offsets = [0, 384], sizes = [8, 128], strides = [1, 1]} : vector<8x512xf32> to vector<8x128xf32>
      %611 = arith.negf %610 : vector<8x128xf32>
      %612 = math.exp %611 : vector<8x128xf32>
      %cst_177 = arith.constant 1.000000e+00 : f32
      %613 = vector.broadcast %cst_177 : f32 to vector<8x128xf32>
      %614 = arith.addf %613, %612 : vector<8x128xf32>
      %615 = arith.divf %613, %614 : vector<8x128xf32>
      %616 = arith.mulf %607, %541 : vector<8x128xf32>
      %617 = arith.mulf %601, %609 : vector<8x128xf32>
      %618 = arith.addf %616, %617 : vector<8x128xf32>
      %619 = math.tanh %618 : vector<8x128xf32>
      %620 = arith.mulf %615, %619 : vector<8x128xf32>
      %621 = arith.truncf %587 : vector<8x128xf32> to vector<8x128xbf16>
      %622 = arith.index_cast %c7_i32_160 : i32 to index
      %c0_178 = arith.constant 0 : index
      %c0_179 = arith.constant 0 : index
      %623 = vector.load %arg14[%622, %c0_178, %c0_179] : memref<8x8x128xbf16, #tpu.memory_space<vmem>>, vector<1x8x128xbf16>
      %624 = vector.shape_cast %623 : vector<1x8x128xbf16> to vector<8x128xbf16>
      %625 = vector.shape_cast %621 : vector<8x128xbf16> to vector<1x8x128xbf16>
      tpu.vector_store %arg14[%622, %c0_178, %c0_179], %625 {strides = array<i32>} : memref<8x8x128xbf16, #tpu.memory_space<vmem>>, vector<1x8x128xbf16>,
      %626 = arith.truncf %620 : vector<8x128xf32> to vector<8x128xbf16>
      %627 = arith.index_cast %554 : i32 to index
      %c0_180 = arith.constant 0 : index
      %c0_181 = arith.constant 0 : index
      %628 = vector.load %arg15[%627, %c0_180, %c0_181] : memref<8x8x128xbf16, #tpu.memory_space<vmem>>, vector<1x8x128xbf16>
      %629 = vector.shape_cast %628 : vector<1x8x128xbf16> to vector<8x128xbf16>
      %630 = vector.shape_cast %626 : vector<8x128xbf16> to vector<1x8x128xbf16>
      tpu.vector_store %arg15[%627, %c0_180, %c0_181], %630 {strides = array<i32>} : memref<8x8x128xbf16, #tpu.memory_space<vmem>>, vector<1x8x128xbf16>,
      %c8_i32 = arith.constant 8 : i32
      tpu.yield
    }) : () -> ()
    "tpu.region"() ({
      %alloca = memref.alloca() : memref<8x8x256xf32, #tpu.memory_space<vmem>>
      %c0 = arith.constant 0 : index
      %c0_0 = arith.constant 0 : index
      %c0_1 = arith.constant 0 : index
      %0 = vector.load %arg14[%c0, %c0_0, %c0_1] : memref<8x8x128xbf16, #tpu.memory_space<vmem>>, vector<8x8x128xbf16>
      %1 = vector.shape_cast %0 : vector<8x8x128xbf16> to vector<64x128xbf16>
      %c0_2 = arith.constant 0 : index
      %c0_3 = arith.constant 0 : index
      %c0_4 = arith.constant 0 : index
      %2 = vector.load %arg15[%c0_2, %c0_3, %c0_4] : memref<8x8x128xbf16, #tpu.memory_space<vmem>>, vector<8x8x128xbf16>
      %3 = vector.shape_cast %2 : vector<8x8x128xbf16> to vector<64x128xbf16>
      %4 = tpu.concatenate %1, %3 in 1 : vector<64x128xbf16>, vector<64x128xbf16> -> vector<64x256xbf16>
      %c0_5 = arith.constant 0 : index
      %c0_6 = arith.constant 0 : index
      %5 = vector.load %arg6[%c0_5, %c0_6] : memref<256x256xbf16, #tpu.memory_space<vmem>>, vector<256x256xbf16>
      %cst = arith.constant dense<0.000000e+00> : vector<64x256xf32>
      %6 = tpu.matmul %4, %5, %cst {dimension_numbers = #tpu.dot_dimension_numbers<[1], [0], [0], [1], [0, 0, 1, 1], [], []>} : vector<64x256xbf16>, vector<256x256xbf16>, vector<64x256xf32> -> vector<64x256xf32>
      %c0_7 = arith.constant 0 : index
      %c0_8 = arith.constant 0 : index
      %7 = vector.load %arg8[%c0_7, %c0_8] : memref<1x256xf32, #tpu.memory_space<vmem>>, vector<1x256xf32>
      %8 = vector.broadcast %7 : vector<1x256xf32> to vector<64x256xf32>
      %9 = arith.addf %6, %8 : vector<64x256xf32>
      %10 = vector.shape_cast %9 : vector<64x256xf32> to vector<8x8x256xf32>
      %c0_9 = arith.constant 0 : index
      %c0_10 = arith.constant 0 : index
      %c0_11 = arith.constant 0 : index
      %11 = vector.load %alloca[%c0_9, %c0_10, %c0_11] : memref<8x8x256xf32, #tpu.memory_space<vmem>>, vector<8x8x256xf32>
      tpu.vector_store %alloca[%c0_9, %c0_10, %c0_11], %10 {strides = array<i32>} : memref<8x8x256xf32, #tpu.memory_space<vmem>>, vector<8x8x256xf32>,
      %cst_12 = arith.constant 0.000000e+00 : f32
      %12 = vector.broadcast %cst_12 : f32 to vector<8x64xf32>
      %cst_13 = arith.constant -1.000000e+30 : f32
      %13 = vector.broadcast %cst_13 : f32 to vector<8x64xf32>
      %c0_i32 = arith.constant 0 : i32
      %14 = arith.index_cast %c0_i32 : i32 to index
      %c0_14 = arith.constant 0 : index
      %c0_15 = arith.constant 0 : index
      %15 = vector.load %alloca[%14, %c0_14, %c0_15] : memref<8x8x256xf32, #tpu.memory_space<vmem>>, vector<1x8x256xf32>
      %16 = vector.shape_cast %15 : vector<1x8x256xf32> to vector<8x256xf32>
      %17 = arith.truncf %12 : vector<8x64xf32> to vector<8x64xbf16>
      %c0_16 = arith.constant 0 : index
      %c0_17 = arith.constant 0 : index
      %18 = vector.load %arg7[%c0_16, %c0_17] : memref<64x256xbf16, #tpu.memory_space<vmem>>, vector<64x256xbf16>
      %cst_18 = arith.constant dense<0.000000e+00> : vector<8x256xf32>
      %19 = tpu.matmul %17, %18, %cst_18 {dimension_numbers = #tpu.dot_dimension_numbers<[1], [0], [0], [1], [0, 0, 1, 1], [], []>} : vector<8x64xbf16>, vector<64x256xbf16>, vector<8x256xf32> -> vector<8x256xf32>
      %20 = arith.addf %16, %19 : vector<8x256xf32>
      %21 = vector.extract_strided_slice %20 {offsets = [0, 0], sizes = [8, 64], strides = [1, 1]} : vector<8x256xf32> to vector<8x64xf32>
      %22 = arith.negf %21 : vector<8x64xf32>
      %23 = math.exp %22 : vector<8x64xf32>
      %cst_19 = arith.constant 1.000000e+00 : f32
      %24 = vector.broadcast %cst_19 : f32 to vector<8x64xf32>
      %25 = arith.addf %24, %23 : vector<8x64xf32>
      %26 = arith.divf %24, %25 : vector<8x64xf32>
      %27 = vector.extract_strided_slice %20 {offsets = [0, 64], sizes = [8, 64], strides = [1, 1]} : vector<8x256xf32> to vector<8x64xf32>
      %28 = arith.negf %27 : vector<8x64xf32>
      %29 = math.exp %28 : vector<8x64xf32>
      %cst_20 = arith.constant 1.000000e+00 : f32
      %30 = vector.broadcast %cst_20 : f32 to vector<8x64xf32>
      %31 = arith.addf %30, %29 : vector<8x64xf32>
      %32 = arith.divf %30, %31 : vector<8x64xf32>
      %33 = vector.extract_strided_slice %20 {offsets = [0, 128], sizes = [8, 64], strides = [1, 1]} : vector<8x256xf32> to vector<8x64xf32>
      %34 = math.tanh %33 : vector<8x64xf32>
      %35 = vector.extract_strided_slice %20 {offsets = [0, 192], sizes = [8, 64], strides = [1, 1]} : vector<8x256xf32> to vector<8x64xf32>
      %36 = arith.negf %35 : vector<8x64xf32>
      %37 = math.exp %36 : vector<8x64xf32>
      %cst_21 = arith.constant 1.000000e+00 : f32
      %38 = vector.broadcast %cst_21 : f32 to vector<8x64xf32>
      %39 = arith.addf %38, %37 : vector<8x64xf32>
      %40 = arith.divf %38, %39 : vector<8x64xf32>
      %41 = arith.mulf %32, %12 : vector<8x64xf32>
      %42 = arith.mulf %26, %34 : vector<8x64xf32>
      %43 = arith.addf %41, %42 : vector<8x64xf32>
      %44 = math.tanh %43 : vector<8x64xf32>
      %45 = arith.mulf %40, %44 : vector<8x64xf32>
      %46 = arith.maximumf %13, %45 : vector<8x64xf32>
      %c1_i32 = arith.constant 1 : i32
      %47 = arith.index_cast %c1_i32 : i32 to index
      %c0_22 = arith.constant 0 : index
      %c0_23 = arith.constant 0 : index
      %48 = vector.load %alloca[%47, %c0_22, %c0_23] : memref<8x8x256xf32, #tpu.memory_space<vmem>>, vector<1x8x256xf32>
      %49 = vector.shape_cast %48 : vector<1x8x256xf32> to vector<8x256xf32>
      %50 = arith.truncf %45 : vector<8x64xf32> to vector<8x64xbf16>
      %c0_24 = arith.constant 0 : index
      %c0_25 = arith.constant 0 : index
      %51 = vector.load %arg7[%c0_24, %c0_25] : memref<64x256xbf16, #tpu.memory_space<vmem>>, vector<64x256xbf16>
      %cst_26 = arith.constant dense<0.000000e+00> : vector<8x256xf32>
      %52 = tpu.matmul %50, %51, %cst_26 {dimension_numbers = #tpu.dot_dimension_numbers<[1], [0], [0], [1], [0, 0, 1, 1], [], []>} : vector<8x64xbf16>, vector<64x256xbf16>, vector<8x256xf32> -> vector<8x256xf32>
      %53 = arith.addf %49, %52 : vector<8x256xf32>
      %54 = vector.extract_strided_slice %53 {offsets = [0, 0], sizes = [8, 64], strides = [1, 1]} : vector<8x256xf32> to vector<8x64xf32>
      %55 = arith.negf %54 : vector<8x64xf32>
      %56 = math.exp %55 : vector<8x64xf32>
      %cst_27 = arith.constant 1.000000e+00 : f32
      %57 = vector.broadcast %cst_27 : f32 to vector<8x64xf32>
      %58 = arith.addf %57, %56 : vector<8x64xf32>
      %59 = arith.divf %57, %58 : vector<8x64xf32>
      %60 = vector.extract_strided_slice %53 {offsets = [0, 64], sizes = [8, 64], strides = [1, 1]} : vector<8x256xf32> to vector<8x64xf32>
      %61 = arith.negf %60 : vector<8x64xf32>
      %62 = math.exp %61 : vector<8x64xf32>
      %cst_28 = arith.constant 1.000000e+00 : f32
      %63 = vector.broadcast %cst_28 : f32 to vector<8x64xf32>
      %64 = arith.addf %63, %62 : vector<8x64xf32>
      %65 = arith.divf %63, %64 : vector<8x64xf32>
      %66 = vector.extract_strided_slice %53 {offsets = [0, 128], sizes = [8, 64], strides = [1, 1]} : vector<8x256xf32> to vector<8x64xf32>
      %67 = math.tanh %66 : vector<8x64xf32>
      %68 = vector.extract_strided_slice %53 {offsets = [0, 192], sizes = [8, 64], strides = [1, 1]} : vector<8x256xf32> to vector<8x64xf32>
      %69 = arith.negf %68 : vector<8x64xf32>
      %70 = math.exp %69 : vector<8x64xf32>
      %cst_29 = arith.constant 1.000000e+00 : f32
      %71 = vector.broadcast %cst_29 : f32 to vector<8x64xf32>
      %72 = arith.addf %71, %70 : vector<8x64xf32>
      %73 = arith.divf %71, %72 : vector<8x64xf32>
      %74 = arith.mulf %65, %43 : vector<8x64xf32>
      %75 = arith.mulf %59, %67 : vector<8x64xf32>
      %76 = arith.addf %74, %75 : vector<8x64xf32>
      %77 = math.tanh %76 : vector<8x64xf32>
      %78 = arith.mulf %73, %77 : vector<8x64xf32>
      %79 = arith.maximumf %46, %78 : vector<8x64xf32>
      %c2_i32 = arith.constant 2 : i32
      %80 = arith.index_cast %c2_i32 : i32 to index
      %c0_30 = arith.constant 0 : index
      %c0_31 = arith.constant 0 : index
      %81 = vector.load %alloca[%80, %c0_30, %c0_31] : memref<8x8x256xf32, #tpu.memory_space<vmem>>, vector<1x8x256xf32>
      %82 = vector.shape_cast %81 : vector<1x8x256xf32> to vector<8x256xf32>
      %83 = arith.truncf %78 : vector<8x64xf32> to vector<8x64xbf16>
      %c0_32 = arith.constant 0 : index
      %c0_33 = arith.constant 0 : index
      %84 = vector.load %arg7[%c0_32, %c0_33] : memref<64x256xbf16, #tpu.memory_space<vmem>>, vector<64x256xbf16>
      %cst_34 = arith.constant dense<0.000000e+00> : vector<8x256xf32>
      %85 = tpu.matmul %83, %84, %cst_34 {dimension_numbers = #tpu.dot_dimension_numbers<[1], [0], [0], [1], [0, 0, 1, 1], [], []>} : vector<8x64xbf16>, vector<64x256xbf16>, vector<8x256xf32> -> vector<8x256xf32>
      %86 = arith.addf %82, %85 : vector<8x256xf32>
      %87 = vector.extract_strided_slice %86 {offsets = [0, 0], sizes = [8, 64], strides = [1, 1]} : vector<8x256xf32> to vector<8x64xf32>
      %88 = arith.negf %87 : vector<8x64xf32>
      %89 = math.exp %88 : vector<8x64xf32>
      %cst_35 = arith.constant 1.000000e+00 : f32
      %90 = vector.broadcast %cst_35 : f32 to vector<8x64xf32>
      %91 = arith.addf %90, %89 : vector<8x64xf32>
      %92 = arith.divf %90, %91 : vector<8x64xf32>
      %93 = vector.extract_strided_slice %86 {offsets = [0, 64], sizes = [8, 64], strides = [1, 1]} : vector<8x256xf32> to vector<8x64xf32>
      %94 = arith.negf %93 : vector<8x64xf32>
      %95 = math.exp %94 : vector<8x64xf32>
      %cst_36 = arith.constant 1.000000e+00 : f32
      %96 = vector.broadcast %cst_36 : f32 to vector<8x64xf32>
      %97 = arith.addf %96, %95 : vector<8x64xf32>
      %98 = arith.divf %96, %97 : vector<8x64xf32>
      %99 = vector.extract_strided_slice %86 {offsets = [0, 128], sizes = [8, 64], strides = [1, 1]} : vector<8x256xf32> to vector<8x64xf32>
      %100 = math.tanh %99 : vector<8x64xf32>
      %101 = vector.extract_strided_slice %86 {offsets = [0, 192], sizes = [8, 64], strides = [1, 1]} : vector<8x256xf32> to vector<8x64xf32>
      %102 = arith.negf %101 : vector<8x64xf32>
      %103 = math.exp %102 : vector<8x64xf32>
      %cst_37 = arith.constant 1.000000e+00 : f32
      %104 = vector.broadcast %cst_37 : f32 to vector<8x64xf32>
      %105 = arith.addf %104, %103 : vector<8x64xf32>
      %106 = arith.divf %104, %105 : vector<8x64xf32>
      %107 = arith.mulf %98, %76 : vector<8x64xf32>
      %108 = arith.mulf %92, %100 : vector<8x64xf32>
      %109 = arith.addf %107, %108 : vector<8x64xf32>
      %110 = math.tanh %109 : vector<8x64xf32>
      %111 = arith.mulf %106, %110 : vector<8x64xf32>
      %112 = arith.maximumf %79, %111 : vector<8x64xf32>
      %c3_i32 = arith.constant 3 : i32
      %113 = arith.index_cast %c3_i32 : i32 to index
      %c0_38 = arith.constant 0 : index
      %c0_39 = arith.constant 0 : index
      %114 = vector.load %alloca[%113, %c0_38, %c0_39] : memref<8x8x256xf32, #tpu.memory_space<vmem>>, vector<1x8x256xf32>
      %115 = vector.shape_cast %114 : vector<1x8x256xf32> to vector<8x256xf32>
      %116 = arith.truncf %111 : vector<8x64xf32> to vector<8x64xbf16>
      %c0_40 = arith.constant 0 : index
      %c0_41 = arith.constant 0 : index
      %117 = vector.load %arg7[%c0_40, %c0_41] : memref<64x256xbf16, #tpu.memory_space<vmem>>, vector<64x256xbf16>
      %cst_42 = arith.constant dense<0.000000e+00> : vector<8x256xf32>
      %118 = tpu.matmul %116, %117, %cst_42 {dimension_numbers = #tpu.dot_dimension_numbers<[1], [0], [0], [1], [0, 0, 1, 1], [], []>} : vector<8x64xbf16>, vector<64x256xbf16>, vector<8x256xf32> -> vector<8x256xf32>
      %119 = arith.addf %115, %118 : vector<8x256xf32>
      %120 = vector.extract_strided_slice %119 {offsets = [0, 0], sizes = [8, 64], strides = [1, 1]} : vector<8x256xf32> to vector<8x64xf32>
      %121 = arith.negf %120 : vector<8x64xf32>
      %122 = math.exp %121 : vector<8x64xf32>
      %cst_43 = arith.constant 1.000000e+00 : f32
      %123 = vector.broadcast %cst_43 : f32 to vector<8x64xf32>
      %124 = arith.addf %123, %122 : vector<8x64xf32>
      %125 = arith.divf %123, %124 : vector<8x64xf32>
      %126 = vector.extract_strided_slice %119 {offsets = [0, 64], sizes = [8, 64], strides = [1, 1]} : vector<8x256xf32> to vector<8x64xf32>
      %127 = arith.negf %126 : vector<8x64xf32>
      %128 = math.exp %127 : vector<8x64xf32>
      %cst_44 = arith.constant 1.000000e+00 : f32
      %129 = vector.broadcast %cst_44 : f32 to vector<8x64xf32>
      %130 = arith.addf %129, %128 : vector<8x64xf32>
      %131 = arith.divf %129, %130 : vector<8x64xf32>
      %132 = vector.extract_strided_slice %119 {offsets = [0, 128], sizes = [8, 64], strides = [1, 1]} : vector<8x256xf32> to vector<8x64xf32>
      %133 = math.tanh %132 : vector<8x64xf32>
      %134 = vector.extract_strided_slice %119 {offsets = [0, 192], sizes = [8, 64], strides = [1, 1]} : vector<8x256xf32> to vector<8x64xf32>
      %135 = arith.negf %134 : vector<8x64xf32>
      %136 = math.exp %135 : vector<8x64xf32>
      %cst_45 = arith.constant 1.000000e+00 : f32
      %137 = vector.broadcast %cst_45 : f32 to vector<8x64xf32>
      %138 = arith.addf %137, %136 : vector<8x64xf32>
      %139 = arith.divf %137, %138 : vector<8x64xf32>
      %140 = arith.mulf %131, %109 : vector<8x64xf32>
      %141 = arith.mulf %125, %133 : vector<8x64xf32>
      %142 = arith.addf %140, %141 : vector<8x64xf32>
      %143 = math.tanh %142 : vector<8x64xf32>
      %144 = arith.mulf %139, %143 : vector<8x64xf32>
      %145 = arith.maximumf %112, %144 : vector<8x64xf32>
      %c4_i32 = arith.constant 4 : i32
      %146 = arith.index_cast %c4_i32 : i32 to index
      %c0_46 = arith.constant 0 : index
      %c0_47 = arith.constant 0 : index
      %147 = vector.load %alloca[%146, %c0_46, %c0_47] : memref<8x8x256xf32, #tpu.memory_space<vmem>>, vector<1x8x256xf32>
      %148 = vector.shape_cast %147 : vector<1x8x256xf32> to vector<8x256xf32>
      %149 = arith.truncf %144 : vector<8x64xf32> to vector<8x64xbf16>
      %c0_48 = arith.constant 0 : index
      %c0_49 = arith.constant 0 : index
      %150 = vector.load %arg7[%c0_48, %c0_49] : memref<64x256xbf16, #tpu.memory_space<vmem>>, vector<64x256xbf16>
      %cst_50 = arith.constant dense<0.000000e+00> : vector<8x256xf32>
      %151 = tpu.matmul %149, %150, %cst_50 {dimension_numbers = #tpu.dot_dimension_numbers<[1], [0], [0], [1], [0, 0, 1, 1], [], []>} : vector<8x64xbf16>, vector<64x256xbf16>, vector<8x256xf32> -> vector<8x256xf32>
      %152 = arith.addf %148, %151 : vector<8x256xf32>
      %153 = vector.extract_strided_slice %152 {offsets = [0, 0], sizes = [8, 64], strides = [1, 1]} : vector<8x256xf32> to vector<8x64xf32>
      %154 = arith.negf %153 : vector<8x64xf32>
      %155 = math.exp %154 : vector<8x64xf32>
      %cst_51 = arith.constant 1.000000e+00 : f32
      %156 = vector.broadcast %cst_51 : f32 to vector<8x64xf32>
      %157 = arith.addf %156, %155 : vector<8x64xf32>
      %158 = arith.divf %156, %157 : vector<8x64xf32>
      %159 = vector.extract_strided_slice %152 {offsets = [0, 64], sizes = [8, 64], strides = [1, 1]} : vector<8x256xf32> to vector<8x64xf32>
      %160 = arith.negf %159 : vector<8x64xf32>
      %161 = math.exp %160 : vector<8x64xf32>
      %cst_52 = arith.constant 1.000000e+00 : f32
      %162 = vector.broadcast %cst_52 : f32 to vector<8x64xf32>
      %163 = arith.addf %162, %161 : vector<8x64xf32>
      %164 = arith.divf %162, %163 : vector<8x64xf32>
      %165 = vector.extract_strided_slice %152 {offsets = [0, 128], sizes = [8, 64], strides = [1, 1]} : vector<8x256xf32> to vector<8x64xf32>
      %166 = math.tanh %165 : vector<8x64xf32>
      %167 = vector.extract_strided_slice %152 {offsets = [0, 192], sizes = [8, 64], strides = [1, 1]} : vector<8x256xf32> to vector<8x64xf32>
      %168 = arith.negf %167 : vector<8x64xf32>
      %169 = math.exp %168 : vector<8x64xf32>
      %cst_53 = arith.constant 1.000000e+00 : f32
      %170 = vector.broadcast %cst_53 : f32 to vector<8x64xf32>
      %171 = arith.addf %170, %169 : vector<8x64xf32>
      %172 = arith.divf %170, %171 : vector<8x64xf32>
      %173 = arith.mulf %164, %142 : vector<8x64xf32>
      %174 = arith.mulf %158, %166 : vector<8x64xf32>
      %175 = arith.addf %173, %174 : vector<8x64xf32>
      %176 = math.tanh %175 : vector<8x64xf32>
      %177 = arith.mulf %172, %176 : vector<8x64xf32>
      %178 = arith.maximumf %145, %177 : vector<8x64xf32>
      %c5_i32 = arith.constant 5 : i32
      %179 = arith.index_cast %c5_i32 : i32 to index
      %c0_54 = arith.constant 0 : index
      %c0_55 = arith.constant 0 : index
      %180 = vector.load %alloca[%179, %c0_54, %c0_55] : memref<8x8x256xf32, #tpu.memory_space<vmem>>, vector<1x8x256xf32>
      %181 = vector.shape_cast %180 : vector<1x8x256xf32> to vector<8x256xf32>
      %182 = arith.truncf %177 : vector<8x64xf32> to vector<8x64xbf16>
      %c0_56 = arith.constant 0 : index
      %c0_57 = arith.constant 0 : index
      %183 = vector.load %arg7[%c0_56, %c0_57] : memref<64x256xbf16, #tpu.memory_space<vmem>>, vector<64x256xbf16>
      %cst_58 = arith.constant dense<0.000000e+00> : vector<8x256xf32>
      %184 = tpu.matmul %182, %183, %cst_58 {dimension_numbers = #tpu.dot_dimension_numbers<[1], [0], [0], [1], [0, 0, 1, 1], [], []>} : vector<8x64xbf16>, vector<64x256xbf16>, vector<8x256xf32> -> vector<8x256xf32>
      %185 = arith.addf %181, %184 : vector<8x256xf32>
      %186 = vector.extract_strided_slice %185 {offsets = [0, 0], sizes = [8, 64], strides = [1, 1]} : vector<8x256xf32> to vector<8x64xf32>
      %187 = arith.negf %186 : vector<8x64xf32>
      %188 = math.exp %187 : vector<8x64xf32>
      %cst_59 = arith.constant 1.000000e+00 : f32
      %189 = vector.broadcast %cst_59 : f32 to vector<8x64xf32>
      %190 = arith.addf %189, %188 : vector<8x64xf32>
      %191 = arith.divf %189, %190 : vector<8x64xf32>
      %192 = vector.extract_strided_slice %185 {offsets = [0, 64], sizes = [8, 64], strides = [1, 1]} : vector<8x256xf32> to vector<8x64xf32>
      %193 = arith.negf %192 : vector<8x64xf32>
      %194 = math.exp %193 : vector<8x64xf32>
      %cst_60 = arith.constant 1.000000e+00 : f32
      %195 = vector.broadcast %cst_60 : f32 to vector<8x64xf32>
      %196 = arith.addf %195, %194 : vector<8x64xf32>
      %197 = arith.divf %195, %196 : vector<8x64xf32>
      %198 = vector.extract_strided_slice %185 {offsets = [0, 128], sizes = [8, 64], strides = [1, 1]} : vector<8x256xf32> to vector<8x64xf32>
      %199 = math.tanh %198 : vector<8x64xf32>
      %200 = vector.extract_strided_slice %185 {offsets = [0, 192], sizes = [8, 64], strides = [1, 1]} : vector<8x256xf32> to vector<8x64xf32>
      %201 = arith.negf %200 : vector<8x64xf32>
      %202 = math.exp %201 : vector<8x64xf32>
      %cst_61 = arith.constant 1.000000e+00 : f32
      %203 = vector.broadcast %cst_61 : f32 to vector<8x64xf32>
      %204 = arith.addf %203, %202 : vector<8x64xf32>
      %205 = arith.divf %203, %204 : vector<8x64xf32>
      %206 = arith.mulf %197, %175 : vector<8x64xf32>
      %207 = arith.mulf %191, %199 : vector<8x64xf32>
      %208 = arith.addf %206, %207 : vector<8x64xf32>
      %209 = math.tanh %208 : vector<8x64xf32>
      %210 = arith.mulf %205, %209 : vector<8x64xf32>
      %211 = arith.maximumf %178, %210 : vector<8x64xf32>
      %c6_i32 = arith.constant 6 : i32
      %212 = arith.index_cast %c6_i32 : i32 to index
      %c0_62 = arith.constant 0 : index
      %c0_63 = arith.constant 0 : index
      %213 = vector.load %alloca[%212, %c0_62, %c0_63] : memref<8x8x256xf32, #tpu.memory_space<vmem>>, vector<1x8x256xf32>
      %214 = vector.shape_cast %213 : vector<1x8x256xf32> to vector<8x256xf32>
      %215 = arith.truncf %210 : vector<8x64xf32> to vector<8x64xbf16>
      %c0_64 = arith.constant 0 : index
      %c0_65 = arith.constant 0 : index
      %216 = vector.load %arg7[%c0_64, %c0_65] : memref<64x256xbf16, #tpu.memory_space<vmem>>, vector<64x256xbf16>
      %cst_66 = arith.constant dense<0.000000e+00> : vector<8x256xf32>
      %217 = tpu.matmul %215, %216, %cst_66 {dimension_numbers = #tpu.dot_dimension_numbers<[1], [0], [0], [1], [0, 0, 1, 1], [], []>} : vector<8x64xbf16>, vector<64x256xbf16>, vector<8x256xf32> -> vector<8x256xf32>
      %218 = arith.addf %214, %217 : vector<8x256xf32>
      %219 = vector.extract_strided_slice %218 {offsets = [0, 0], sizes = [8, 64], strides = [1, 1]} : vector<8x256xf32> to vector<8x64xf32>
      %220 = arith.negf %219 : vector<8x64xf32>
      %221 = math.exp %220 : vector<8x64xf32>
      %cst_67 = arith.constant 1.000000e+00 : f32
      %222 = vector.broadcast %cst_67 : f32 to vector<8x64xf32>
      %223 = arith.addf %222, %221 : vector<8x64xf32>
      %224 = arith.divf %222, %223 : vector<8x64xf32>
      %225 = vector.extract_strided_slice %218 {offsets = [0, 64], sizes = [8, 64], strides = [1, 1]} : vector<8x256xf32> to vector<8x64xf32>
      %226 = arith.negf %225 : vector<8x64xf32>
      %227 = math.exp %226 : vector<8x64xf32>
      %cst_68 = arith.constant 1.000000e+00 : f32
      %228 = vector.broadcast %cst_68 : f32 to vector<8x64xf32>
      %229 = arith.addf %228, %227 : vector<8x64xf32>
      %230 = arith.divf %228, %229 : vector<8x64xf32>
      %231 = vector.extract_strided_slice %218 {offsets = [0, 128], sizes = [8, 64], strides = [1, 1]} : vector<8x256xf32> to vector<8x64xf32>
      %232 = math.tanh %231 : vector<8x64xf32>
      %233 = vector.extract_strided_slice %218 {offsets = [0, 192], sizes = [8, 64], strides = [1, 1]} : vector<8x256xf32> to vector<8x64xf32>
      %234 = arith.negf %233 : vector<8x64xf32>
      %235 = math.exp %234 : vector<8x64xf32>
      %cst_69 = arith.constant 1.000000e+00 : f32
      %236 = vector.broadcast %cst_69 : f32 to vector<8x64xf32>
      %237 = arith.addf %236, %235 : vector<8x64xf32>
      %238 = arith.divf %236, %237 : vector<8x64xf32>
      %239 = arith.mulf %230, %208 : vector<8x64xf32>
      %240 = arith.mulf %224, %232 : vector<8x64xf32>
      %241 = arith.addf %239, %240 : vector<8x64xf32>
      %242 = math.tanh %241 : vector<8x64xf32>
      %243 = arith.mulf %238, %242 : vector<8x64xf32>
      %244 = arith.maximumf %211, %243 : vector<8x64xf32>
      %c7_i32 = arith.constant 7 : i32
      %245 = arith.index_cast %c7_i32 : i32 to index
      %c0_70 = arith.constant 0 : index
      %c0_71 = arith.constant 0 : index
      %246 = vector.load %alloca[%245, %c0_70, %c0_71] : memref<8x8x256xf32, #tpu.memory_space<vmem>>, vector<1x8x256xf32>
      %247 = vector.shape_cast %246 : vector<1x8x256xf32> to vector<8x256xf32>
      %248 = arith.truncf %243 : vector<8x64xf32> to vector<8x64xbf16>
      %c0_72 = arith.constant 0 : index
      %c0_73 = arith.constant 0 : index
      %249 = vector.load %arg7[%c0_72, %c0_73] : memref<64x256xbf16, #tpu.memory_space<vmem>>, vector<64x256xbf16>
      %cst_74 = arith.constant dense<0.000000e+00> : vector<8x256xf32>
      %250 = tpu.matmul %248, %249, %cst_74 {dimension_numbers = #tpu.dot_dimension_numbers<[1], [0], [0], [1], [0, 0, 1, 1], [], []>} : vector<8x64xbf16>, vector<64x256xbf16>, vector<8x256xf32> -> vector<8x256xf32>
      %251 = arith.addf %247, %250 : vector<8x256xf32>
      %252 = vector.extract_strided_slice %251 {offsets = [0, 0], sizes = [8, 64], strides = [1, 1]} : vector<8x256xf32> to vector<8x64xf32>
      %253 = arith.negf %252 : vector<8x64xf32>
      %254 = math.exp %253 : vector<8x64xf32>
      %cst_75 = arith.constant 1.000000e+00 : f32
      %255 = vector.broadcast %cst_75 : f32 to vector<8x64xf32>
      %256 = arith.addf %255, %254 : vector<8x64xf32>
      %257 = arith.divf %255, %256 : vector<8x64xf32>
      %258 = vector.extract_strided_slice %251 {offsets = [0, 64], sizes = [8, 64], strides = [1, 1]} : vector<8x256xf32> to vector<8x64xf32>
      %259 = arith.negf %258 : vector<8x64xf32>
      %260 = math.exp %259 : vector<8x64xf32>
      %cst_76 = arith.constant 1.000000e+00 : f32
      %261 = vector.broadcast %cst_76 : f32 to vector<8x64xf32>
      %262 = arith.addf %261, %260 : vector<8x64xf32>
      %263 = arith.divf %261, %262 : vector<8x64xf32>
      %264 = vector.extract_strided_slice %251 {offsets = [0, 128], sizes = [8, 64], strides = [1, 1]} : vector<8x256xf32> to vector<8x64xf32>
      %265 = math.tanh %264 : vector<8x64xf32>
      %266 = vector.extract_strided_slice %251 {offsets = [0, 192], sizes = [8, 64], strides = [1, 1]} : vector<8x256xf32> to vector<8x64xf32>
      %267 = arith.negf %266 : vector<8x64xf32>
      %268 = math.exp %267 : vector<8x64xf32>
      %cst_77 = arith.constant 1.000000e+00 : f32
      %269 = vector.broadcast %cst_77 : f32 to vector<8x64xf32>
      %270 = arith.addf %269, %268 : vector<8x64xf32>
      %271 = arith.divf %269, %270 : vector<8x64xf32>
      %272 = arith.mulf %263, %241 : vector<8x64xf32>
      %273 = arith.mulf %257, %265 : vector<8x64xf32>
      %274 = arith.addf %272, %273 : vector<8x64xf32>
      %275 = math.tanh %274 : vector<8x64xf32>
      %276 = arith.mulf %271, %275 : vector<8x64xf32>
      %277 = arith.maximumf %244, %276 : vector<8x64xf32>
      %c8_i32 = arith.constant 8 : i32
      %278 = arith.truncf %277 : vector<8x64xf32> to vector<8x64xbf16>
      %c0_78 = arith.constant 0 : index
      %c0_79 = arith.constant 0 : index
      %279 = vector.load %arg9[%c0_78, %c0_79] : memref<64x32xbf16, #tpu.memory_space<vmem>>, vector<64x32xbf16>
      %cst_80 = arith.constant dense<0.000000e+00> : vector<8x32xf32>
      %280 = tpu.matmul %278, %279, %cst_80 {dimension_numbers = #tpu.dot_dimension_numbers<[1], [0], [0], [1], [0, 0, 1, 1], [], []>} : vector<8x64xbf16>, vector<64x32xbf16>, vector<8x32xf32> -> vector<8x32xf32>
      %c0_81 = arith.constant 0 : index
      %c0_82 = arith.constant 0 : index
      %281 = vector.load %arg10[%c0_81, %c0_82] : memref<1x32xf32, #tpu.memory_space<vmem>>, vector<1x32xf32>
      %282 = vector.broadcast %281 : vector<1x32xf32> to vector<8x32xf32>
      %283 = arith.addf %280, %282 : vector<8x32xf32>
      %cst_83 = arith.constant 0.000000e+00 : f32
      %284 = vector.broadcast %cst_83 : f32 to vector<8x32xf32>
      %285 = arith.maximumf %283, %284 : vector<8x32xf32>
      %286 = arith.truncf %285 : vector<8x32xf32> to vector<8x32xbf16>
      %c0_84 = arith.constant 0 : index
      %c0_85 = arith.constant 0 : index
      %287 = vector.load %arg11[%c0_84, %c0_85] : memref<32x1xbf16, #tpu.memory_space<vmem>>, vector<32x1xbf16>
      %cst_86 = arith.constant dense<0.000000e+00> : vector<8x1xf32>
      %288 = tpu.matmul %286, %287, %cst_86 {dimension_numbers = #tpu.dot_dimension_numbers<[1], [0], [0], [1], [0, 0, 1, 1], [], []>} : vector<8x32xbf16>, vector<32x1xbf16>, vector<8x1xf32> -> vector<8x1xf32>
      %c0_87 = arith.constant 0 : index
      %c0_88 = arith.constant 0 : index
      %289 = vector.load %arg12[%c0_87, %c0_88] : memref<1x1xf32, #tpu.memory_space<vmem>>, vector<1x1xf32>
      %290 = vector.broadcast %289 : vector<1x1xf32> to vector<8x1xf32>
      %291 = arith.addf %288, %290 : vector<8x1xf32>
      %292 = arith.negf %291 : vector<8x1xf32>
      %293 = math.exp %292 : vector<8x1xf32>
      %cst_89 = arith.constant 1.000000e+00 : f32
      %294 = vector.broadcast %cst_89 : f32 to vector<8x1xf32>
      %295 = arith.addf %294, %293 : vector<8x1xf32>
      %296 = arith.divf %294, %295 : vector<8x1xf32>
      %c0_90 = arith.constant 0 : index
      %c0_91 = arith.constant 0 : index
      %297 = vector.load %arg13[%c0_90, %c0_91] : memref<8x1xf32, #tpu.memory_space<vmem>>, vector<8x1xf32>
      tpu.vector_store %arg13[%c0_90, %c0_91], %296 {strides = array<i32>} : memref<8x1xf32, #tpu.memory_space<vmem>>, vector<8x1xf32>,
      tpu.yield
    }) : () -> ()
    return
  }
  func.func @transform_0(%arg0: i32) -> (i32, i32, i32) {
    %c0_i32 = arith.constant 0 : i32
    %c0_i32_0 = arith.constant 0 : i32
    %c0_i32_1 = arith.constant 0 : i32
    return %c0_i32, %arg0, %c0_i32_0 : i32, i32, i32
  }
  func.func @transform_1(%arg0: i32) -> (i32, i32) {
    %c0_i32 = arith.constant 0 : i32
    %c0_i32_0 = arith.constant 0 : i32
    %c0_i32_1 = arith.constant 0 : i32
    return %c0_i32, %c0_i32_0 : i32, i32
  }
  func.func @transform_2(%arg0: i32) -> (i32, i32) {
    %c0_i32 = arith.constant 0 : i32
    %c0_i32_0 = arith.constant 0 : i32
    %c0_i32_1 = arith.constant 0 : i32
    return %c0_i32, %c0_i32_0 : i32, i32
  }
  func.func @transform_3(%arg0: i32) -> (i32, i32) {
    %c0_i32 = arith.constant 0 : i32
    %c0_i32_0 = arith.constant 0 : i32
    %c0_i32_1 = arith.constant 0 : i32
    return %c0_i32, %c0_i32_0 : i32, i32
  }
  func.func @transform_4(%arg0: i32) -> (i32, i32) {
    %c0_i32 = arith.constant 0 : i32
    %c0_i32_0 = arith.constant 0 : i32
    %c0_i32_1 = arith.constant 0 : i32
    return %c0_i32, %c0_i32_0 : i32, i32
  }
  func.func @transform_5(%arg0: i32) -> (i32, i32) {
    %c0_i32 = arith.constant 0 : i32
    %c0_i32_0 = arith.constant 0 : i32
    %c0_i32_1 = arith.constant 0 : i32
    return %c0_i32, %c0_i32_0 : i32, i32
  }
  func.func @transform_6(%arg0: i32) -> (i32, i32) {
    %c0_i32 = arith.constant 0 : i32
    %c0_i32_0 = arith.constant 0 : i32
    %c0_i32_1 = arith.constant 0 : i32
    return %c0_i32, %c0_i32_0 : i32, i32
  }
  func.func @transform_7(%arg0: i32) -> (i32, i32) {
    %c0_i32 = arith.constant 0 : i32
    %c0_i32_0 = arith.constant 0 : i32
    %c0_i32_1 = arith.constant 0 : i32
    return %c0_i32, %c0_i32_0 : i32, i32
  }
  func.func @transform_8(%arg0: i32) -> (i32, i32) {
    %c0_i32 = arith.constant 0 : i32
    %c0_i32_0 = arith.constant 0 : i32
    %c0_i32_1 = arith.constant 0 : i32
    return %c0_i32, %c0_i32_0 : i32, i32
  }
  func.func @transform_9(%arg0: i32) -> (i32, i32) {
    %c0_i32 = arith.constant 0 : i32
    %c0_i32_0 = arith.constant 0 : i32
    %c0_i32_1 = arith.constant 0 : i32
    return %c0_i32, %c0_i32_0 : i32, i32
  }
  func.func @transform_10(%arg0: i32) -> (i32, i32) {
    %c0_i32 = arith.constant 0 : i32
    %c0_i32_0 = arith.constant 0 : i32
    %c0_i32_1 = arith.constant 0 : i32
    return %c0_i32, %c0_i32_0 : i32, i32
  }
  func.func @transform_11(%arg0: i32) -> (i32, i32) {
    %c0_i32 = arith.constant 0 : i32
    %c0_i32_0 = arith.constant 0 : i32
    %c0_i32_1 = arith.constant 0 : i32
    return %c0_i32, %c0_i32_0 : i32, i32
  }
  func.func @transform_12(%arg0: i32) -> (i32, i32) {
    %c0_i32 = arith.constant 0 : i32
    %c0_i32_0 = arith.constant 0 : i32
    return %arg0, %c0_i32 : i32, i32
  }
}

</mosaic_0001>

<bundles_post_ra>
// kernel: tpu_custom_call.1
= control target key start
LH: loop header
LB: loop body
LE: loop exit
PB: predicated region body
PF: predicated region fallthrough
CT: control target
= control target key end

     0   :  { %s10632_s0 = inlined_call_operand.hbm [shape: bf16[8,8,64], index: 0, kind: input, shape index: {}]   ;;  %s10633_s1 = inlined_call_operand.hbm [shape: bf16[64,1024], index: 1, kind: input, shape index: {}]   ;;  %s10634_s2 = inlined_call_operand.vmem [shape: f32[1,1024], index: 2, kind: input, shape index: {}]   ;;  %s10635_s3 = inlined_call_operand.hbm [shape: bf16[128,512], index: 3, kind: input, shape index: {}]   ;;  %s10636_s4 = inlined_call_operand.hbm [shape: bf16[128,512], index: 4, kind: input, shape index: {}]   ;;  %s10637_s5 = inlined_call_operand.hbm [shape: bf16[256,256], index: 5, kind: input, shape index: {}]   ;;  %s10638_s6 = inlined_call_operand.vmem [shape: bf16[64,256], index: 6, kind: input, shape index: {}]   ;;  %s10639_s7 = inlined_call_operand.vmem [shape: f32[1,256], index: 7, kind: input, shape index: {}]   ;;  %s10640_s8 = inlined_call_operand.vmem [shape: bf16[64,32], index: 8, kind: input, shape index: {}]   ;;  %s10641_s9 = inlined_call_operand.vmem [shape: f32[1,32], index: 9, kind: input, shape index: {}]   ;;  %s10642_s10 = inlined_call_operand.vmem [shape: bf16[32,1], index: 10, kind: input, shape index: {}]   ;;  %s10643_s11 = inlined_call_operand.<no memory space> [shape: f32[1,1], index: 11, kind: input, shape index: {}]   ;;  %s10644_s12 = inlined_call_operand.vmem [shape: f32[8,1], index: 12, kind: output, shape index: {}]  }
   0x1   :  { %v17_v0 = vstv %s10643_s11 }
   0x2   :  { %18 = vst [vmem:[#allocation4] sm:$0x1] %v17_v0 }
   0x3   :  { %19 = vsyncpa [#allocation6], 0 }
   0x4   :  { %20 = vsyncpa [#allocation8], 0 }
   0x5   :  { %21 = vsyncpa [#allocation11], 0  ;;  %s8872_s23 = smov [#allocation7]   ;;  %s8756_s27 = scalar_lea.hbm %s10633_s1, 4096 }
   0x6   :  { %s39_s24 = sshll.u32 %s8872_s23, 4  ;;  %p8757_p0 = scmp.ne.s32.totalorder %s10633_s1, %s8756_s27  ;;  %s40_s24 = int_to_ptr.vmem [resolvable:$true] %s39_s24 }
   0x7   :  { %p8760_p1 = scmp.lt.u32.totalorder %s8756_s27, %s10633_s1 }
   0x9   :  { %p8762_p2 = pnand %p8760_p1, %p8757_p0 }
   0xb   :  { %8765 = shalt.err (!%p8762_p2)
}
   0xc   :  { %s8766_s11 = scalar_lea.vmem %s40_s24, 4096  ;;  %p8771_p4 = scmp.lt.s32.totalorder %s40_s24, %s40_s24 }
   0xd   :  { %p8767_p3 = scmp.ne.s32.totalorder %s40_s24, %s8766_s11  ;;  %p8772_p5 = scmp.lt.s32.totalorder %s8766_s11, %s8766_s11 }
   0xf   :  { %p8773_p6 = por %p8772_p5, %p8771_p4 }
  0x11   :  { %p8774_p7 = pnand %p8773_p6, %p8767_p3 }
  0x13   :  { %8777 = shalt.err (!%p8774_p7)
}
  0x14   :  { %s8873_s14 = smov 512   ;;  %s8874_s15 = smov 32  }
  0x15   :  { %45 = dma.hbm_to_vmem [thread:$0]  %s10633_s1, 4096, %s40_s24, [#allocation8], %s8873_s14, %s8873_s14, %s8874_s15  }
  0x16   :  { %s8875_s18 = smov [#allocation10]   ;;  %s8876_s20 = smov [#allocation5]  }
  0x17   :  { %s65_s19 = sshll.u32 %s8875_s18, 4  ;;  %s27_s21 = sshll.u32 %s8876_s20, 4  ;;  %s66_s19 = int_to_ptr.vmem [resolvable:$true] %s65_s19  ;;  %s28_s21 = int_to_ptr.vmem [resolvable:$true] %s27_s21 }
  0x18   :  { %s8778_s25 = scalar_lea.hbm %s10636_s4, 4096 }
  0x19   :  { %p8779_p8 = scmp.ne.s32.totalorder %s10636_s4, %s8778_s25  ;;  %p8782_p9 = scmp.lt.u32.totalorder %s8778_s25, %s10636_s4 }
  0x1b   :  { %p8784_p10 = pnand %p8782_p9, %p8779_p8 }
  0x1d   :  { %8787 = shalt.err (!%p8784_p10)
}
  0x1e   :  { %s8788_s1 = scalar_lea.vmem %s66_s19, 4096  ;;  %p8793_p12 = scmp.lt.s32.totalorder %s66_s19, %s66_s19 }
  0x1f   :  { %p8789_p11 = scmp.ne.s32.totalorder %s66_s19, %s8788_s1  ;;  %p8794_p13 = scmp.lt.s32.totalorder %s8788_s1, %s8788_s1 }
  0x21   :  { %p8795_p0 = por %p8794_p13, %p8793_p12 }
  0x23   :  { %p8796_p1 = pnand %p8795_p0, %p8789_p11 }
  0x25   :  { %8799 = shalt.err (!%p8796_p1)
}
  0x26   :  { %s8877_s24 = smov 256   ;;  %s8878_s30 = smov 16  }
  0x27   :  { %71 = dma.hbm_to_vmem [thread:$0]  %s10636_s4, 4096, %s66_s19, [#allocation11], %s8877_s24, %s8877_s24, %s8878_s30  }
  0x28   :  { %s8800_s16 = scalar_lea.hbm %s10632_s0, 512 }
  0x29   :  { %p8801_p2 = scmp.ne.s32.totalorder %s10632_s0, %s8800_s16  ;;  %p8804_p3 = scmp.lt.u32.totalorder %s8800_s16, %s10632_s0 }
  0x2b   :  { %p8806_p4 = pnand %p8804_p3, %p8801_p2 }
  0x2d   :  { %8809 = shalt.err (!%p8806_p4)
}
  0x2e   :  { %s8810_s23 = scalar_lea.vmem %s28_s21, 512  ;;  %p8815_p6 = scmp.lt.s32.totalorder %s28_s21, %s28_s21 }
  0x2f   :  { %p8811_p5 = scmp.ne.s32.totalorder %s28_s21, %s8810_s23  ;;  %p8816_p7 = scmp.lt.s32.totalorder %s8810_s23, %s8810_s23 }
  0x31   :  { %p8817_p8 = por %p8816_p7, %p8815_p6 }
  0x33   :  { %p8818_p9 = pnand %p8817_p8, %p8811_p5 }
  0x35   :  { %8821 = shalt.err (!%p8818_p9)
}
  0x36   :  { %s8879_s4 = smov 64   ;;  %s8880_s19 = smov 4  }
  0x37   :  { %33 = dma.hbm_to_vmem [thread:$0]  %s10632_s0, 512, %s28_s21, [#allocation6], %s8879_s4, %s8879_s4, %s8880_s19  }
  0x38   :  { %s8881_s27 = smov [#allocation9]   ;;  %s8882_s29 = smov [#allocation12]  }
  0x39   :  { %s53_s28 = sshll.u32 %s8881_s27, 4  ;;  %s77_s1 = sshll.u32 %s8882_s29, 4  ;;  %s54_s28 = int_to_ptr.vmem [resolvable:$true] %s53_s28  ;;  %s78_s1 = int_to_ptr.vmem [resolvable:$true] %s77_s1 }
  0x3a   :  { %s8822_s14 = scalar_lea.hbm %s10635_s3, 4096 }
  0x3b   :  { %p8823_p10 = scmp.ne.s32.totalorder %s10635_s3, %s8822_s14  ;;  %p8826_p11 = scmp.lt.u32.totalorder %s8822_s14, %s10635_s3 }
  0x3d   :  { %p8828_p12 = pnand %p8826_p11, %p8823_p10 }
  0x3f   :  { %8831 = shalt.err (!%p8828_p12)
}
  0x40   :  { %s8832_s0 = scalar_lea.vmem %s54_s28, 4096  ;;  %p8837_p0 = scmp.lt.s32.totalorder %s54_s28, %s54_s28 }
  0x41   :  { %p8833_p13 = scmp.ne.s32.totalorder %s54_s28, %s8832_s0  ;;  %p8838_p1 = scmp.lt.s32.totalorder %s8832_s0, %s8832_s0 }
  0x43   :  { %p8839_p2 = por %p8838_p1, %p8837_p0 }
  0x45   :  { %p8840_p3 = pnand %p8839_p2, %p8833_p13 }
  0x47   :  { %8843 = shalt.err (!%p8840_p3)
}
  0x48   :  { %59 = dma.hbm_to_vmem [thread:$0]  %s10635_s3, 4096, %s54_s28, [#allocation8], %s8877_s24, %s8877_s24, %s8878_s30  }
  0x49   :  { %s8844_s4 = scalar_lea.hbm %s10637_s5, 4096 }
  0x4a   :  { %p8845_p4 = scmp.ne.s32.totalorder %s10637_s5, %s8844_s4  ;;  %p8848_p5 = scmp.lt.u32.totalorder %s8844_s4, %s10637_s5 }
  0x4c   :  { %p8850_p6 = pnand %p8848_p5, %p8845_p4 }
  0x4e   :  { %8853 = shalt.err (!%p8850_p6)
}
  0x4f   :  { %s8854_s29 = scalar_lea.vmem %s78_s1, 4096  ;;  %p8859_p8 = scmp.lt.s32.totalorder %s78_s1, %s78_s1 }
  0x50   :  { %p8855_p7 = scmp.ne.s32.totalorder %s78_s1, %s8854_s29  ;;  %p8860_p9 = scmp.lt.s32.totalorder %s8854_s29, %s8854_s29 }
  0x52   :  { %p8861_p10 = por %p8860_p9, %p8859_p8 }
  0x54   :  { %p8862_p11 = pnand %p8861_p10, %p8855_p7 }
  0x56   :  { %8865 = shalt.err (!%p8862_p11)
}
  0x57   :  { %s8883_s3 = smov 128   ;;  %s8884_s24 = smov 8  }
  0x58   :  { %83 = dma.hbm_to_vmem [thread:$0]  %s10637_s5, 4096, %s78_s1, [#allocation11], %s8883_s3, %s8883_s3, %s8884_s24  }
  0x59   :  { %8866 = dma.done.wait [#allocation6], 512  }
  0x5a   :  { %8867 = vsyncadd [#allocation6], 4294966784 }
  0x5b   :  { %8868 = dma.done.wait [#allocation8], 8192  }
  0x5c   :  { %8869 = vsyncadd [#allocation8], 4294959104 }
  0x5d   :  { %8870 = dma.done.wait [#allocation11], 8192  }
  0x5e   :  { %8871 = vsyncadd [#allocation11], 4294959104 }
  0x5f   :  { %v120_v1 = vld [vmem:[#allocation7] sm:$0xff]  ;;  %v121_v3 = vld [vmem:[#allocation7 + $0x8] sm:$0xff]  ;;  %v10645_v9 = vmov 0   ;;  %v122_v32 = vld [vmem:[#allocation7 + $0x10] sm:$0xff]  ;;  %vm374_vm0 = vcmask 523264   ;;  %vm8889_vm1 = vmmov 0  }
  0x60   :  { %v124_v2 = vld [vmem:[#allocation7 + $0x20] sm:$0xff]  ;;  %v125_v5 = vld [vmem:[#allocation7 + $0x28] sm:$0xff]  ;;  %419 = vmatprep.mubr.bf16.mxu0 %v10645_v9  ;;  %492 = vmatprep.mubr.bf16.mxu1 %v10645_v9  ;;  %v126_v33 = vld [vmem:[#allocation7 + $0x30] sm:$0xff]  ;;  %vm7075_vm2 = vcmask 261120   ;;  %vm7125_vm3 = vcmask 7168  }
  0x61   :  { %v7139_v4 = vcombine.high %v120_v1, %v124_v2  ;;  %v7138_v6 = vcombine.low %v120_v1, %v124_v2  ;;  %v128_v7 = vld [vmem:[#allocation7 + $0x40] sm:$0xff]  ;;  %v7141_v10 = vcombine.high %v121_v3, %v125_v5  ;;  %v7140_v11 = vcombine.low %v121_v3, %v125_v5  ;;  %v129_v13 = vld [vmem:[#allocation7 + $0x48] sm:$0xff]  ;;  %v123_v34 = vld [vmem:[#allocation7 + $0x18] sm:$0xff] }
  0x62   :  { %v132_v8 = vld [vmem:[#allocation7 + $0x60] sm:$0xff]  ;;  %v133_v14 = vld [vmem:[#allocation7 + $0x68] sm:$0xff]  ;;  %v127_v35 = vld [vmem:[#allocation7 + $0x38] sm:$0xff]  ;;  %v7143_v38 = vcombine.high %v122_v32, %v126_v33  ;;  %v7142_v44 = vcombine.low %v122_v32, %v126_v33 }
  0x63   :  { %v7147_v12 = vcombine.high %v128_v7, %v132_v8  ;;  %v136_v15 = vld [vmem:[#allocation7 + $0x80] sm:$0xff]  ;;  %387 = vmatprep.subr.bf16.mxu0 %v7139_v4  ;;  %v7149_v16 = vcombine.high %v129_v13, %v133_v14  ;;  %v137_v18 = vld [vmem:[#allocation7 + $0x88] sm:$0xff]  ;;  %460 = vmatprep.subr.bf16.mxu1 %v7141_v10  ;;  %v7146_v20 = vcombine.low %v128_v7, %v132_v8  ;;  %v130_v40 = vld [vmem:[#allocation7 + $0x50] sm:$0xff] }
  0x64   :  { %v140_v17 = vld [vmem:[#allocation7 + $0xa0] sm:$0xff]  ;;  %v141_v19 = vld [vmem:[#allocation7 + $0xa8] sm:$0xff]  ;;  %388 = vmatpush1.bf16.msra.mxu0 %v7138_v6  ;;  %461 = vmatpush1.bf16.msra.mxu1 %v7140_v11  ;;  %v7148_v21 = vcombine.low %v129_v13, %v133_v14  ;;  %v7145_v41 = vcombine.high %v123_v34, %v127_v35  ;;  %v134_v42 = vld [vmem:[#allocation7 + $0x70] sm:$0xff]  ;;  %v7144_v47 = vcombine.low %v123_v34, %v127_v35 }
  0x65   :  { %389 = vmatprep.subr.bf16.mxu0 %v7147_v12  ;;  %v7155_v22 = vcombine.high %v136_v15, %v140_v17  ;;  %462 = vmatprep.subr.bf16.mxu1 %v7149_v16  ;;  %v7157_v23 = vcombine.high %v137_v18, %v141_v19  ;;  %v144_v24 = vld [vmem:[#allocation7 + $0xc0] sm:$0xff]  ;;  %v145_v26 = vld [vmem:[#allocation7 + $0xc8] sm:$0xff]  ;;  %v7154_v28 = vcombine.low %v136_v15, %v140_v17  ;;  %v131_v43 = vld [vmem:[#allocation7 + $0x58] sm:$0xff] }
  0x66   :  { %v148_v25 = vld [vmem:[#allocation7 + $0xe0] sm:$0xff]  ;;  %v149_v27 = vld [vmem:[#allocation7 + $0xe8] sm:$0xff]  ;;  %v7156_v29 = vcombine.low %v137_v18, %v141_v19  ;;  %v135_v45 = vld [vmem:[#allocation7 + $0x78] sm:$0xff]  ;;  %v7151_v46 = vcombine.high %v130_v40, %v134_v42  ;;  %v7150_v52 = vcombine.low %v130_v40, %v134_v42 }
  0x67   :  { %v7163_v30 = vcombine.high %v144_v24, %v148_v25  ;;  %v7165_v31 = vcombine.high %v145_v26, %v149_v27  ;;  %v7162_v36 = vcombine.low %v144_v24, %v148_v25  ;;  %v7164_v37 = vcombine.low %v145_v26, %v149_v27  ;;  %v9026_v39 = vld [vmem:[#allocation5] sm:$0xff]   ;;  %v138_v48 = vld [vmem:[#allocation7 + $0x90] sm:$0xff]  ;;  %v139_v51 = vld [vmem:[#allocation7 + $0x98] sm:$0xff] }
  0x68   :  { %390 = vmatpush1.bf16.msra.mxu0 %v7146_v20  ;;  %463 = vmatpush1.bf16.msra.mxu1 %v7148_v21  ;;  %v142_v49 = vld [vmem:[#allocation7 + $0xb0] sm:$0xff]  ;;  %v7153_v50 = vcombine.high %v131_v43, %v135_v45  ;;  %v143_v53 = vld [vmem:[#allocation7 + $0xb8] sm:$0xff]  ;;  %v9034_v55 = vld [vmem:[#allocation5 + $0x8] sm:$0xff]   ;;  %v7152_v56 = vcombine.low %v131_v43, %v135_v45 }
  0x69   :  { %391 = vmatprep.subr.bf16.mxu0 %v7155_v22  ;;  %464 = vmatprep.subr.bf16.mxu1 %v7157_v23  ;;  %v7159_v54 = vcombine.high %v138_v48, %v142_v49  ;;  %v146_v57 = vld [vmem:[#allocation7 + $0xd0] sm:$0xff]  ;;  %v7161_v58 = vcombine.high %v139_v51, %v143_v53  ;;  %v147_v60 = vld [vmem:[#allocation7 + $0xd8] sm:$0xff]  ;;  %v7158_v62 = vcombine.low %v138_v48, %v142_v49 }
  0x6a   :  { %v150_v59 = vld [vmem:[#allocation7 + $0xf0] sm:$0xff]  ;;  %v151_v61 = vld [vmem:[#allocation7 + $0xf8] sm:$0xff]  ;;  %v7160_v63 = vcombine.low %v139_v51, %v143_v53 }
  0x6b   :  { %v7167_v0 = vcombine.high %v146_v57, %v150_v59  ;;  %v7169_v1 = vcombine.high %v147_v60, %v151_v61  ;;  %v7166_v2 = vcombine.low %v146_v57, %v150_v59  ;;  %v7168_v3 = vcombine.low %v147_v60, %v151_v61  ;;  %v9042_v4 = vld [vmem:[#allocation9 + $0x4] ss:$16 sps:$4 sm:$0xff]   ;;  %v9046_v6 = vld [vmem:[#allocation9 + $0xc] ss:$16 sps:$4 sm:$0xff]   ;;  %v9064_v8 = vld [vmem:[#allocation9] ss:$16 sps:$4 sm:$0xff]  }
  0x6c   :  { %392 = vmatpush1.bf16.msra.mxu0 %v7154_v28  ;;  %465 = vmatpush1.bf16.msra.mxu1 %v7156_v29  ;;  %v9044_v5 = vld [vmem:[#allocation5 + $0x10] sm:$0xff]   ;;  %v9056_v7 = vld [vmem:[#allocation5 + $0x18] sm:$0xff]  }
  0x6d   :  { %393 = vmatprep.subr.bf16.mxu0 %v7163_v30  ;;  %466 = vmatprep.subr.bf16.mxu1 %v7165_v31  ;;  %v9066_v10 = vld [vmem:[#allocation9 + $0x8] ss:$16 sps:$4 sm:$0xff]   ;;  %v9068_v11 = vld [vmem:[#allocation9 + $0x24] ss:$16 sps:$4 sm:$0xff]   ;;  %v9070_v12 = vld [vmem:[#allocation9 + $0x2c] ss:$16 sps:$4 sm:$0xff]  }
  0x6e   :  { %v9074_v13 = vld [vmem:[#allocation9 + $0x20] ss:$16 sps:$4 sm:$0xff]   ;;  %v9079_v14 = vld [vmem:[#allocation9 + $0x28] ss:$16 sps:$4 sm:$0xff]   ;;  %v9083_v15 = vld [vmem:[#allocation9 + $0x44] ss:$16 sps:$4 sm:$0xff]  }
  0x6f   :  { %v9087_v16 = vld [vmem:[#allocation9 + $0x4c] ss:$16 sps:$4 sm:$0xff]   ;;  %v9090_v17 = vld [vmem:[#allocation9 + $0x40] ss:$16 sps:$4 sm:$0xff]   ;;  %v9093_v18 = vld [vmem:[#allocation9 + $0x48] ss:$16 sps:$4 sm:$0xff]  }
  0x70   :  { %394 = vmatpush1.bf16.msra.mxu0 %v7162_v36  ;;  %467 = vmatpush1.bf16.msra.mxu1 %v7164_v37  ;;  %v9097_v19 = vld [vmem:[#allocation9 + $0x64] ss:$16 sps:$4 sm:$0xff]   ;;  %v9099_v20 = vld [vmem:[#allocation9 + $0x6c] ss:$16 sps:$4 sm:$0xff]   ;;  %v9102_v21 = vld [vmem:[#allocation9 + $0x60] ss:$16 sps:$4 sm:$0xff]  }
  0x71   :  { %533 = vmatprep.subr.bf16.mxu0 %v7143_v38  ;;  %606 = vmatprep.subr.bf16.mxu1 %v7145_v41  ;;  %v9106_v22 = vld [vmem:[#allocation9 + $0x68] ss:$16 sps:$4 sm:$0xff]   ;;  %v9108_v23 = vld [vmem:[#allocation9 + $0x84] ss:$16 sps:$4 sm:$0xff]   ;;  %v9113_v24 = vld [vmem:[#allocation9 + $0x8c] ss:$16 sps:$4 sm:$0xff]  }
  0x72   :  { %v9119_v25 = vld [vmem:[#allocation9 + $0x80] ss:$16 sps:$4 sm:$0xff]   ;;  %v9122_v26 = vld [vmem:[#allocation9 + $0x88] ss:$16 sps:$4 sm:$0xff]   ;;  %v9124_v27 = vld [vmem:[#allocation9 + $0xa4] ss:$16 sps:$4 sm:$0xff]  }
  0x73   :  { %7170 = vmatmul.mubr.msk.bf16.vlgmr.msra.gmra.mrb[0].mxu0 %vm374_vm0, %v9026_v39  ;;  %7174 = vmatmul.mubr.msk.bf16.vlgmr.msra.gmra.mrb[0].mxu1 %vm374_vm0, %v9026_v39  ;;  %v9127_v28 = vld [vmem:[#allocation9 + $0xac] ss:$16 sps:$4 sm:$0xff]   ;;  %v9132_v29 = vld [vmem:[#allocation9 + $0xa0] ss:$16 sps:$4 sm:$0xff]   ;;  %v9136_v30 = vld [vmem:[#allocation9 + $0xa8] ss:$16 sps:$4 sm:$0xff]  }
  0x74   :  { %534 = vmatpush1.bf16.msra.mxu0 %v7142_v44  ;;  %429 = vmatprep.mubr.bf16.mxu0 %v10645_v9  ;;  %v9138_v31 = vld [vmem:[#allocation9 + $0xc4] ss:$16 sps:$4 sm:$0xff]   ;;  %v9143_v32 = vld [vmem:[#allocation9 + $0xcc] ss:$16 sps:$4 sm:$0xff]   ;;  %v9149_v33 = vld [vmem:[#allocation9 + $0xc0] ss:$16 sps:$4 sm:$0xff]  }
  0x75   :  { %502 = vmatprep.mubr.bf16.mxu1 %v10645_v9  ;;  %535 = vmatprep.subr.bf16.mxu0 %v7151_v46  ;;  %v9152_v34 = vld [vmem:[#allocation9 + $0xc8] ss:$16 sps:$4 sm:$0xff]   ;;  %v9154_v35 = vld [vmem:[#allocation9 + $0xe4] ss:$16 sps:$4 sm:$0xff]   ;;  %v9157_v36 = vld [vmem:[#allocation9 + $0xec] ss:$16 sps:$4 sm:$0xff]  }
  0x76   :  { %607 = vmatpush1.bf16.msra.mxu1 %v7144_v47  ;;  %v9162_v37 = vld [vmem:[#allocation9 + $0xe0] ss:$16 sps:$4 sm:$0xff]   ;;  %v9166_v38 = vld [vmem:[#allocation9 + $0xe8] ss:$16 sps:$4 sm:$0xff]   ;;  %v9173_v40 = vld [vmem:[#allocation10 + $0xc] ss:$16 sps:$4 sm:$0xff]  }
  0x77   :  { %608 = vmatprep.subr.bf16.mxu1 %v7153_v50  ;;  %v9179_v41 = vld [vmem:[#allocation10] ss:$16 sps:$4 sm:$0xff]   ;;  %v9182_v42 = vld [vmem:[#allocation10 + $0x8] ss:$16 sps:$4 sm:$0xff]   ;;  %v9184_v43 = vld [vmem:[#allocation10 + $0x24] ss:$16 sps:$4 sm:$0xff]  }
  0x78   :  { %536 = vmatpush1.bf16.msra.mxu0 %v7150_v52  ;;  %v9187_v44 = vld [vmem:[#allocation10 + $0x2c] ss:$16 sps:$4 sm:$0xff]   ;;  %v9192_v45 = vld [vmem:[#allocation10 + $0x20] ss:$16 sps:$4 sm:$0xff]   ;;  %v9195_v46 = vld [vmem:[#allocation10 + $0x28] ss:$16 sps:$4 sm:$0xff]  }
  0x79   :  { %537 = vmatprep.subr.bf16.mxu0 %v7159_v54  ;;  %v9197_v47 = vld [vmem:[#allocation10 + $0x44] ss:$16 sps:$4 sm:$0xff]   ;;  %v9201_v48 = vld [vmem:[#allocation10 + $0x4c] ss:$16 sps:$4 sm:$0xff]   ;;  %v9206_v49 = vld [vmem:[#allocation10 + $0x40] ss:$16 sps:$4 sm:$0xff]  }
  0x7a   :  { %609 = vmatpush1.bf16.msra.mxu1 %v7152_v56  ;;  %v9209_v50 = vld [vmem:[#allocation10 + $0x48] ss:$16 sps:$4 sm:$0xff]   ;;  %v9211_v51 = vld [vmem:[#allocation10 + $0x64] ss:$16 sps:$4 sm:$0xff]   ;;  %v9215_v52 = vld [vmem:[#allocation10 + $0x6c] ss:$16 sps:$4 sm:$0xff]  }
  0x7b   :  { %7171 = vmatmul.mubr.msk.bf16.gmra.mrb[4].mxu0 %vm374_vm0, %v9034_v55  ;;  %610 = vmatprep.subr.bf16.mxu1 %v7161_v58  ;;  %v9220_v53 = vld [vmem:[#allocation10 + $0x60] ss:$16 sps:$4 sm:$0xff]   ;;  %v9222_v54 = vld [vmem:[#allocation10 + $0x68] ss:$16 sps:$4 sm:$0xff]   ;;  %v9227_v56 = vld [vmem:[#allocation10 + $0x8c] ss:$16 sps:$4 sm:$0xff]  }
  0x7c   :  { %7175 = vmatmul.mubr.msk.bf16.gmra.mrb[4].mxu1 %vm374_vm0, %v9034_v55  ;;  %439 = vmatprep.mubr.bf16.mxu0 %v10645_v9  ;;  %v9232_v57 = vld [vmem:[#allocation10 + $0x80] ss:$16 sps:$4 sm:$0xff]   ;;  %v9234_v58 = vld [vmem:[#allocation10 + $0x88] ss:$16 sps:$4 sm:$0xff]   ;;  %v9236_v59 = vld [vmem:[#allocation10 + $0xa4] ss:$16 sps:$4 sm:$0xff]  }
  0x7d   :  { %512 = vmatprep.mubr.bf16.mxu1 %v10645_v9  ;;  %538 = vmatpush1.bf16.msra.mxu0 %v7158_v62  ;;  %v9239_v60 = vld [vmem:[#allocation10 + $0xac] ss:$16 sps:$4 sm:$0xff]   ;;  %v9244_v61 = vld [vmem:[#allocation10 + $0xa0] ss:$16 sps:$4 sm:$0xff]   ;;  %v9246_v62 = vld [vmem:[#allocation10 + $0xa8] ss:$16 sps:$4 sm:$0xff]  }
  0x7e   :  { %539 = vmatprep.subr.bf16.mxu0 %v7167_v0  ;;  %611 = vmatpush1.bf16.msra.mxu1 %v7160_v63  ;;  %v9248_v63 = vld [vmem:[#allocation10 + $0xc4] ss:$16 sps:$4 sm:$0xff]   ;;  %v9251_v0 = vld [vmem:[#allocation10 + $0xcc] ss:$16 sps:$4 sm:$0xff]  }
  0x7f   :  { %612 = vmatprep.subr.bf16.mxu1 %v7169_v1  ;;  %10697 = vst [vmem:[#allocation19_spill] sm:$0xff] %v9251_v0  ;;  %v9256_v1 = vld [vmem:[#allocation10 + $0xc0] ss:$16 sps:$4 sm:$0xff]  }
  0x81   :  { %540 = vmatpush1.bf16.msra.mxu0 %v7166_v2  ;;  %v9258_v2 = vld [vmem:[#allocation10 + $0xc8] ss:$16 sps:$4 sm:$0xff]  }
  0x82   :  { %613 = vmatpush1.bf16.msra.mxu1 %v7168_v3  ;;  %1165 = vmatprep.subr.bf16.mxu0 %v9042_v4  ;;  %v9260_v3 = vld [vmem:[#allocation10 + $0xe4] ss:$16 sps:$4 sm:$0xff]  }
  0x83   :  { %7172 = vmatmul.mubr.msk.bf16.gmra.mrb[8].mxu0 %vm374_vm0, %v9044_v5  ;;  %1206 = vmatprep.subr.bf16.mxu1 %v9046_v6 }
  0x84   :  { %7176 = vmatmul.mubr.msk.bf16.gmra.mrb[8].mxu1 %vm374_vm0, %v9044_v5  ;;  %449 = vmatprep.mubr.bf16.mxu0 %v10645_v9 }
  0x85   :  { %522 = vmatprep.mubr.bf16.mxu1 %v10645_v9 }
  0x8b   :  { %7173 = vmatmul.mubr.msk.bf16.gmra.mrb[12].mxu0 %vm374_vm0, %v9056_v7 }
  0x8c   :  { %7177 = vmatmul.mubr.msk.bf16.gmra.mrb[12].mxu1 %vm374_vm0, %v9056_v7  ;;  %565 = vmatprep.mubr.bf16.mxu0 %v10645_v9 }
  0x8d   :  { %638 = vmatprep.mubr.bf16.mxu1 %v10645_v9 }
  0x93   :  { %7178 = vmatmul.mubr.msk.bf16.vlgmr.msra.gmra.mrb[16].mxu0 %vm374_vm0, %v9026_v39 }
  0x94   :  { %7182 = vmatmul.mubr.msk.bf16.vlgmr.msra.gmra.mrb[16].mxu1 %vm374_vm0, %v9026_v39  ;;  %1166 = vmatpush1.bf16.msra.mxu0 %v9064_v8  ;;  %v9168_v39 = vld [vmem:[#allocation10 + $0x4] ss:$16 sps:$4 sm:$0xff]  }
  0x95   :  { %1207 = vmatpush1.bf16.msra.mxu1 %v9066_v10  ;;  %1167 = vmatprep.subr.bf16.mxu0 %v9068_v11 }
  0x96   :  { %1208 = vmatprep.subr.bf16.mxu1 %v9070_v12  ;;  %575 = vmatprep.mubr.bf16.mxu0 %v10645_v9 }
  0x97   :  { %648 = vmatprep.mubr.bf16.mxu1 %v10645_v9 }
  0x98   :  { %1168 = vmatpush1.bf16.msra.mxu0 %v9074_v13 }
  0x99   :  { %1209 = vmatpush1.bf16.msra.mxu1 %v9079_v14  ;;  %1169 = vmatprep.subr.bf16.mxu0 %v9083_v15 }
  0x9a   :  { %1210 = vmatprep.subr.bf16.mxu1 %v9087_v16 }
  0x9b   :  { %7179 = vmatmul.mubr.msk.bf16.gmra.mrb[20].mxu0 %vm374_vm0, %v9034_v55 }
  0x9c   :  { %7183 = vmatmul.mubr.msk.bf16.gmra.mrb[20].mxu1 %vm374_vm0, %v9034_v55  ;;  %1170 = vmatpush1.bf16.msra.mxu0 %v9090_v17  ;;  %v9224_v55 = vld [vmem:[#allocation10 + $0x84] ss:$16 sps:$4 sm:$0xff]  }
  0x9d   :  { %1211 = vmatpush1.bf16.msra.mxu1 %v9093_v18  ;;  %1171 = vmatprep.subr.bf16.mxu0 %v9097_v19 }
  0x9e   :  { %1212 = vmatprep.subr.bf16.mxu1 %v9099_v20  ;;  %585 = vmatprep.mubr.bf16.mxu0 %v10645_v9 }
  0x9f   :  { %658 = vmatprep.mubr.bf16.mxu1 %v10645_v9 }
  0xa0   :  { %1172 = vmatpush1.bf16.msra.mxu0 %v9102_v21 }
  0xa1   :  { %1213 = vmatpush1.bf16.msra.mxu1 %v9106_v22  ;;  %1173 = vmatprep.subr.bf16.mxu0 %v9108_v23 }
  0xa2   :  { %1214 = vmatprep.subr.bf16.mxu1 %v9113_v24 }
  0xa3   :  { %7180 = vmatmul.mubr.msk.bf16.gmra.mrb[24].mxu0 %vm374_vm0, %v9044_v5 }
  0xa4   :  { %7184 = vmatmul.mubr.msk.bf16.gmra.mrb[24].mxu1 %vm374_vm0, %v9044_v5  ;;  %1174 = vmatpush1.bf16.msra.mxu0 %v9119_v25  ;;  %v9263_v5 = vld [vmem:[#allocation10 + $0xec] ss:$16 sps:$4 sm:$0xff]  }
  0xa5   :  { %1215 = vmatpush1.bf16.msra.mxu1 %v9122_v26  ;;  %1175 = vmatprep.subr.bf16.mxu0 %v9124_v27 }
  0xa6   :  { %1216 = vmatprep.subr.bf16.mxu1 %v9127_v28  ;;  %595 = vmatprep.mubr.bf16.mxu0 %v10645_v9 }
  0xa7   :  { %668 = vmatprep.mubr.bf16.mxu1 %v10645_v9 }
  0xa8   :  { %1176 = vmatpush1.bf16.msra.mxu0 %v9132_v29 }
  0xa9   :  { %1217 = vmatpush1.bf16.msra.mxu1 %v9136_v30  ;;  %1177 = vmatprep.subr.bf16.mxu0 %v9138_v31 }
  0xaa   :  { %1218 = vmatprep.subr.bf16.mxu1 %v9143_v32 }
  0xab   :  { %7181 = vmatmul.mubr.msk.bf16.gmra.mrb[28].mxu0 %vm374_vm0, %v9056_v7 }
  0xac   :  { %7185 = vmatmul.mubr.msk.bf16.gmra.mrb[28].mxu1 %vm374_vm0, %v9056_v7  ;;  %1178 = vmatpush1.bf16.msra.mxu0 %v9149_v33  ;;  %v9268_v7 = vld [vmem:[#allocation10 + $0xe0] ss:$16 sps:$4 sm:$0xff]  }
  0xad   :  { %1219 = vmatpush1.bf16.msra.mxu1 %v9152_v34  ;;  %1179 = vmatprep.subr.bf16.mxu0 %v9154_v35 }
  0xae   :  { %1220 = vmatprep.subr.bf16.mxu1 %v9157_v36  ;;  %1197 = vmatprep.mubr.bf16.mxu0 %v10645_v9 }
  0xaf   :  { %1238 = vmatprep.mubr.bf16.mxu1 %v10645_v9 }
  0xb0   :  { %1180 = vmatpush1.bf16.msra.mxu0 %v9162_v37 }
  0xb1   :  { %1221 = vmatpush1.bf16.msra.mxu1 %v9166_v38  ;;  %1474 = vmatprep.subr.bf16.mxu0 %v9168_v39 }
  0xb2   :  { %1515 = vmatprep.subr.bf16.mxu1 %v9173_v40 }
  0xb3   :  { %1198 = vmatmul.mubr.bf16.vlgmr.msra.gmra.mrb[32].mxu0 %v10645_v9 }
  0xb4   :  { %1239 = vmatmul.mubr.bf16.vlgmr.msra.gmra.mrb[32].mxu1 %v10645_v9  ;;  %1475 = vmatpush1.bf16.msra.mxu0 %v9179_v41 }
  0xb5   :  { %1516 = vmatpush1.bf16.msra.mxu1 %v9182_v42  ;;  %1476 = vmatprep.subr.bf16.mxu0 %v9184_v43 }
  0xb6   :  { %1517 = vmatprep.subr.bf16.mxu1 %v9187_v44  ;;  %1506 = vmatprep.mubr.bf16.mxu0 %v10645_v9 }
  0xb7   :  { %1547 = vmatprep.mubr.bf16.mxu1 %v10645_v9  ;;  %v9270_v9 = vld [vmem:[#allocation10 + $0xe8] ss:$16 sps:$4 sm:$0xff]  }
  0xb8   :  { %1477 = vmatpush1.bf16.msra.mxu0 %v9192_v45 }
  0xb9   :  { %1518 = vmatpush1.bf16.msra.mxu1 %v9195_v46  ;;  %1478 = vmatprep.subr.bf16.mxu0 %v9197_v47 }
  0xba   :  { %1519 = vmatprep.subr.bf16.mxu1 %v9201_v48 }
  0xbc   :  { %1479 = vmatpush1.bf16.msra.mxu0 %v9206_v49 }
  0xbd   :  { %1520 = vmatpush1.bf16.msra.mxu1 %v9209_v50  ;;  %1480 = vmatprep.subr.bf16.mxu0 %v9211_v51 }
  0xbe   :  { %1521 = vmatprep.subr.bf16.mxu1 %v9215_v52 }
  0xc0   :  { %1481 = vmatpush1.bf16.msra.mxu0 %v9220_v53 }
  0xc1   :  { %1522 = vmatpush1.bf16.msra.mxu1 %v9222_v54  ;;  %1482 = vmatprep.subr.bf16.mxu0 %v9224_v55 }
  0xc2   :  { %1523 = vmatprep.subr.bf16.mxu1 %v9227_v56 }
  0xc4   :  { %1483 = vmatpush1.bf16.msra.mxu0 %v9232_v57 }
  0xc5   :  { %1524 = vmatpush1.bf16.msra.mxu1 %v9234_v58  ;;  %1484 = vmatprep.subr.bf16.mxu0 %v9236_v59 }
  0xc6   :  { %1525 = vmatprep.subr.bf16.mxu1 %v9239_v60 }
  0xc8   :  { %1485 = vmatpush1.bf16.msra.mxu0 %v9244_v61 }
  0xc9   :  { %1526 = vmatpush1.bf16.msra.mxu1 %v9246_v62  ;;  %1486 = vmatprep.subr.bf16.mxu0 %v9248_v63 }
  0xca   :  { %1527 = vmatprep.subr.bf16.mxu1 %v9251_v0  ;;  %v10698_v0 = vmov 0  }
  0xcc   :  { %1487 = vmatpush1.bf16.msra.mxu0 %v9256_v1 }
  0xcd   :  { %1528 = vmatpush1.bf16.msra.mxu1 %v9258_v2  ;;  %1488 = vmatprep.subr.bf16.mxu0 %v9260_v3 }
  0xce   :  { %1529 = vmatprep.subr.bf16.mxu1 %v9263_v5 }
  0xd0   :  { %1489 = vmatpush1.bf16.msra.mxu0 %v9268_v7 }
  0xd1   :  { %1530 = vmatpush1.bf16.msra.mxu1 %v9270_v9  ;;  %1788 = vmatprep.subr.bf16.mxu0 %v9042_v4  ;;  %v154_v4 = vlaneseq }
  0xd2   :  { %1829 = vmatprep.subr.bf16.mxu1 %v9046_v6 }
  0xd3   :  { %1507 = vmatmul.mubr.bf16.vlgmr.msra.gmra.mrb[36].mxu0 %v10698_v0  ;;  %v9316_v6 = vshrl.u32 %v154_v4, 7 }
  0xd4   :  { %1548 = vmatmul.mubr.bf16.vlgmr.msra.gmra.mrb[36].mxu1 %v10698_v0  ;;  %1789 = vmatpush1.bf16.msra.mxu0 %v9064_v8 }
  0xd5   :  { %1830 = vmatpush1.bf16.msra.mxu1 %v9066_v10  ;;  %1790 = vmatprep.subr.bf16.mxu0 %v9068_v11  ;;  %10699 = vst [vmem:[#allocation20_spill] sm:$0xff] %v9316_v6  ;;  %v10649_v8 = vsub.s32 0, %v9316_v6  ;;  %v9322_v10 = vld [vmem:[%s10634_s2] sm:$0xff]  ;;  %v10648_v11 = vsub.s32 1, %v9316_v6 }
  0xd6   :  { %1831 = vmatprep.subr.bf16.mxu1 %v9070_v12  ;;  %1820 = vmatprep.mubr.bf16.mxu0 %v10698_v0  ;;  %v164_v12 = vsub.s32 2, %v9316_v6 }
  0xd7   :  { %1861 = vmatprep.mubr.bf16.mxu1 %v10698_v0 }
  0xd8   :  { %1791 = vmatpush1.bf16.msra.mxu0 %v9074_v13  ;;  %v168_v13 = vsub.s32 3, %v9316_v6 }
  0xd9   :  { %1832 = vmatpush1.bf16.msra.mxu1 %v9079_v14  ;;  %1792 = vmatprep.subr.bf16.mxu0 %v9083_v15  ;;  %v9330_v14 = vrot.slane %v9322_v10, %v10649_v8  ;;  %v9335_v15 = vrot.slane %v9322_v10, %v10648_v11 }
  0xda   :  { %1833 = vmatprep.subr.bf16.mxu1 %v9087_v16  ;;  %v9338_v16 = vrot.slane %v9322_v10, %v164_v12 }
  0xdc   :  { %1793 = vmatpush1.bf16.msra.mxu0 %v9090_v17  ;;  %v9341_v17 = vrot.slane %v9322_v10, %v168_v13 }
  0xdd   :  { %1834 = vmatpush1.bf16.msra.mxu1 %v9093_v18  ;;  %1794 = vmatprep.subr.bf16.mxu0 %v9097_v19 }
  0xde   :  { %1835 = vmatprep.subr.bf16.mxu1 %v9099_v20 }
  0xe0   :  { %1795 = vmatpush1.bf16.msra.mxu0 %v9102_v21 }
  0xe1   :  { %1836 = vmatpush1.bf16.msra.mxu1 %v9106_v22  ;;  %1796 = vmatprep.subr.bf16.mxu0 %v9108_v23 }
  0xe2   :  { %1837 = vmatprep.subr.bf16.mxu1 %v9113_v24 }
  0xe4   :  { %1797 = vmatpush1.bf16.msra.mxu0 %v9119_v25 }
  0xe5   :  { %1838 = vmatpush1.bf16.msra.mxu1 %v9122_v26  ;;  %1798 = vmatprep.subr.bf16.mxu0 %v9124_v27 }
  0xe6   :  { %1839 = vmatprep.subr.bf16.mxu1 %v9127_v28 }
  0xe8   :  { %1799 = vmatpush1.bf16.msra.mxu0 %v9132_v29 }
  0xe9   :  { %1840 = vmatpush1.bf16.msra.mxu1 %v9136_v30  ;;  %1800 = vmatprep.subr.bf16.mxu0 %v9138_v31 }
  0xea   :  { %1841 = vmatprep.subr.bf16.mxu1 %v9143_v32 }
  0xec   :  { %1801 = vmatpush1.bf16.msra.mxu0 %v9149_v33 }
  0xed   :  { %1842 = vmatpush1.bf16.msra.mxu1 %v9152_v34  ;;  %1802 = vmatprep.subr.bf16.mxu0 %v9154_v35 }
  0xee   :  { %1843 = vmatprep.subr.bf16.mxu1 %v9157_v36 }
  0xf0   :  { %1803 = vmatpush1.bf16.msra.mxu0 %v9162_v37 }
  0xf1   :  { %1844 = vmatpush1.bf16.msra.mxu1 %v9166_v38  ;;  %2097 = vmatprep.subr.bf16.mxu0 %v9168_v39 }
  0xf2   :  { %2138 = vmatprep.subr.bf16.mxu1 %v9173_v40 }
 0x146   :  { %v421_v18 = vpop.f32.mrb[0].mxu0  ;;  %v494_v21 = vpop.f32.mrb[0].mxu1 }
 0x147   :  { %v422_v19 = vadd.f32 %v421_v18, %v9330_v14  ;;  %v423_v20 = vpop.f32.mrb[1].mxu0  ;;  %v495_v24 = vadd.f32 %v494_v21, %v9338_v16  ;;  %v496_v25 = vpop.f32.mrb[1].mxu1 }
 0x148   :  { %v424_v22 = vadd.f32 %v423_v20, %v9335_v15  ;;  %v425_v23 = vpop.f32.mrb[2].mxu0  ;;  %v497_v28 = vadd.f32 %v496_v25, %v9341_v17  ;;  %v498_v29 = vpop.f32.mrb[2].mxu1 }
 0x149   :  { %v426_v26 = vadd.f32 %v425_v23, %v9330_v14  ;;  %v427_v27 = vpop.f32.mrb[3].mxu0  ;;  %v499_v32 = vadd.f32 %v498_v29, %v9338_v16  ;;  %v500_v33 = vpop.f32.mrb[3].mxu1 }
 0x14a   :  { %v9348_v30 = vpack.c.bf16 %v424_v22, %v422_v19  ;;  %v428_v31 = vadd.f32 %v427_v27, %v9335_v15  ;;  %v9352_v34 = vpack.c.bf16 %v497_v28, %v495_v24  ;;  %v501_v35 = vadd.f32 %v500_v33, %v9341_v17 }
 0x14c   :  { %v9355_v36 = vpack.c.bf16 %v428_v31, %v426_v26  ;;  %v9357_v37 = vpack.c.bf16 %v501_v35, %v499_v32 }
 0x14e   :  { %v431_v38 = vpop.f32.mrb[4].mxu0 }
 0x14f   :  { %v432_v39 = vadd.f32 %v431_v38, %v9330_v14  ;;  %v433_v40 = vpop.f32.mrb[5].mxu0  ;;  %v504_v4 = vpop.f32.mrb[4].mxu1 }
 0x150   :  { %v434_v12 = vadd.f32 %v433_v40, %v9335_v15  ;;  %v435_v13 = vpop.f32.mrb[6].mxu0  ;;  %v505_v18 = vadd.f32 %v504_v4, %v9338_v16  ;;  %v506_v19 = vpop.f32.mrb[5].mxu1 }
 0x151   :  { %v436_v20 = vadd.f32 %v435_v13, %v9330_v14  ;;  %v437_v21 = vpop.f32.mrb[7].mxu0  ;;  %v507_v22 = vadd.f32 %v506_v19, %v9341_v17  ;;  %v508_v23 = vpop.f32.mrb[6].mxu1 }
 0x152   :  { %v9364_v24 = vpack.c.bf16 %v434_v12, %v432_v39  ;;  %v438_v25 = vadd.f32 %v437_v21, %v9335_v15  ;;  %v509_v26 = vadd.f32 %v508_v23, %v9338_v16  ;;  %v510_v27 = vpop.f32.mrb[7].mxu1 }
 0x153   :  { %v9368_v28 = vpack.c.bf16 %v507_v22, %v505_v18  ;;  %v511_v29 = vadd.f32 %v510_v27, %v9341_v17 }
 0x154   :  { %v9371_v31 = vpack.c.bf16 %v438_v25, %v436_v20 }
 0x155   :  { %v9373_v32 = vpack.c.bf16 %v511_v29, %v509_v26 }
 0x156   :  { %10700 = vst [vmem:[#allocation21_spill] sm:$0xff] %v9371_v31  ;;  %v441_v33 = vpop.f32.mrb[8].mxu0 }
 0x157   :  { %10701 = vst [vmem:[#allocation22_spill] sm:$0xff] %v9373_v32  ;;  %v442_v35 = vadd.f32 %v441_v33, %v9330_v14  ;;  %v443_v38 = vpop.f32.mrb[9].mxu0  ;;  %v514_v40 = vpop.f32.mrb[8].mxu1 }
 0x158   :  { %v444_v39 = vadd.f32 %v443_v38, %v9335_v15  ;;  %v445_v4 = vpop.f32.mrb[10].mxu0  ;;  %v515_v12 = vadd.f32 %v514_v40, %v9338_v16  ;;  %v516_v13 = vpop.f32.mrb[9].mxu1 }
 0x159   :  { %v446_v18 = vadd.f32 %v445_v4, %v9330_v14  ;;  %v447_v19 = vpop.f32.mrb[11].mxu0  ;;  %v517_v21 = vadd.f32 %v516_v13, %v9341_v17  ;;  %v518_v20 = vpop.f32.mrb[10].mxu1 }
 0x15a   :  { %v9380_v22 = vpack.c.bf16 %v444_v39, %v442_v35  ;;  %v448_v23 = vadd.f32 %v447_v19, %v9335_v15  ;;  %v519_v25 = vadd.f32 %v518_v20, %v9338_v16  ;;  %v520_v26 = vpop.f32.mrb[11].mxu1  ;;  %v172_v35 = vsub.s32 4, %v9316_v6 }
 0x15b   :  { %v9384_v27 = vpack.c.bf16 %v517_v21, %v515_v12  ;;  %v521_v29 = vadd.f32 %v520_v26, %v9341_v17  ;;  %v176_v20 = vsub.s32 5, %v9316_v6 }
 0x15c   :  { %10702 = vst [vmem:[#allocation23_spill] sm:$0xff] %v9380_v22  ;;  %v9387_v33 = vpack.c.bf16 %v448_v23, %v446_v18  ;;  %v180_v18 = vsub.s32 6, %v9316_v6  ;;  %v969_v22 = vunpack.c.l.bf16 %v9348_v30 }
 0x15d   :  { %10703 = vst [vmem:[#allocation24_spill] sm:$0xff] %v9384_v27  ;;  %v9389_v38 = vpack.c.bf16 %v521_v29, %v519_v25 }
 0x15e   :  { %10704 = vst [vmem:[#allocation25_spill] sm:$0xff] %v9387_v33  ;;  %v451_v40 = vpop.f32.mrb[12].mxu0 }
 0x15f   :  { %10705 = vst [vmem:[#allocation26_spill] sm:$0xff] %v9389_v38  ;;  %v452_v4 = vadd.f32 %v451_v40, %v9330_v14  ;;  %v453_v13 = vpop.f32.mrb[13].mxu0  ;;  %v524_v39 = vpop.f32.mrb[12].mxu1  ;;  %v184_v40 = vsub.s32 7, %v9316_v6 }
 0x160   :  { %v454_v19 = vadd.f32 %v453_v13, %v9335_v15  ;;  %v455_v11 = vpop.f32.mrb[14].mxu0  ;;  %v525_v12 = vadd.f32 %v524_v39, %v9338_v16  ;;  %v526_v21 = vpop.f32.mrb[13].mxu1  ;;  %v9405_v39 = vrot.slane %v9322_v10, %v172_v35 }
 0x161   :  { %v456_v23 = vadd.f32 %v455_v11, %v9330_v14  ;;  %v457_v25 = vpop.f32.mrb[15].mxu0  ;;  %v527_v26 = vadd.f32 %v526_v21, %v9341_v17  ;;  %v528_v29 = vpop.f32.mrb[14].mxu1  ;;  %v9413_v21 = vrot.slane %v9322_v10, %v176_v20 }
 0x162   :  { %v9400_v8 = vpack.c.bf16 %v454_v19, %v452_v4  ;;  %v458_v13 = vadd.f32 %v457_v25, %v9335_v15  ;;  %v529_v38 = vadd.f32 %v528_v29, %v9338_v16  ;;  %v530_v33 = vpop.f32.mrb[15].mxu1  ;;  %v9416_v4 = vrot.slane %v9322_v10, %v180_v18 }
 0x163   :  { %v9407_v27 = vpack.c.bf16 %v527_v26, %v525_v12  ;;  %v531_v11 = vadd.f32 %v530_v33, %v9341_v17  ;;  %v9421_v15 = vrot.slane %v9322_v10, %v184_v40 }
 0x164   :  { %10706 = vst [vmem:[#allocation27_spill] sm:$0xff] %v9400_v8  ;;  %v9410_v14 = vpack.c.bf16 %v458_v13, %v456_v23 }
 0x165   :  { %10707 = vst [vmem:[#allocation28_spill] sm:$0xff] %v9407_v27  ;;  %v9418_v19 = vpack.c.bf16 %v531_v11, %v529_v38 }
 0x166   :  { %10708 = vst [vmem:[#allocation29_spill] sm:$0xff] %v9410_v14  ;;  %v567_v16 = vpop.f32.mrb[16].mxu0 }
 0x167   :  { %10709 = vst [vmem:[#allocation30_spill] sm:$0xff] %v9418_v19  ;;  %v568_v35 = vadd.f32 %v567_v16, %v9405_v39  ;;  %v569_v12 = vpop.f32.mrb[17].mxu0  ;;  %v640_v25 = vpop.f32.mrb[16].mxu1 }
 0x168   :  { %v570_v17 = vadd.f32 %v569_v12, %v9413_v21  ;;  %v571_v33 = vpop.f32.mrb[18].mxu0  ;;  %v641_v23 = vadd.f32 %v640_v25, %v9416_v4  ;;  %v642_v20 = vpop.f32.mrb[17].mxu1 }
 0x169   :  { %v572_v26 = vadd.f32 %v571_v33, %v9405_v39  ;;  %v573_v18 = vpop.f32.mrb[19].mxu0  ;;  %v643_v38 = vadd.f32 %v642_v20, %v9421_v15  ;;  %v644_v29 = vpop.f32.mrb[18].mxu1 }
 0x16a   :  { %v9428_v13 = vpack.c.bf16 %v570_v17, %v568_v35  ;;  %v574_v10 = vadd.f32 %v573_v18, %v9413_v21  ;;  %v645_v40 = vadd.f32 %v644_v29, %v9416_v4  ;;  %v646_v11 = vpop.f32.mrb[19].mxu1 }
 0x16b   :  { %v9432_v16 = vpack.c.bf16 %v643_v38, %v641_v23  ;;  %v647_v12 = vadd.f32 %v646_v11, %v9421_v15 }
 0x16c   :  { %10710 = vst [vmem:[#allocation31_spill] sm:$0xff] %v9428_v13  ;;  %v9435_v6 = vpack.c.bf16 %v574_v10, %v572_v26 }
 0x16d   :  { %10711 = vst [vmem:[#allocation32_spill] sm:$0xff] %v9432_v16  ;;  %v9437_v25 = vpack.c.bf16 %v647_v12, %v645_v40 }
 0x16e   :  { %10712 = vst [vmem:[#allocation33_spill] sm:$0xff] %v9435_v6  ;;  %v577_v33 = vpop.f32.mrb[20].mxu0 }
 0x16f   :  { %10713 = vst [vmem:[#allocation34_spill] sm:$0xff] %v9437_v25  ;;  %v578_v19 = vadd.f32 %v577_v33, %v9405_v39  ;;  %v579_v20 = vpop.f32.mrb[21].mxu0  ;;  %v650_v14 = vpop.f32.mrb[20].mxu1 }
 0x170   :  { %v580_v35 = vadd.f32 %v579_v20, %v9413_v21  ;;  %v581_v17 = vpop.f32.mrb[22].mxu0  ;;  %v651_v18 = vadd.f32 %v650_v14, %v9416_v4  ;;  %v652_v29 = vpop.f32.mrb[21].mxu1 }
 0x171   :  { %v582_v23 = vadd.f32 %v581_v17, %v9405_v39  ;;  %v583_v38 = vpop.f32.mrb[23].mxu0  ;;  %v653_v11 = vadd.f32 %v652_v29, %v9421_v15  ;;  %v654_v26 = vpop.f32.mrb[22].mxu1 }
 0x172   :  { %v9444_v10 = vpack.c.bf16 %v580_v35, %v578_v19  ;;  %v584_v40 = vadd.f32 %v583_v38, %v9413_v21  ;;  %v655_v12 = vadd.f32 %v654_v26, %v9416_v4  ;;  %v656_v33 = vpop.f32.mrb[23].mxu1 }
 0x173   :  { %v9448_v16 = vpack.c.bf16 %v653_v11, %v651_v18  ;;  %v657_v20 = vadd.f32 %v656_v33, %v9421_v15 }
 0x174   :  { %10714 = vst [vmem:[#allocation35_spill] sm:$0xff] %v9444_v10  ;;  %v9451_v13 = vpack.c.bf16 %v584_v40, %v582_v23 }
 0x175   :  { %10715 = vst [vmem:[#allocation36_spill] sm:$0xff] %v9448_v16  ;;  %v9453_v14 = vpack.c.bf16 %v657_v20, %v655_v12 }
 0x176   :  { %10716 = vst [vmem:[#allocation37_spill] sm:$0xff] %v9451_v13  ;;  %v587_v17 = vpop.f32.mrb[24].mxu0 }
 0x177   :  { %10717 = vst [vmem:[#allocation38_spill] sm:$0xff] %v9453_v14  ;;  %v588_v25 = vadd.f32 %v587_v17, %v9405_v39  ;;  %v589_v29 = vpop.f32.mrb[25].mxu0  ;;  %v660_v6 = vpop.f32.mrb[24].mxu1 }
 0x178   :  { %v590_v19 = vadd.f32 %v589_v29, %v9413_v21  ;;  %v591_v35 = vpop.f32.mrb[26].mxu0  ;;  %v661_v38 = vadd.f32 %v660_v6, %v9416_v4  ;;  %v662_v26 = vpop.f32.mrb[25].mxu1 }
 0x179   :  { %v592_v18 = vadd.f32 %v591_v35, %v9405_v39  ;;  %v593_v11 = vpop.f32.mrb[27].mxu0  ;;  %v663_v33 = vadd.f32 %v662_v26, %v9421_v15  ;;  %v664_v23 = vpop.f32.mrb[26].mxu1 }
 0x17a   :  { %v9460_v40 = vpack.c.bf16 %v590_v19, %v588_v25  ;;  %v594_v12 = vadd.f32 %v593_v11, %v9413_v21  ;;  %v665_v20 = vadd.f32 %v664_v23, %v9416_v4  ;;  %v666_v17 = vpop.f32.mrb[27].mxu1 }
 0x17b   :  { %v9464_v27 = vpack.c.bf16 %v663_v33, %v661_v38  ;;  %v667_v29 = vadd.f32 %v666_v17, %v9421_v15 }
 0x17c   :  { %10718 = vst [vmem:[#allocation39_spill] sm:$0xff] %v9460_v40  ;;  %v9467_v8 = vpack.c.bf16 %v594_v12, %v592_v18 }
 0x17d   :  { %10719 = vst [vmem:[#allocation40_spill] sm:$0xff] %v9464_v27  ;;  %v9469_v6 = vpack.c.bf16 %v667_v29, %v665_v20 }
 0x17e   :  { %10720 = vst [vmem:[#allocation41_spill] sm:$0xff] %v9467_v8  ;;  %v597_v35 = vpop.f32.mrb[28].mxu0 }
 0x17f   :  { %10721 = vst [vmem:[#allocation42_spill] sm:$0xff] %v9469_v6  ;;  %v598_v16 = vadd.f32 %v597_v35, %v9405_v39  ;;  %v599_v26 = vpop.f32.mrb[29].mxu0  ;;  %v670_v10 = vpop.f32.mrb[28].mxu1 }
 0x180   :  { %v600_v25 = vadd.f32 %v599_v26, %v9413_v21  ;;  %v601_v19 = vpop.f32.mrb[30].mxu0  ;;  %v671_v11 = vadd.f32 %v670_v10, %v9416_v4  ;;  %v672_v23 = vpop.f32.mrb[29].mxu1 }
 0x181   :  { %v602_v38 = vadd.f32 %v601_v19, %v9405_v39  ;;  %v603_v33 = vpop.f32.mrb[31].mxu0  ;;  %v673_v17 = vadd.f32 %v672_v23, %v9421_v15  ;;  %v674_v18 = vpop.f32.mrb[30].mxu1  ;;  %v971_v19 = vunpack.c.l.bf16 %v9352_v34  ;;  %v970_v23 = vunpack.c.h.bf16 %v9348_v30 }
 0x182   :  { %v9476_v12 = vpack.c.bf16 %v600_v25, %v598_v16  ;;  %v604_v20 = vadd.f32 %v603_v33, %v9413_v21  ;;  %v675_v29 = vadd.f32 %v674_v18, %v9416_v4  ;;  %v676_v35 = vpop.f32.mrb[31].mxu1  ;;  %v972_v21 = vunpack.c.h.bf16 %v9352_v34 }
 0x183   :  { %v9480_v14 = vpack.c.bf16 %v673_v17, %v671_v11  ;;  %v677_v26 = vadd.f32 %v676_v35, %v9421_v15 }
 0x184   :  { %v7890_v13 = vpack.c.bf16 %v604_v20, %v602_v38 }
 0x185   :  { %v7891_v10 = vpack.c.bf16 %v677_v26, %v675_v29 }
 0x186   :  { %v1199_v39 = vpop.f32.mrb[32].mxu0 }
 0x187   :  { %v1247_v16 = vadd.f32 %v1199_v39, %v969_v22  ;;  %v1240_v25 = vpop.f32.mrb[32].mxu1  ;;  %v1201_v27 = vpop.f32.mrb[33].mxu0 }
 0x188   :  { %v1249_v4 = vadd.f32 %v1240_v25, %v971_v19  ;;  %v1248_v33 = vadd.f32 %v1201_v27, %v970_v23  ;;  %v1242_v11 = vpop.f32.mrb[33].mxu1  ;;  %v1203_v17 = vpop.f32.mrb[34].mxu0 }
 0x189   :  { %v7250_v18 = vmul.f32 -1.442695, %v1247_v16  ;;  %v1250_v15 = vadd.f32 %v1242_v11, %v972_v21  ;;  %v1204_v38 = vpop.f32.mrb[35].mxu0  ;;  %v1244_v20 = vpop.f32.mrb[34].mxu1 }
 0x18a   :  { %v7251_v29 = vmul.f32 -1.442695, %v1248_v33  ;;  %v1245_v35 = vpop.f32.mrb[35].mxu1  ;;  %v1278_v33 = vunpack.c.l.bf16 %v7890_v13  ;;  %v1281_v20 = vunpack.c.h.bf16 %v7891_v10 }
 0x18b   :  { %8326 = vpow2.f32 %v7250_v18  ;;  %v7252_v26 = vmul.f32 -1.442695, %v1250_v15  ;;  %v1280_v18 = vunpack.c.l.bf16 %v7891_v10  ;;  %v1279_v15 = vunpack.c.h.bf16 %v7890_v13 }
 0x18c   :  { %8328 = vpow2.f32 %v7251_v29 }
 0x18d   :  { %8330 = vpow2.f32 %v7252_v26 }
 0x18e   :  { %8332 = vtanh.f32 %v1249_v4 }
 0x195   :  { %v8327_v40 = vpop.eup %8326 }
 0x196   :  { %v8329_v30 = vpop.eup %8328  ;;  %v1254_v22 = vadd.f32 1.0, %v8327_v40 }
 0x197   :  { %v1260_v39 = vadd.f32 1.0, %v8329_v30  ;;  %v8331_v34 = vpop.eup %8330 }
 0x198   :  { %8334 = vrcp.f32 %v1254_v22  ;;  %v8333_v27 = vpop.eup %8332  ;;  %v1267_v25 = vadd.f32 1.0, %v8331_v34 }
 0x199   :  { %8336 = vrcp.f32 %v1260_v39 }
 0x19a   :  { %8338 = vrcp.f32 %v1267_v25 }
 0x1a2   :  { %v8335_v19 = vpop.eup %8334 }
 0x1a3   :  { %v8337_v23 = vpop.eup %8336  ;;  %v1271_v16 = vmul.f32 %v8335_v19, %v8333_v27 }
 0x1a4   :  { %v1270_v21 = vmul.f32 0.0, %v8337_v23  ;;  %v8339_v13 = vpop.eup %8338 }
 0x1a6   :  { %v9487_v11 = vadd.f32 %v1271_v16, %v1270_v21  ;;  %v1508_v17 = vpop.f32.mrb[36].mxu0 }
 0x1a7   :  { %v1556_v40 = vadd.f32 %v1508_v17, %v1278_v33  ;;  %v1549_v38 = vpop.f32.mrb[36].mxu1  ;;  %v1510_v4 = vpop.f32.mrb[37].mxu0 }
 0x1a8   :  { %8340 = vtanh.f32 %v9487_v11  ;;  %v1558_v29 = vadd.f32 %v1549_v38, %v1280_v18  ;;  %v1557_v35 = vadd.f32 %v1510_v4, %v1279_v15  ;;  %v1551_v26 = vpop.f32.mrb[37].mxu1  ;;  %v1512_v30 = vpop.f32.mrb[38].mxu0  ;;  %v9581_v38 = vld [vmem:[#allocation9 + $0x88] ss:$16 sps:$4 sm:$0xff]   ;;  %v9587_v4 = vld [vmem:[#allocation9 + $0xa4] ss:$16 sps:$4 sm:$0xff]  }
 0x1a9   :  { %v7285_v22 = vmul.f32 -1.442695, %v1556_v40  ;;  %v1559_v39 = vadd.f32 %v1551_v26, %v1281_v20  ;;  %v1513_v34 = vpop.f32.mrb[39].mxu0  ;;  %v1553_v27 = vpop.f32.mrb[38].mxu1  ;;  %v9579_v40 = vld [vmem:[#allocation9 + $0x80] ss:$16 sps:$4 sm:$0xff]  }
 0x1aa   :  { %v7286_v19 = vmul.f32 -1.442695, %v1557_v35  ;;  %v1554_v23 = vpop.f32.mrb[39].mxu1  ;;  %v9589_v20 = vld [vmem:[#allocation9 + $0xac] ss:$16 sps:$4 sm:$0xff]  }
 0x1ab   :  { %8342 = vpow2.f32 %v7285_v22  ;;  %v7287_v25 = vmul.f32 -1.442695, %v1559_v39  ;;  %v9593_v35 = vld [vmem:[#allocation9 + $0xa8] ss:$16 sps:$4 sm:$0xff]   ;;  %v9599_v26 = vld [vmem:[#allocation9 + $0xc4] ss:$16 sps:$4 sm:$0xff]  }
 0x1ac   :  { %8344 = vpow2.f32 %v7286_v19  ;;  %v9601_v30 = vld [vmem:[#allocation9 + $0xcc] ss:$16 sps:$4 sm:$0xff]   ;;  %v9603_v22 = vld [vmem:[#allocation9 + $0xc0] ss:$16 sps:$4 sm:$0xff]   ;;  %v9605_v39 = vld [vmem:[#allocation9 + $0xc8] ss:$16 sps:$4 sm:$0xff]  }
 0x1ad   :  { %8346 = vpow2.f32 %v7287_v25  ;;  %v9611_v34 = vld [vmem:[#allocation9 + $0xe4] ss:$16 sps:$4 sm:$0xff]   ;;  %v9613_v27 = vld [vmem:[#allocation9 + $0xec] ss:$16 sps:$4 sm:$0xff]   ;;  %v9615_v19 = vld [vmem:[#allocation9 + $0xe0] ss:$16 sps:$4 sm:$0xff]   ;;  %v1592_v25 = vunpack.c.l.bf16 %v9355_v36 }
 0x1ae   :  { %8348 = vtanh.f32 %v1558_v29  ;;  %v9591_v29 = vld [vmem:[#allocation9 + $0xa0] ss:$16 sps:$4 sm:$0xff]   ;;  %v9617_v23 = vld [vmem:[#allocation9 + $0xe8] ss:$16 sps:$4 sm:$0xff]  }
 0x1b2   :  { %v8341_v16 = vpop.eup %8340 }
 0x1b3   :  { %v1274_v21 = vmul.f32 %v8341_v16, %v8339_v13  ;;  %v9623_v13 = vld [vmem:[#allocation10 + $0x4] ss:$16 sps:$4 sm:$0xff]   ;;  %v9625_v16 = vld [vmem:[#allocation10 + $0xc] ss:$16 sps:$4 sm:$0xff]  }
 0x1b5   :  { %v8343_v33 = vpop.eup %8342  ;;  %v1584_v10 = vpack.c.bf16 %v1274_v21, %v1274_v21  ;;  %v1594_v21 = vunpack.c.l.bf16 %v9357_v37 }
 0x1b6   :  { %v8345_v17 = vpop.eup %8344  ;;  %v1563_v32 = vadd.f32 1.0, %v8343_v33 }
 0x1b7   :  { %v1569_v18 = vadd.f32 1.0, %v8345_v17  ;;  %1585 = vst [vmem:[#allocation2] sm:$0xf] %v1584_v10  ;;  %1821 = vmatmul.mubr.bf16.vlgmr.msra.gmra.mrb[40].mxu0 %v1584_v10  ;;  %1862 = vmatmul.mubr.bf16.vlgmr.msra.gmra.mrb[40].mxu1 %v1584_v10  ;;  %v1593_v17 = vunpack.c.h.bf16 %v9355_v36 }
 0x1b8   :  { %8350 = vrcp.f32 %v1563_v32  ;;  %2098 = vmatpush1.bf16.msra.mxu0 %v9179_v41  ;;  %2139 = vmatpush1.bf16.msra.mxu1 %v9182_v42  ;;  %v8347_v41 = vpop.eup %8346 }
 0x1b9   :  { %8352 = vrcp.f32 %v1569_v18  ;;  %2099 = vmatprep.subr.bf16.mxu0 %v9184_v43  ;;  %2140 = vmatprep.subr.bf16.mxu1 %v9187_v44  ;;  %v8349_v42 = vpop.eup %8348  ;;  %v1595_v18 = vunpack.c.h.bf16 %v9357_v37 }
 0x1ba   :  { %2129 = vmatprep.mubr.bf16.mxu0 %v10698_v0  ;;  %2170 = vmatprep.mubr.bf16.mxu1 %v10698_v0 }
 0x1bc   :  { %2100 = vmatpush1.bf16.msra.mxu0 %v9192_v45  ;;  %2141 = vmatpush1.bf16.msra.mxu1 %v9195_v46  ;;  %v1576_v45 = vadd.f32 1.0, %v8347_v41 }
 0x1bd   :  { %2101 = vmatprep.subr.bf16.mxu0 %v9197_v47  ;;  %2142 = vmatprep.subr.bf16.mxu1 %v9201_v48  ;;  %v10722_v47 = vld [vmem:[#allocation19_spill] sm:$0xff] }
 0x1be   :  { %8354 = vrcp.f32 %v1576_v45 }
 0x1c0   :  { %2102 = vmatpush1.bf16.msra.mxu0 %v9206_v49  ;;  %2143 = vmatpush1.bf16.msra.mxu1 %v9209_v50 }
 0x1c1   :  { %2103 = vmatprep.subr.bf16.mxu0 %v9211_v51  ;;  %2144 = vmatprep.subr.bf16.mxu1 %v9215_v52  ;;  %v9527_v52 = vld [vmem:[#allocation9 + $0x4] ss:$16 sps:$4 sm:$0xff]  }
 0x1c2   :  { %v8351_v43 = vpop.eup %8350 }
 0x1c3   :  { %v8353_v44 = vpop.eup %8352  ;;  %v1580_v32 = vmul.f32 %v8351_v43, %v8349_v42 }
 0x1c4   :  { %v1579_v15 = vmul.f32 0.0, %v8353_v44  ;;  %2104 = vmatpush1.bf16.msra.mxu0 %v9220_v53  ;;  %2145 = vmatpush1.bf16.msra.mxu1 %v9222_v54  ;;  %v9529_v53 = vld [vmem:[#allocation9 + $0xc] ss:$16 sps:$4 sm:$0xff]   ;;  %v9531_v54 = vld [vmem:[#allocation9] ss:$16 sps:$4 sm:$0xff]  }
 0x1c5   :  { %2105 = vmatprep.subr.bf16.mxu0 %v9224_v55  ;;  %2146 = vmatprep.subr.bf16.mxu1 %v9227_v56  ;;  %v9533_v55 = vld [vmem:[#allocation9 + $0x8] ss:$16 sps:$4 sm:$0xff]   ;;  %v9541_v56 = vld [vmem:[#allocation9 + $0x2c] ss:$16 sps:$4 sm:$0xff]  }
 0x1c6   :  { %v9508_v46 = vadd.f32 %v1580_v32, %v1579_v15 }
 0x1c8   :  { %8356 = vtanh.f32 %v9508_v46  ;;  %2106 = vmatpush1.bf16.msra.mxu0 %v9232_v57  ;;  %2147 = vmatpush1.bf16.msra.mxu1 %v9234_v58  ;;  %v8355_v48 = vpop.eup %8354  ;;  %v9543_v57 = vld [vmem:[#allocation9 + $0x20] ss:$16 sps:$4 sm:$0xff]   ;;  %v9545_v58 = vld [vmem:[#allocation9 + $0x28] ss:$16 sps:$4 sm:$0xff]  }
 0x1c9   :  { %2107 = vmatprep.subr.bf16.mxu0 %v9236_v59  ;;  %2148 = vmatprep.subr.bf16.mxu1 %v9239_v60  ;;  %v9551_v59 = vld [vmem:[#allocation9 + $0x44] ss:$16 sps:$4 sm:$0xff]   ;;  %v9553_v60 = vld [vmem:[#allocation9 + $0x4c] ss:$16 sps:$4 sm:$0xff]  }
 0x1cc   :  { %2108 = vmatpush1.bf16.msra.mxu0 %v9244_v61  ;;  %2149 = vmatpush1.bf16.msra.mxu1 %v9246_v62  ;;  %v9555_v61 = vld [vmem:[#allocation9 + $0x40] ss:$16 sps:$4 sm:$0xff]   ;;  %v9557_v62 = vld [vmem:[#allocation9 + $0x48] ss:$16 sps:$4 sm:$0xff]  }
 0x1cd   :  { %2109 = vmatprep.subr.bf16.mxu0 %v9248_v63  ;;  %2150 = vmatprep.subr.bf16.mxu1 %v10722_v47  ;;  %v9563_v63 = vld [vmem:[#allocation9 + $0x64] ss:$16 sps:$4 sm:$0xff]  }
 0x1d0   :  { %2110 = vmatpush1.bf16.msra.mxu0 %v9256_v1  ;;  %2151 = vmatpush1.bf16.msra.mxu1 %v9258_v2  ;;  %v9565_v1 = vld [vmem:[#allocation9 + $0x6c] ss:$16 sps:$4 sm:$0xff]   ;;  %v9567_v2 = vld [vmem:[#allocation9 + $0x60] ss:$16 sps:$4 sm:$0xff]  }
 0x1d1   :  { %2111 = vmatprep.subr.bf16.mxu0 %v9260_v3  ;;  %2152 = vmatprep.subr.bf16.mxu1 %v9263_v5  ;;  %v9569_v3 = vld [vmem:[#allocation9 + $0x68] ss:$16 sps:$4 sm:$0xff]   ;;  %v9575_v5 = vld [vmem:[#allocation9 + $0x84] ss:$16 sps:$4 sm:$0xff]  }
 0x1d2   :  { %v8357_v49 = vpop.eup %8356 }
 0x1d3   :  { %v1583_v50 = vmul.f32 %v8357_v49, %v8355_v48 }
 0x1d4   :  { %2112 = vmatpush1.bf16.msra.mxu0 %v9268_v7  ;;  %2153 = vmatpush1.bf16.msra.mxu1 %v9270_v9  ;;  %v9539_v9 = vld [vmem:[#allocation9 + $0x24] ss:$16 sps:$4 sm:$0xff]   ;;  %v9577_v7 = vld [vmem:[#allocation9 + $0x8c] ss:$16 sps:$4 sm:$0xff]  }
 0x1d5   :  { %v1586_v51 = vpack.c.bf16 %v1583_v50, %v1583_v50  ;;  %2412 = vmatprep.subr.bf16.mxu0 %v9527_v52  ;;  %2453 = vmatprep.subr.bf16.mxu1 %v9529_v53 }
 0x1d7   :  { %1588 = vst [vmem:[#allocation3 + $0x1c] sm:$0xf] %v1586_v51  ;;  %2130 = vmatmul.mubr.bf16.vlgmr.msra.gmra.mrb[44].mxu0 %v1586_v51  ;;  %2171 = vmatmul.mubr.bf16.vlgmr.msra.gmra.mrb[44].mxu1 %v1586_v51 }
 0x1d8   :  { %2444 = vmatprep.mubr.bf16.mxu0 %v10698_v0  ;;  %2485 = vmatprep.mubr.bf16.mxu1 %v10698_v0 }
 0x1d9   :  { %2413 = vmatpush1.bf16.msra.mxu0 %v9531_v54  ;;  %2454 = vmatpush1.bf16.msra.mxu1 %v9533_v55 }
 0x1da   :  { %2414 = vmatprep.subr.bf16.mxu0 %v9539_v9  ;;  %2455 = vmatprep.subr.bf16.mxu1 %v9541_v56 }
 0x1dd   :  { %2415 = vmatpush1.bf16.msra.mxu0 %v9543_v57  ;;  %2456 = vmatpush1.bf16.msra.mxu1 %v9545_v58 }
 0x1de   :  { %2416 = vmatprep.subr.bf16.mxu0 %v9551_v59  ;;  %2457 = vmatprep.subr.bf16.mxu1 %v9553_v60 }
 0x1e1   :  { %2417 = vmatpush1.bf16.msra.mxu0 %v9555_v61  ;;  %2458 = vmatpush1.bf16.msra.mxu1 %v9557_v62 }
 0x1e2   :  { %2418 = vmatprep.subr.bf16.mxu0 %v9563_v63  ;;  %2459 = vmatprep.subr.bf16.mxu1 %v9565_v1 }
 0x1e5   :  { %2419 = vmatpush1.bf16.msra.mxu0 %v9567_v2  ;;  %2460 = vmatpush1.bf16.msra.mxu1 %v9569_v3 }
 0x1e6   :  { %2420 = vmatprep.subr.bf16.mxu0 %v9575_v5  ;;  %2461 = vmatprep.subr.bf16.mxu1 %v9577_v7 }
 0x1e9   :  { %2421 = vmatpush1.bf16.msra.mxu0 %v9579_v40  ;;  %2462 = vmatpush1.bf16.msra.mxu1 %v9581_v38 }
 0x1ea   :  { %2422 = vmatprep.subr.bf16.mxu0 %v9587_v4  ;;  %2463 = vmatprep.subr.bf16.mxu1 %v9589_v20 }
 0x1ed   :  { %2423 = vmatpush1.bf16.msra.mxu0 %v9591_v29  ;;  %2464 = vmatpush1.bf16.msra.mxu1 %v9593_v35 }
 0x1ee   :  { %2424 = vmatprep.subr.bf16.mxu0 %v9599_v26  ;;  %2465 = vmatprep.subr.bf16.mxu1 %v9601_v30 }
 0x1f1   :  { %2425 = vmatpush1.bf16.msra.mxu0 %v9603_v22  ;;  %2466 = vmatpush1.bf16.msra.mxu1 %v9605_v39 }
 0x1f2   :  { %2426 = vmatprep.subr.bf16.mxu0 %v9611_v34  ;;  %2467 = vmatprep.subr.bf16.mxu1 %v9613_v27 }
 0x1f5   :  { %2427 = vmatpush1.bf16.msra.mxu0 %v9615_v19  ;;  %2468 = vmatpush1.bf16.msra.mxu1 %v9617_v23 }
 0x1f6   :  { %2721 = vmatprep.subr.bf16.mxu0 %v9623_v13  ;;  %2762 = vmatprep.subr.bf16.mxu1 %v9625_v16 }
 0x28a   :  { %v1822_v33 = vpop.f32.mrb[40].mxu0  ;;  %v1863_v10 = vpop.f32.mrb[40].mxu1 }
 0x28b   :  { %v1870_v41 = vadd.f32 %v1822_v33, %v1592_v25  ;;  %v1872_v42 = vadd.f32 %v1863_v10, %v1594_v21  ;;  %v1824_v43 = vpop.f32.mrb[41].mxu0  ;;  %v1865_v44 = vpop.f32.mrb[41].mxu1 }
 0x28c   :  { %v1871_v32 = vadd.f32 %v1824_v43, %v1593_v17  ;;  %v1873_v45 = vadd.f32 %v1865_v44, %v1595_v18  ;;  %v1826_v15 = vpop.f32.mrb[42].mxu0  ;;  %v1867_v47 = vpop.f32.mrb[42].mxu1  ;;  %v1901_v43 = vunpack.c.l.bf16 %v9476_v12  ;;  %v1903_v44 = vunpack.c.l.bf16 %v9480_v14 }
 0x28d   :  { %v7320_v48 = vmul.f32 -1.442695, %v1870_v41  ;;  %v1827_v49 = vpop.f32.mrb[43].mxu0  ;;  %v1868_v50 = vpop.f32.mrb[43].mxu1 }
 0x28e   :  { %v7321_v51 = vmul.f32 -1.442695, %v1871_v32  ;;  %v7322_v31 = vmul.f32 -1.442695, %v1873_v45 }
 0x28f   :  { %8358 = vpow2.f32 %v7320_v48 }
 0x290   :  { %8360 = vpow2.f32 %v7321_v51 }
 0x291   :  { %8362 = vpow2.f32 %v7322_v31 }
 0x292   :  { %8364 = vtanh.f32 %v1872_v42  ;;  %v1904_v42 = vunpack.c.h.bf16 %v9480_v14 }
 0x299   :  { %v8359_v6 = vpop.eup %8358 }
 0x29a   :  { %v8361_v8 = vpop.eup %8360  ;;  %v1877_v36 = vadd.f32 1.0, %v8359_v6 }
 0x29b   :  { %v1883_v37 = vadd.f32 1.0, %v8361_v8  ;;  %v8363_v25 = vpop.eup %8362  ;;  %v1902_v8 = vunpack.c.h.bf16 %v9476_v12 }
 0x29c   :  { %8366 = vrcp.f32 %v1877_v36  ;;  %v8365_v21 = vpop.eup %8364  ;;  %v1890_v18 = vadd.f32 1.0, %v8363_v25 }
 0x29d   :  { %8368 = vrcp.f32 %v1883_v37 }
 0x29e   :  { %8370 = vrcp.f32 %v1890_v18  ;;  %v9643_v18 = vld [vmem:[#allocation10 + $0x8] ss:$16 sps:$4 sm:$0xff]  }
 0x2a6   :  { %v8367_v33 = vpop.eup %8366 }
 0x2a7   :  { %v8369_v10 = vpop.eup %8368  ;;  %v1894_v17 = vmul.f32 %v8367_v33, %v8365_v21 }
 0x2a8   :  { %v1893_v41 = vmul.f32 %v8369_v10, %v9487_v11  ;;  %v8371_v12 = vpop.eup %8370 }
 0x2aa   :  { %v9636_v32 = vadd.f32 %v1894_v17, %v1893_v41  ;;  %v2131_v6 = vpop.f32.mrb[44].mxu0  ;;  %v2172_v31 = vpop.f32.mrb[44].mxu1  ;;  %v9641_v17 = vld [vmem:[#allocation10] ss:$16 sps:$4 sm:$0xff]  }
 0x2ab   :  { %v2179_v45 = vadd.f32 %v2131_v6, %v1901_v43  ;;  %v2181_v15 = vadd.f32 %v2172_v31, %v1903_v44  ;;  %v2133_v47 = vpop.f32.mrb[45].mxu0  ;;  %v2174_v48 = vpop.f32.mrb[45].mxu1  ;;  %v9645_v44 = vld [vmem:[#allocation10 + $0x24] ss:$16 sps:$4 sm:$0xff]   ;;  %v9647_v6 = vld [vmem:[#allocation10 + $0x2c] ss:$16 sps:$4 sm:$0xff]  }
 0x2ac   :  { %v2180_v49 = vadd.f32 %v2133_v47, %v1902_v8  ;;  %v2182_v50 = vadd.f32 %v2174_v48, %v1904_v42  ;;  %v2135_v11 = vpop.f32.mrb[46].mxu0  ;;  %v2176_v51 = vpop.f32.mrb[46].mxu1  ;;  %8372 = vtanh.f32 %v9636_v32  ;;  %v9653_v47 = vld [vmem:[#allocation10 + $0x28] ss:$16 sps:$4 sm:$0xff]   ;;  %v9657_v48 = vld [vmem:[#allocation10 + $0x44] ss:$16 sps:$4 sm:$0xff]  }
 0x2ad   :  { %v7355_v36 = vmul.f32 -1.442695, %v2179_v45  ;;  %v2136_v37 = vpop.f32.mrb[47].mxu0  ;;  %v2177_v25 = vpop.f32.mrb[47].mxu1  ;;  %v9651_v45 = vld [vmem:[#allocation10 + $0x20] ss:$16 sps:$4 sm:$0xff]  }
 0x2ae   :  { %v7356_v21 = vmul.f32 -1.442695, %v2180_v49  ;;  %v7357_v14 = vmul.f32 -1.442695, %v2182_v50  ;;  %v9665_v49 = vld [vmem:[#allocation10 + $0x40] ss:$16 sps:$4 sm:$0xff]  }
 0x2af   :  { %8374 = vpow2.f32 %v7355_v36  ;;  %v9667_v50 = vld [vmem:[#allocation10 + $0x48] ss:$16 sps:$4 sm:$0xff]   ;;  %v9671_v11 = vld [vmem:[#allocation10 + $0x64] ss:$16 sps:$4 sm:$0xff]   ;;  %v9673_v51 = vld [vmem:[#allocation10 + $0x6c] ss:$16 sps:$4 sm:$0xff]  }
 0x2b0   :  { %8376 = vpow2.f32 %v7356_v21  ;;  %10723 = vst [vmem:[#allocation19_spill] sm:$0xff] %v9671_v11  ;;  %10724 = vst [vmem:[#allocation43_spill] sm:$0xff] %v9673_v51  ;;  %v9677_v37 = vld [vmem:[#allocation10 + $0x60] ss:$16 sps:$4 sm:$0xff]   ;;  %v9679_v25 = vld [vmem:[#allocation10 + $0x68] ss:$16 sps:$4 sm:$0xff]  }
 0x2b1   :  { %8378 = vpow2.f32 %v7357_v14 }
 0x2b2   :  { %8380 = vtanh.f32 %v2181_v15  ;;  %v9659_v15 = vld [vmem:[#allocation10 + $0x4c] ss:$16 sps:$4 sm:$0xff]  }
 0x2b6   :  { %v8373_v33 = vpop.eup %8372 }
 0x2b7   :  { %v1897_v10 = vmul.f32 %v8373_v33, %v8371_v12  ;;  %v9683_v12 = vld [vmem:[#allocation10 + $0x84] ss:$16 sps:$4 sm:$0xff]   ;;  %v9685_v33 = vld [vmem:[#allocation10 + $0x8c] ss:$16 sps:$4 sm:$0xff]  }
 0x2b9   :  { %v8375_v41 = vpop.eup %8374  ;;  %v2207_v43 = vpack.c.bf16 %v1897_v10, %v1897_v10 }
 0x2ba   :  { %v8377_v31 = vpop.eup %8376  ;;  %v2186_v8 = vadd.f32 1.0, %v8375_v41 }
 0x2bb   :  { %v2192_v42 = vadd.f32 1.0, %v8377_v31  ;;  %2209 = vst [vmem:[#allocation2 + $0x4] sm:$0xf] %v2207_v43  ;;  %2445 = vmatmul.mubr.bf16.vlgmr.msra.gmra.mrb[48].mxu0 %v2207_v43  ;;  %2486 = vmatmul.mubr.bf16.vlgmr.msra.gmra.mrb[48].mxu1 %v2207_v43  ;;  %v8379_v36 = vpop.eup %8378 }
 0x2bc   :  { %8382 = vrcp.f32 %v2186_v8  ;;  %2722 = vmatpush1.bf16.msra.mxu0 %v9641_v17  ;;  %2763 = vmatpush1.bf16.msra.mxu1 %v9643_v18  ;;  %v8381_v21 = vpop.eup %8380  ;;  %v2199_v43 = vadd.f32 1.0, %v8379_v36  ;;  %v9690_v8 = vld [vmem:[#allocation10 + $0x80] ss:$16 sps:$4 sm:$0xff]   ;;  %v9706_v36 = vld [vmem:[#allocation10 + $0xa8] ss:$16 sps:$4 sm:$0xff]  }
 0x2bd   :  { %8384 = vrcp.f32 %v2192_v42  ;;  %2723 = vmatprep.subr.bf16.mxu0 %v9645_v44  ;;  %2764 = vmatprep.subr.bf16.mxu1 %v9647_v6  ;;  %v9692_v42 = vld [vmem:[#allocation10 + $0x88] ss:$16 sps:$4 sm:$0xff]   ;;  %10729 = vst [vmem:[#allocation48_spill] sm:$0xff] %v9706_v36 }
 0x2be   :  { %2753 = vmatprep.mubr.bf16.mxu0 %v10698_v0  ;;  %2794 = vmatprep.mubr.bf16.mxu1 %v10698_v0  ;;  %10725 = vst [vmem:[#allocation44_spill] sm:$0xff] %v9692_v42  ;;  %8386 = vrcp.f32 %v2199_v43  ;;  %v9719_v43 = vld [vmem:[#allocation10 + $0xc8] ss:$16 sps:$4 sm:$0xff]  }
 0x2c0   :  { %2724 = vmatpush1.bf16.msra.mxu0 %v9651_v45  ;;  %2765 = vmatpush1.bf16.msra.mxu1 %v9653_v47 }
 0x2c1   :  { %2725 = vmatprep.subr.bf16.mxu0 %v9657_v48  ;;  %2766 = vmatprep.subr.bf16.mxu1 %v9659_v15 }
 0x2c4   :  { %2726 = vmatpush1.bf16.msra.mxu0 %v9665_v49  ;;  %2767 = vmatpush1.bf16.msra.mxu1 %v9667_v50 }
 0x2c5   :  { %2727 = vmatprep.subr.bf16.mxu0 %v9671_v11  ;;  %2768 = vmatprep.subr.bf16.mxu1 %v9673_v51  ;;  %v9696_v51 = vld [vmem:[#allocation10 + $0xa4] ss:$16 sps:$4 sm:$0xff]   ;;  %v9698_v11 = vld [vmem:[#allocation10 + $0xac] ss:$16 sps:$4 sm:$0xff]  }
 0x2c6   :  { %v8383_v14 = vpop.eup %8382  ;;  %10726 = vst [vmem:[#allocation45_spill] sm:$0xff] %v9696_v51  ;;  %10727 = vst [vmem:[#allocation46_spill] sm:$0xff] %v9698_v11 }
 0x2c7   :  { %v8385_v10 = vpop.eup %8384  ;;  %v2203_v41 = vmul.f32 %v8383_v14, %v8381_v21  ;;  %v9711_v14 = vld [vmem:[#allocation10 + $0xc4] ss:$16 sps:$4 sm:$0xff]  }
 0x2c8   :  { %v2202_v31 = vmul.f32 %v8385_v10, %v9508_v46  ;;  %2728 = vmatpush1.bf16.msra.mxu0 %v9677_v37  ;;  %2769 = vmatpush1.bf16.msra.mxu1 %v9679_v25  ;;  %v9704_v46 = vld [vmem:[#allocation10 + $0xa0] ss:$16 sps:$4 sm:$0xff]   ;;  %10730 = vst [vmem:[#allocation49_spill] sm:$0xff] %v9711_v14  ;;  %v9713_v10 = vld [vmem:[#allocation10 + $0xcc] ss:$16 sps:$4 sm:$0xff]  }
 0x2c9   :  { %2729 = vmatprep.subr.bf16.mxu0 %v9683_v12  ;;  %2770 = vmatprep.subr.bf16.mxu1 %v9685_v33  ;;  %10728 = vst [vmem:[#allocation47_spill] sm:$0xff] %v9704_v46  ;;  %10731 = vst [vmem:[#allocation50_spill] sm:$0xff] %v9713_v10 }
 0x2ca   :  { %v9700_v21 = vadd.f32 %v2203_v41, %v2202_v31  ;;  %v9717_v41 = vld [vmem:[#allocation10 + $0xc0] ss:$16 sps:$4 sm:$0xff]   ;;  %v9723_v31 = vld [vmem:[#allocation10 + $0xe4] ss:$16 sps:$4 sm:$0xff]  }
 0x2cc   :  { %2730 = vmatpush1.bf16.msra.mxu0 %v9690_v8  ;;  %2771 = vmatpush1.bf16.msra.mxu1 %v9692_v42  ;;  %8388 = vtanh.f32 %v9700_v21 }
 0x2cd   :  { %2731 = vmatprep.subr.bf16.mxu0 %v9696_v51  ;;  %2772 = vmatprep.subr.bf16.mxu1 %v9698_v11  ;;  %v9725_v51 = vld [vmem:[#allocation10 + $0xec] ss:$16 sps:$4 sm:$0xff]   ;;  %v9729_v11 = vld [vmem:[#allocation10 + $0xe0] ss:$16 sps:$4 sm:$0xff]  }
 0x2d0   :  { %2732 = vmatpush1.bf16.msra.mxu0 %v9704_v46  ;;  %2773 = vmatpush1.bf16.msra.mxu1 %v9706_v36  ;;  %v9731_v46 = vld [vmem:[#allocation10 + $0xe8] ss:$16 sps:$4 sm:$0xff]   ;;  %v8387_v36 = vpop.eup %8386 }
 0x2d1   :  { %2733 = vmatprep.subr.bf16.mxu0 %v9711_v14  ;;  %2774 = vmatprep.subr.bf16.mxu1 %v9713_v10 }
 0x2d4   :  { %2734 = vmatpush1.bf16.msra.mxu0 %v9717_v41  ;;  %2775 = vmatpush1.bf16.msra.mxu1 %v9719_v43 }
 0x2d5   :  { %2735 = vmatprep.subr.bf16.mxu0 %v9723_v31  ;;  %2776 = vmatprep.subr.bf16.mxu1 %v9725_v51 }
 0x2d6   :  { %v8389_v14 = vpop.eup %8388 }
 0x2d7   :  { %v2206_v42 = vmul.f32 %v8389_v14, %v8387_v36 }
 0x2d8   :  { %2736 = vmatpush1.bf16.msra.mxu0 %v9729_v11  ;;  %2777 = vmatpush1.bf16.msra.mxu1 %v9731_v46 }
 0x2d9   :  { %v2210_v10 = vpack.c.bf16 %v2206_v42, %v2206_v42  ;;  %3036 = vmatprep.subr.bf16.mxu0 %v9527_v52  ;;  %3077 = vmatprep.subr.bf16.mxu1 %v9529_v53  ;;  %v2216_v52 = vunpack.c.l.bf16 %v9364_v24  ;;  %v2218_v53 = vunpack.c.l.bf16 %v9368_v28 }
 0x2db   :  { %2212 = vst [vmem:[#allocation3 + $0x18] sm:$0xf] %v2210_v10  ;;  %2754 = vmatmul.mubr.bf16.vlgmr.msra.gmra.mrb[52].mxu0 %v2210_v10  ;;  %2795 = vmatmul.mubr.bf16.vlgmr.msra.gmra.mrb[52].mxu1 %v2210_v10 }
 0x2dc   :  { %3037 = vmatpush1.bf16.msra.mxu0 %v9531_v54  ;;  %3078 = vmatpush1.bf16.msra.mxu1 %v9533_v55 }
 0x2dd   :  { %3038 = vmatprep.subr.bf16.mxu0 %v9539_v9  ;;  %3079 = vmatprep.subr.bf16.mxu1 %v9541_v56  ;;  %v2217_v9 = vunpack.c.h.bf16 %v9364_v24  ;;  %v2219_v56 = vunpack.c.h.bf16 %v9368_v28 }
 0x2de   :  { %3068 = vmatprep.mubr.bf16.mxu0 %v10698_v0  ;;  %3109 = vmatprep.mubr.bf16.mxu1 %v10698_v0 }
 0x2e0   :  { %3039 = vmatpush1.bf16.msra.mxu0 %v9543_v57  ;;  %3080 = vmatpush1.bf16.msra.mxu1 %v9545_v58 }
 0x2e1   :  { %3040 = vmatprep.subr.bf16.mxu0 %v9551_v59  ;;  %3081 = vmatprep.subr.bf16.mxu1 %v9553_v60 }
 0x2e4   :  { %3041 = vmatpush1.bf16.msra.mxu0 %v9555_v61  ;;  %3082 = vmatpush1.bf16.msra.mxu1 %v9557_v62 }
 0x2e5   :  { %3042 = vmatprep.subr.bf16.mxu0 %v9563_v63  ;;  %3083 = vmatprep.subr.bf16.mxu1 %v9565_v1 }
 0x2e8   :  { %3043 = vmatpush1.bf16.msra.mxu0 %v9567_v2  ;;  %3084 = vmatpush1.bf16.msra.mxu1 %v9569_v3 }
 0x2e9   :  { %3044 = vmatprep.subr.bf16.mxu0 %v9575_v5  ;;  %3085 = vmatprep.subr.bf16.mxu1 %v9577_v7 }
 0x2ec   :  { %3045 = vmatpush1.bf16.msra.mxu0 %v9579_v40  ;;  %3086 = vmatpush1.bf16.msra.mxu1 %v9581_v38 }
 0x2ed   :  { %3046 = vmatprep.subr.bf16.mxu0 %v9587_v4  ;;  %3087 = vmatprep.subr.bf16.mxu1 %v9589_v20 }
 0x2f0   :  { %3047 = vmatpush1.bf16.msra.mxu0 %v9591_v29  ;;  %3088 = vmatpush1.bf16.msra.mxu1 %v9593_v35 }
 0x2f1   :  { %3048 = vmatprep.subr.bf16.mxu0 %v9599_v26  ;;  %3089 = vmatprep.subr.bf16.mxu1 %v9601_v30 }
 0x2f4   :  { %3049 = vmatpush1.bf16.msra.mxu0 %v9603_v22  ;;  %3090 = vmatpush1.bf16.msra.mxu1 %v9605_v39 }
 0x2f5   :  { %3050 = vmatprep.subr.bf16.mxu0 %v9611_v34  ;;  %3091 = vmatprep.subr.bf16.mxu1 %v9613_v27  ;;  %v10732_v34 = vld [vmem:[#allocation41_spill] sm:$0xff] }
 0x2f6   :  { %v2525_v27 = vunpack.c.l.bf16 %v10732_v34  ;;  %v2526_v36 = vunpack.c.h.bf16 %v10732_v34  ;;  %v9859_v34 = vld [vmem:[#allocation9 + $0x64] ss:$16 sps:$4 sm:$0xff]  }
 0x2f8   :  { %3051 = vmatpush1.bf16.msra.mxu0 %v9615_v19  ;;  %3092 = vmatpush1.bf16.msra.mxu1 %v9617_v23  ;;  %v10733_v19 = vld [vmem:[#allocation42_spill] sm:$0xff] }
 0x2f9   :  { %3345 = vmatprep.subr.bf16.mxu0 %v9623_v13  ;;  %3386 = vmatprep.subr.bf16.mxu1 %v9625_v16  ;;  %v2527_v23 = vunpack.c.l.bf16 %v10733_v19  ;;  %v2528_v14 = vunpack.c.h.bf16 %v10733_v19  ;;  %v9863_v19 = vld [vmem:[#allocation9 + $0x60] ss:$16 sps:$4 sm:$0xff]  }
 0x38e   :  { %v2446_v54 = vpop.f32.mrb[48].mxu0  ;;  %v2487_v55 = vpop.f32.mrb[48].mxu1 }
 0x38f   :  { %v2494_v57 = vadd.f32 %v2446_v54, %v2216_v52  ;;  %v2496_v58 = vadd.f32 %v2487_v55, %v2218_v53  ;;  %v2448_v59 = vpop.f32.mrb[49].mxu0  ;;  %v2489_v60 = vpop.f32.mrb[49].mxu1 }
 0x390   :  { %v2495_v61 = vadd.f32 %v2448_v59, %v2217_v9  ;;  %v2497_v62 = vadd.f32 %v2489_v60, %v2219_v56  ;;  %v2450_v63 = vpop.f32.mrb[50].mxu0  ;;  %v2491_v1 = vpop.f32.mrb[50].mxu1 }
 0x391   :  { %v7390_v2 = vmul.f32 -1.442695, %v2494_v57  ;;  %v2451_v3 = vpop.f32.mrb[51].mxu0  ;;  %v2492_v5 = vpop.f32.mrb[51].mxu1 }
 0x392   :  { %v7391_v7 = vmul.f32 -1.442695, %v2495_v61  ;;  %v7392_v40 = vmul.f32 -1.442695, %v2497_v62 }
 0x393   :  { %8390 = vpow2.f32 %v7390_v2 }
 0x394   :  { %8392 = vpow2.f32 %v7391_v7 }
 0x395   :  { %8394 = vpow2.f32 %v7392_v40 }
 0x396   :  { %8396 = vtanh.f32 %v2496_v58 }
 0x39d   :  { %v8391_v38 = vpop.eup %8390 }
 0x39e   :  { %v8393_v4 = vpop.eup %8392  ;;  %v2501_v24 = vadd.f32 1.0, %v8391_v38 }
 0x39f   :  { %v2507_v28 = vadd.f32 1.0, %v8393_v4  ;;  %v8395_v20 = vpop.eup %8394 }
 0x3a0   :  { %8398 = vrcp.f32 %v2501_v24  ;;  %v8397_v29 = vpop.eup %8396  ;;  %v2514_v22 = vadd.f32 1.0, %v8395_v20 }
 0x3a1   :  { %8400 = vrcp.f32 %v2507_v28 }
 0x3a2   :  { %8402 = vrcp.f32 %v2514_v22  ;;  %v9851_v22 = vld [vmem:[#allocation9 + $0x40] ss:$16 sps:$4 sm:$0xff]  }
 0x3aa   :  { %v8399_v35 = vpop.eup %8398 }
 0x3ab   :  { %v8401_v26 = vpop.eup %8400  ;;  %v2518_v30 = vmul.f32 %v8399_v35, %v8397_v29  ;;  %v9839_v29 = vld [vmem:[#allocation9 + $0x20] ss:$16 sps:$4 sm:$0xff]   ;;  %v9841_v35 = vld [vmem:[#allocation9 + $0x28] ss:$16 sps:$4 sm:$0xff]  }
 0x3ac   :  { %v2517_v39 = vmul.f32 %v8401_v26, %v9636_v32  ;;  %v8403_v61 = vpop.eup %8402  ;;  %v9847_v26 = vld [vmem:[#allocation9 + $0x44] ss:$16 sps:$4 sm:$0xff]  }
 0x3ae   :  { %v9780_v13 = vadd.f32 %v2518_v30, %v2517_v39  ;;  %v2755_v16 = vpop.f32.mrb[52].mxu0  ;;  %v2796_v42 = vpop.f32.mrb[52].mxu1  ;;  %v9849_v30 = vld [vmem:[#allocation9 + $0x4c] ss:$16 sps:$4 sm:$0xff]   ;;  %v9853_v39 = vld [vmem:[#allocation9 + $0x48] ss:$16 sps:$4 sm:$0xff]  }
 0x3af   :  { %v2803_v10 = vadd.f32 %v2755_v16, %v2525_v27  ;;  %v2805_v52 = vadd.f32 %v2796_v42, %v2527_v23  ;;  %v2757_v53 = vpop.f32.mrb[53].mxu0  ;;  %v2798_v54 = vpop.f32.mrb[53].mxu1  ;;  %v9861_v27 = vld [vmem:[#allocation9 + $0x6c] ss:$16 sps:$4 sm:$0xff]   ;;  %v9865_v23 = vld [vmem:[#allocation9 + $0x68] ss:$16 sps:$4 sm:$0xff]  }
 0x3b0   :  { %v2804_v55 = vadd.f32 %v2757_v53, %v2526_v36  ;;  %v2806_v9 = vadd.f32 %v2798_v54, %v2528_v14  ;;  %v2759_v32 = vpop.f32.mrb[54].mxu0  ;;  %v2800_v56 = vpop.f32.mrb[54].mxu1  ;;  %8404 = vtanh.f32 %v9780_v13  ;;  %v9871_v16 = vld [vmem:[#allocation9 + $0x84] ss:$16 sps:$4 sm:$0xff]   ;;  %v9873_v42 = vld [vmem:[#allocation9 + $0x8c] ss:$16 sps:$4 sm:$0xff]  }
 0x3b1   :  { %v7425_v57 = vmul.f32 -1.442695, %v2803_v10  ;;  %v2760_v58 = vpop.f32.mrb[55].mxu0  ;;  %v2801_v59 = vpop.f32.mrb[55].mxu1  ;;  %v9875_v36 = vld [vmem:[#allocation9 + $0x80] ss:$16 sps:$4 sm:$0xff]  }
 0x3b2   :  { %v7426_v60 = vmul.f32 -1.442695, %v2804_v55  ;;  %v7427_v63 = vmul.f32 -1.442695, %v2806_v9  ;;  %v9877_v14 = vld [vmem:[#allocation9 + $0x88] ss:$16 sps:$4 sm:$0xff]  }
 0x3b3   :  { %8406 = vpow2.f32 %v7425_v57  ;;  %v9883_v10 = vld [vmem:[#allocation9 + $0xa4] ss:$16 sps:$4 sm:$0xff]   ;;  %v9887_v53 = vld [vmem:[#allocation9 + $0xa0] ss:$16 sps:$4 sm:$0xff]   ;;  %v9889_v54 = vld [vmem:[#allocation9 + $0xa8] ss:$16 sps:$4 sm:$0xff]  }
 0x3b4   :  { %8408 = vpow2.f32 %v7426_v60  ;;  %v9895_v55 = vld [vmem:[#allocation9 + $0xc4] ss:$16 sps:$4 sm:$0xff]   ;;  %v9897_v9 = vld [vmem:[#allocation9 + $0xcc] ss:$16 sps:$4 sm:$0xff]   ;;  %v9899_v32 = vld [vmem:[#allocation9 + $0xc0] ss:$16 sps:$4 sm:$0xff]  }
 0x3b5   :  { %8410 = vpow2.f32 %v7427_v63  ;;  %v9901_v56 = vld [vmem:[#allocation9 + $0xc8] ss:$16 sps:$4 sm:$0xff]   ;;  %v9907_v57 = vld [vmem:[#allocation9 + $0xe4] ss:$16 sps:$4 sm:$0xff]   ;;  %v9909_v58 = vld [vmem:[#allocation9 + $0xec] ss:$16 sps:$4 sm:$0xff]  }
 0x3b6   :  { %8412 = vtanh.f32 %v2805_v52  ;;  %v9885_v52 = vld [vmem:[#allocation9 + $0xac] ss:$16 sps:$4 sm:$0xff]   ;;  %v9911_v59 = vld [vmem:[#allocation9 + $0xe0] ss:$16 sps:$4 sm:$0xff]   ;;  %v9913_v60 = vld [vmem:[#allocation9 + $0xe8] ss:$16 sps:$4 sm:$0xff]  }
 0x3b7   :  { %v10743_v63 = vld [vmem:[#allocation21_spill] sm:$0xff] }
 0x3ba   :  { %v8405_v62 = vpop.eup %8404 }
 0x3bb   :  { %v2521_v1 = vmul.f32 %v8405_v62, %v8403_v61  ;;  %v9919_v61 = vld [vmem:[#allocation10 + $0x4] ss:$16 sps:$4 sm:$0xff]   ;;  %v9921_v62 = vld [vmem:[#allocation10 + $0xc] ss:$16 sps:$4 sm:$0xff]  }
 0x3bd   :  { %v8407_v2 = vpop.eup %8406  ;;  %v2831_v3 = vpack.c.bf16 %v2521_v1, %v2521_v1  ;;  %v2840_v1 = vunpack.c.l.bf16 %v10743_v63 }
 0x3be   :  { %v8409_v5 = vpop.eup %8408  ;;  %v2810_v7 = vadd.f32 1.0, %v8407_v2  ;;  %v10744_v2 = vld [vmem:[#allocation22_spill] sm:$0xff] }
 0x3bf   :  { %v2816_v40 = vadd.f32 1.0, %v8409_v5  ;;  %2833 = vst [vmem:[#allocation2 + $0x8] sm:$0xf] %v2831_v3  ;;  %3069 = vmatmul.mubr.bf16.vlgmr.msra.gmra.mrb[56].mxu0 %v2831_v3  ;;  %3110 = vmatmul.mubr.bf16.vlgmr.msra.gmra.mrb[56].mxu1 %v2831_v3  ;;  %v2842_v3 = vunpack.c.l.bf16 %v10744_v2 }
 0x3c0   :  { %8414 = vrcp.f32 %v2810_v7  ;;  %3346 = vmatpush1.bf16.msra.mxu0 %v9641_v17  ;;  %3387 = vmatpush1.bf16.msra.mxu1 %v9643_v18  ;;  %v8411_v17 = vpop.eup %8410 }
 0x3c1   :  { %8416 = vrcp.f32 %v2816_v40  ;;  %3347 = vmatprep.subr.bf16.mxu0 %v9645_v44  ;;  %3388 = vmatprep.subr.bf16.mxu1 %v9647_v6  ;;  %v8413_v18 = vpop.eup %8412  ;;  %v10734_v44 = vld [vmem:[#allocation19_spill] sm:$0xff]  ;;  %v10735_v6 = vld [vmem:[#allocation43_spill] sm:$0xff]  ;;  %v2841_v40 = vunpack.c.h.bf16 %v10743_v63 }
 0x3c2   :  { %3377 = vmatprep.mubr.bf16.mxu0 %v10698_v0  ;;  %3418 = vmatprep.mubr.bf16.mxu1 %v10698_v0 }
 0x3c4   :  { %3348 = vmatpush1.bf16.msra.mxu0 %v9651_v45  ;;  %3389 = vmatpush1.bf16.msra.mxu1 %v9653_v47  ;;  %v2823_v45 = vadd.f32 1.0, %v8411_v17  ;;  %v2843_v17 = vunpack.c.h.bf16 %v10744_v2 }
 0x3c5   :  { %3349 = vmatprep.subr.bf16.mxu0 %v9657_v48  ;;  %3390 = vmatprep.subr.bf16.mxu1 %v9659_v15  ;;  %v10736_v15 = vld [vmem:[#allocation44_spill] sm:$0xff] }
 0x3c6   :  { %8418 = vrcp.f32 %v2823_v45 }
 0x3c8   :  { %3350 = vmatpush1.bf16.msra.mxu0 %v9665_v49  ;;  %3391 = vmatpush1.bf16.msra.mxu1 %v9667_v50  ;;  %v10737_v49 = vld [vmem:[#allocation45_spill] sm:$0xff]  ;;  %v10738_v50 = vld [vmem:[#allocation46_spill] sm:$0xff] }
 0x3c9   :  { %3351 = vmatprep.subr.bf16.mxu0 %v10734_v44  ;;  %3392 = vmatprep.subr.bf16.mxu1 %v10735_v6 }
 0x3ca   :  { %v8415_v38 = vpop.eup %8414 }
 0x3cb   :  { %v8417_v4 = vpop.eup %8416  ;;  %v2827_v24 = vmul.f32 %v8415_v38, %v8413_v18 }
 0x3cc   :  { %v2826_v47 = vmul.f32 %v8417_v4, %v9700_v21  ;;  %3352 = vmatpush1.bf16.msra.mxu0 %v9677_v37  ;;  %3393 = vmatpush1.bf16.msra.mxu1 %v9679_v25  ;;  %v10739_v37 = vld [vmem:[#allocation47_spill] sm:$0xff]  ;;  %v10740_v25 = vld [vmem:[#allocation48_spill] sm:$0xff] }
 0x3cd   :  { %3353 = vmatprep.subr.bf16.mxu0 %v9683_v12  ;;  %3394 = vmatprep.subr.bf16.mxu1 %v9685_v33  ;;  %v10741_v12 = vld [vmem:[#allocation49_spill] sm:$0xff]  ;;  %v10742_v33 = vld [vmem:[#allocation50_spill] sm:$0xff] }
 0x3ce   :  { %v9804_v48 = vadd.f32 %v2827_v24, %v2826_v47 }
 0x3d0   :  { %3354 = vmatpush1.bf16.msra.mxu0 %v9690_v8  ;;  %3395 = vmatpush1.bf16.msra.mxu1 %v10736_v15  ;;  %8420 = vtanh.f32 %v9804_v48  ;;  %v8419_v8 = vpop.eup %8418 }
 0x3d1   :  { %3355 = vmatprep.subr.bf16.mxu0 %v10737_v49  ;;  %3396 = vmatprep.subr.bf16.mxu1 %v10738_v50 }
 0x3d4   :  { %3356 = vmatpush1.bf16.msra.mxu0 %v10739_v37  ;;  %3397 = vmatpush1.bf16.msra.mxu1 %v10740_v25 }
 0x3d5   :  { %3357 = vmatprep.subr.bf16.mxu0 %v10741_v12  ;;  %3398 = vmatprep.subr.bf16.mxu1 %v10742_v33 }
 0x3d8   :  { %3358 = vmatpush1.bf16.msra.mxu0 %v9717_v41  ;;  %3399 = vmatpush1.bf16.msra.mxu1 %v9719_v43  ;;  %v9823_v41 = vld [vmem:[#allocation9 + $0x4] ss:$16 sps:$4 sm:$0xff]   ;;  %v9825_v43 = vld [vmem:[#allocation9 + $0xc] ss:$16 sps:$4 sm:$0xff]  }
 0x3d9   :  { %3359 = vmatprep.subr.bf16.mxu0 %v9723_v31  ;;  %3400 = vmatprep.subr.bf16.mxu1 %v9725_v51  ;;  %v9827_v31 = vld [vmem:[#allocation9] ss:$16 sps:$4 sm:$0xff]   ;;  %v9829_v51 = vld [vmem:[#allocation9 + $0x8] ss:$16 sps:$4 sm:$0xff]  }
 0x3da   :  { %v8421_v21 = vpop.eup %8420 }
 0x3db   :  { %v2830_v28 = vmul.f32 %v8421_v21, %v8419_v8 }
 0x3dc   :  { %3360 = vmatpush1.bf16.msra.mxu0 %v9729_v11  ;;  %3401 = vmatpush1.bf16.msra.mxu1 %v9731_v46  ;;  %v9835_v11 = vld [vmem:[#allocation9 + $0x24] ss:$16 sps:$4 sm:$0xff]   ;;  %v9837_v46 = vld [vmem:[#allocation9 + $0x2c] ss:$16 sps:$4 sm:$0xff]  }
 0x3dd   :  { %v2834_v20 = vpack.c.bf16 %v2830_v28, %v2830_v28  ;;  %3660 = vmatprep.subr.bf16.mxu0 %v9823_v41  ;;  %3701 = vmatprep.subr.bf16.mxu1 %v9825_v43 }
 0x3df   :  { %2836 = vst [vmem:[#allocation3 + $0x14] sm:$0xf] %v2834_v20  ;;  %3378 = vmatmul.mubr.bf16.vlgmr.msra.gmra.mrb[60].mxu0 %v2834_v20  ;;  %3419 = vmatmul.mubr.bf16.vlgmr.msra.gmra.mrb[60].mxu1 %v2834_v20 }
 0x3e0   :  { %3692 = vmatprep.mubr.bf16.mxu0 %v10698_v0  ;;  %3733 = vmatprep.mubr.bf16.mxu1 %v10698_v0 }
 0x3e1   :  { %3661 = vmatpush1.bf16.msra.mxu0 %v9827_v31  ;;  %3702 = vmatpush1.bf16.msra.mxu1 %v9829_v51 }
 0x3e2   :  { %3662 = vmatprep.subr.bf16.mxu0 %v9835_v11  ;;  %3703 = vmatprep.subr.bf16.mxu1 %v9837_v46 }
 0x3e5   :  { %3663 = vmatpush1.bf16.msra.mxu0 %v9839_v29  ;;  %3704 = vmatpush1.bf16.msra.mxu1 %v9841_v35 }
 0x3e6   :  { %3664 = vmatprep.subr.bf16.mxu0 %v9847_v26  ;;  %3705 = vmatprep.subr.bf16.mxu1 %v9849_v30 }
 0x3e9   :  { %3665 = vmatpush1.bf16.msra.mxu0 %v9851_v22  ;;  %3706 = vmatpush1.bf16.msra.mxu1 %v9853_v39 }
 0x3ea   :  { %3666 = vmatprep.subr.bf16.mxu0 %v9859_v34  ;;  %3707 = vmatprep.subr.bf16.mxu1 %v9861_v27 }
 0x3ed   :  { %3667 = vmatpush1.bf16.msra.mxu0 %v9863_v19  ;;  %3708 = vmatpush1.bf16.msra.mxu1 %v9865_v23 }
 0x3ee   :  { %3668 = vmatprep.subr.bf16.mxu0 %v9871_v16  ;;  %3709 = vmatprep.subr.bf16.mxu1 %v9873_v42 }
 0x3f1   :  { %3669 = vmatpush1.bf16.msra.mxu0 %v9875_v36  ;;  %3710 = vmatpush1.bf16.msra.mxu1 %v9877_v14 }
 0x3f2   :  { %3670 = vmatprep.subr.bf16.mxu0 %v9883_v10  ;;  %3711 = vmatprep.subr.bf16.mxu1 %v9885_v52 }
 0x3f5   :  { %3671 = vmatpush1.bf16.msra.mxu0 %v9887_v53  ;;  %3712 = vmatpush1.bf16.msra.mxu1 %v9889_v54 }
 0x3f6   :  { %3672 = vmatprep.subr.bf16.mxu0 %v9895_v55  ;;  %3713 = vmatprep.subr.bf16.mxu1 %v9897_v9 }
 0x3f9   :  { %3673 = vmatpush1.bf16.msra.mxu0 %v9899_v32  ;;  %3714 = vmatpush1.bf16.msra.mxu1 %v9901_v56 }
 0x3fa   :  { %3674 = vmatprep.subr.bf16.mxu0 %v9907_v57  ;;  %3715 = vmatprep.subr.bf16.mxu1 %v9909_v58 }
 0x3fd   :  { %3675 = vmatpush1.bf16.msra.mxu0 %v9911_v59  ;;  %3716 = vmatpush1.bf16.msra.mxu1 %v9913_v60 }
 0x3fe   :  { %3969 = vmatprep.subr.bf16.mxu0 %v9919_v61  ;;  %4010 = vmatprep.subr.bf16.mxu1 %v9921_v62 }
 0x492   :  { %v3070_v5 = vpop.f32.mrb[56].mxu0  ;;  %v3111_v7 = vpop.f32.mrb[56].mxu1 }
 0x493   :  { %v3118_v18 = vadd.f32 %v3070_v5, %v2840_v1  ;;  %v3120_v44 = vadd.f32 %v3111_v7, %v2842_v3  ;;  %v3072_v6 = vpop.f32.mrb[57].mxu0  ;;  %v3113_v38 = vpop.f32.mrb[57].mxu1  ;;  %v10745_v7 = vld [vmem:[#allocation39_spill] sm:$0xff] }
 0x494   :  { %v3119_v4 = vadd.f32 %v3072_v6, %v2841_v40  ;;  %v3121_v24 = vadd.f32 %v3113_v38, %v2843_v17  ;;  %v3074_v45 = vpop.f32.mrb[58].mxu0  ;;  %v3115_v47 = vpop.f32.mrb[58].mxu1  ;;  %v3149_v40 = vunpack.c.l.bf16 %v10745_v7  ;;  %v10746_v17 = vld [vmem:[#allocation40_spill] sm:$0xff] }
 0x495   :  { %v7460_v15 = vmul.f32 -1.442695, %v3118_v18  ;;  %v3075_v49 = vpop.f32.mrb[59].mxu0  ;;  %v3116_v50 = vpop.f32.mrb[59].mxu1  ;;  %v3151_v18 = vunpack.c.l.bf16 %v10746_v17 }
 0x496   :  { %v7461_v37 = vmul.f32 -1.442695, %v3119_v4  ;;  %v7462_v25 = vmul.f32 -1.442695, %v3121_v24  ;;  %v3152_v24 = vunpack.c.h.bf16 %v10746_v17  ;;  %v9943_v17 = vld [vmem:[#allocation10 + $0x2c] ss:$16 sps:$4 sm:$0xff]  }
 0x497   :  { %8422 = vpow2.f32 %v7460_v15 }
 0x498   :  { %8424 = vpow2.f32 %v7461_v37 }
 0x499   :  { %8426 = vpow2.f32 %v7462_v25 }
 0x49a   :  { %8428 = vtanh.f32 %v3120_v44  ;;  %v3150_v44 = vunpack.c.h.bf16 %v10745_v7 }
 0x4a1   :  { %v8423_v12 = vpop.eup %8422 }
 0x4a2   :  { %v8425_v33 = vpop.eup %8424  ;;  %v3125_v8 = vadd.f32 1.0, %v8423_v12 }
 0x4a3   :  { %v3131_v21 = vadd.f32 1.0, %v8425_v33  ;;  %v8427_v28 = vpop.eup %8426 }
 0x4a4   :  { %8430 = vrcp.f32 %v3125_v8  ;;  %v8429_v20 = vpop.eup %8428  ;;  %v3138_v3 = vadd.f32 1.0, %v8427_v28 }
 0x4a5   :  { %8432 = vrcp.f32 %v3131_v21 }
 0x4a6   :  { %8434 = vrcp.f32 %v3138_v3  ;;  %v9939_v3 = vld [vmem:[#allocation10 + $0x8] ss:$16 sps:$4 sm:$0xff]  }
 0x4ae   :  { %v8431_v63 = vpop.eup %8430 }
 0x4af   :  { %v8433_v1 = vpop.eup %8432  ;;  %v3142_v2 = vmul.f32 %v8431_v63, %v8429_v20 }
 0x4b0   :  { %v3141_v5 = vmul.f32 %v8433_v1, %v9780_v13  ;;  %v8435_v28 = vpop.eup %8434 }
 0x4b2   :  { %v9932_v6 = vadd.f32 %v3142_v2, %v3141_v5  ;;  %v3379_v38 = vpop.f32.mrb[60].mxu0  ;;  %v3420_v4 = vpop.f32.mrb[60].mxu1  ;;  %v9937_v2 = vld [vmem:[#allocation10] ss:$16 sps:$4 sm:$0xff]  }
 0x4b3   :  { %v3427_v45 = vadd.f32 %v3379_v38, %v3149_v40  ;;  %v3429_v47 = vadd.f32 %v3420_v4, %v3151_v18  ;;  %v3381_v15 = vpop.f32.mrb[61].mxu0  ;;  %v3422_v49 = vpop.f32.mrb[61].mxu1  ;;  %v9941_v40 = vld [vmem:[#allocation10 + $0x24] ss:$16 sps:$4 sm:$0xff]  }
 0x4b4   :  { %v3428_v50 = vadd.f32 %v3381_v15, %v3150_v44  ;;  %v3430_v37 = vadd.f32 %v3422_v49, %v3152_v24  ;;  %v3383_v13 = vpop.f32.mrb[62].mxu0  ;;  %v3424_v25 = vpop.f32.mrb[62].mxu1  ;;  %8436 = vtanh.f32 %v9932_v6  ;;  %v9947_v44 = vld [vmem:[#allocation10 + $0x20] ss:$16 sps:$4 sm:$0xff]   ;;  %v9949_v24 = vld [vmem:[#allocation10 + $0x28] ss:$16 sps:$4 sm:$0xff]  }
 0x4b5   :  { %v7495_v12 = vmul.f32 -1.442695, %v3427_v45  ;;  %v3384_v33 = vpop.f32.mrb[63].mxu0  ;;  %v3425_v8 = vpop.f32.mrb[63].mxu1  ;;  %v9953_v45 = vld [vmem:[#allocation10 + $0x44] ss:$16 sps:$4 sm:$0xff]  }
 0x4b6   :  { %v7496_v21 = vmul.f32 -1.442695, %v3428_v50  ;;  %v7497_v63 = vmul.f32 -1.442695, %v3430_v37  ;;  %v9961_v15 = vld [vmem:[#allocation10 + $0x40] ss:$16 sps:$4 sm:$0xff]  }
 0x4b7   :  { %8438 = vpow2.f32 %v7495_v12  ;;  %v9963_v49 = vld [vmem:[#allocation10 + $0x48] ss:$16 sps:$4 sm:$0xff]   ;;  %v9967_v50 = vld [vmem:[#allocation10 + $0x64] ss:$16 sps:$4 sm:$0xff]   ;;  %v9969_v37 = vld [vmem:[#allocation10 + $0x6c] ss:$16 sps:$4 sm:$0xff]  }
 0x4b8   :  { %8440 = vpow2.f32 %v7496_v21  ;;  %v9973_v25 = vld [vmem:[#allocation10 + $0x60] ss:$16 sps:$4 sm:$0xff]   ;;  %v9975_v12 = vld [vmem:[#allocation10 + $0x68] ss:$16 sps:$4 sm:$0xff]   ;;  %v9979_v8 = vld [vmem:[#allocation10 + $0x84] ss:$16 sps:$4 sm:$0xff]  }
 0x4b9   :  { %8442 = vpow2.f32 %v7497_v63  ;;  %v9981_v21 = vld [vmem:[#allocation10 + $0x8c] ss:$16 sps:$4 sm:$0xff]  }
 0x4ba   :  { %8444 = vtanh.f32 %v3429_v47  ;;  %v9955_v47 = vld [vmem:[#allocation10 + $0x4c] ss:$16 sps:$4 sm:$0xff]  }
 0x4be   :  { %v8437_v20 = vpop.eup %8436 }
 0x4bf   :  { %v3145_v1 = vmul.f32 %v8437_v20, %v8435_v28 }
 0x4c1   :  { %v8439_v5 = vpop.eup %8438  ;;  %v3455_v7 = vpack.c.bf16 %v3145_v1, %v3145_v1 }
 0x4c2   :  { %v8441_v18 = vpop.eup %8440  ;;  %v3434_v38 = vadd.f32 1.0, %v8439_v5 }
 0x4c3   :  { %v3440_v4 = vadd.f32 1.0, %v8441_v18  ;;  %3457 = vst [vmem:[#allocation2 + $0xc] sm:$0xf] %v3455_v7  ;;  %3693 = vmatmul.mubr.bf16.vlgmr.msra.gmra.mrb[64].mxu0 %v3455_v7  ;;  %3734 = vmatmul.mubr.bf16.vlgmr.msra.gmra.mrb[64].mxu1 %v3455_v7  ;;  %v8443_v13 = vpop.eup %8442  ;;  %v9986_v7 = vld [vmem:[#allocation10 + $0x80] ss:$16 sps:$4 sm:$0xff]  }
 0x4c4   :  { %8446 = vrcp.f32 %v3434_v38  ;;  %3970 = vmatpush1.bf16.msra.mxu0 %v9937_v2  ;;  %4011 = vmatpush1.bf16.msra.mxu1 %v9939_v3  ;;  %v8445_v33 = vpop.eup %8444  ;;  %v3447_v1 = vadd.f32 1.0, %v8443_v13  ;;  %v9988_v18 = vld [vmem:[#allocation10 + $0x88] ss:$16 sps:$4 sm:$0xff]   ;;  %v9992_v38 = vld [vmem:[#allocation10 + $0xa4] ss:$16 sps:$4 sm:$0xff]  }
 0x4c5   :  { %8448 = vrcp.f32 %v3440_v4  ;;  %3971 = vmatprep.subr.bf16.mxu0 %v9941_v40  ;;  %4012 = vmatprep.subr.bf16.mxu1 %v9943_v17  ;;  %10747 = vst [vmem:[#allocation41_spill] sm:$0xff] %v9988_v18  ;;  %10748 = vst [vmem:[#allocation42_spill] sm:$0xff] %v9992_v38  ;;  %v9994_v4 = vld [vmem:[#allocation10 + $0xac] ss:$16 sps:$4 sm:$0xff]   ;;  %v10002_v13 = vld [vmem:[#allocation10 + $0xa8] ss:$16 sps:$4 sm:$0xff]  }
 0x4c6   :  { %4001 = vmatprep.mubr.bf16.mxu0 %v10698_v0  ;;  %4042 = vmatprep.mubr.bf16.mxu1 %v10698_v0  ;;  %10749 = vst [vmem:[#allocation19_spill] sm:$0xff] %v9994_v4  ;;  %8450 = vrcp.f32 %v3447_v1  ;;  %10751 = vst [vmem:[#allocation44_spill] sm:$0xff] %v10002_v13  ;;  %v10015_v1 = vld [vmem:[#allocation10 + $0xc8] ss:$16 sps:$4 sm:$0xff]  }
 0x4c8   :  { %3972 = vmatpush1.bf16.msra.mxu0 %v9947_v44  ;;  %4013 = vmatpush1.bf16.msra.mxu1 %v9949_v24 }
 0x4c9   :  { %3973 = vmatprep.subr.bf16.mxu0 %v9953_v45  ;;  %4014 = vmatprep.subr.bf16.mxu1 %v9955_v47 }
 0x4cc   :  { %3974 = vmatpush1.bf16.msra.mxu0 %v9961_v15  ;;  %4015 = vmatpush1.bf16.msra.mxu1 %v9963_v49 }
 0x4cd   :  { %3975 = vmatprep.subr.bf16.mxu0 %v9967_v50  ;;  %4016 = vmatprep.subr.bf16.mxu1 %v9969_v37 }
 0x4ce   :  { %v8447_v28 = vpop.eup %8446 }
 0x4cf   :  { %v8449_v20 = vpop.eup %8448  ;;  %v3451_v63 = vmul.f32 %v8447_v28, %v8445_v33  ;;  %v10007_v28 = vld [vmem:[#allocation10 + $0xc4] ss:$16 sps:$4 sm:$0xff]  }
 0x4d0   :  { %v3450_v5 = vmul.f32 %v8449_v20, %v9804_v48  ;;  %3976 = vmatpush1.bf16.msra.mxu0 %v9973_v25  ;;  %4017 = vmatpush1.bf16.msra.mxu1 %v9975_v12  ;;  %v10000_v48 = vld [vmem:[#allocation10 + $0xa0] ss:$16 sps:$4 sm:$0xff]   ;;  %10752 = vst [vmem:[#allocation45_spill] sm:$0xff] %v10007_v28  ;;  %v10009_v20 = vld [vmem:[#allocation10 + $0xcc] ss:$16 sps:$4 sm:$0xff]  }
 0x4d1   :  { %3977 = vmatprep.subr.bf16.mxu0 %v9979_v8  ;;  %4018 = vmatprep.subr.bf16.mxu1 %v9981_v21  ;;  %10750 = vst [vmem:[#allocation43_spill] sm:$0xff] %v10000_v48  ;;  %10753 = vst [vmem:[#allocation46_spill] sm:$0xff] %v10009_v20 }
 0x4d2   :  { %v9996_v33 = vadd.f32 %v3451_v63, %v3450_v5  ;;  %v10013_v63 = vld [vmem:[#allocation10 + $0xc0] ss:$16 sps:$4 sm:$0xff]   ;;  %v10019_v5 = vld [vmem:[#allocation10 + $0xe4] ss:$16 sps:$4 sm:$0xff]  }
 0x4d4   :  { %3978 = vmatpush1.bf16.msra.mxu0 %v9986_v7  ;;  %4019 = vmatpush1.bf16.msra.mxu1 %v9988_v18  ;;  %8452 = vtanh.f32 %v9996_v33 }
 0x4d5   :  { %3979 = vmatprep.subr.bf16.mxu0 %v9992_v38  ;;  %4020 = vmatprep.subr.bf16.mxu1 %v9994_v4  ;;  %v10021_v38 = vld [vmem:[#allocation10 + $0xec] ss:$16 sps:$4 sm:$0xff]   ;;  %v10025_v4 = vld [vmem:[#allocation10 + $0xe0] ss:$16 sps:$4 sm:$0xff]  }
 0x4d8   :  { %3980 = vmatpush1.bf16.msra.mxu0 %v10000_v48  ;;  %4021 = vmatpush1.bf16.msra.mxu1 %v10002_v13  ;;  %v10027_v48 = vld [vmem:[#allocation10 + $0xe8] ss:$16 sps:$4 sm:$0xff]   ;;  %v8451_v13 = vpop.eup %8450 }
 0x4d9   :  { %3981 = vmatprep.subr.bf16.mxu0 %v10007_v28  ;;  %4022 = vmatprep.subr.bf16.mxu1 %v10009_v20 }
 0x4dc   :  { %3982 = vmatpush1.bf16.msra.mxu0 %v10013_v63  ;;  %4023 = vmatpush1.bf16.msra.mxu1 %v10015_v1 }
 0x4dd   :  { %3983 = vmatprep.subr.bf16.mxu0 %v10019_v5  ;;  %4024 = vmatprep.subr.bf16.mxu1 %v10021_v38 }
 0x4de   :  { %v8453_v28 = vpop.eup %8452 }
 0x4df   :  { %v3454_v18 = vmul.f32 %v8453_v28, %v8451_v13 }
 0x4e0   :  { %3984 = vmatpush1.bf16.msra.mxu0 %v10025_v4  ;;  %4025 = vmatpush1.bf16.msra.mxu1 %v10027_v48 }
 0x4e1   :  { %v3458_v20 = vpack.c.bf16 %v3454_v18, %v3454_v18  ;;  %4284 = vmatprep.subr.bf16.mxu0 %v9823_v41  ;;  %4325 = vmatprep.subr.bf16.mxu1 %v9825_v43  ;;  %v10754_v41 = vld [vmem:[#allocation23_spill] sm:$0xff]  ;;  %v10757_v18 = vld [vmem:[#allocation38_spill] sm:$0xff] }
 0x4e2   :  { %v3464_v43 = vunpack.c.l.bf16 %v10754_v41  ;;  %v3775_v13 = vunpack.c.l.bf16 %v10757_v18 }
 0x4e3   :  { %3460 = vst [vmem:[#allocation3 + $0x10] sm:$0xf] %v3458_v20  ;;  %4002 = vmatmul.mubr.bf16.vlgmr.msra.gmra.mrb[68].mxu0 %v3458_v20  ;;  %4043 = vmatmul.mubr.bf16.vlgmr.msra.gmra.mrb[68].mxu1 %v3458_v20 }
 0x4e4   :  { %4285 = vmatpush1.bf16.msra.mxu0 %v9827_v31  ;;  %4326 = vmatpush1.bf16.msra.mxu1 %v9829_v51  ;;  %v10755_v31 = vld [vmem:[#allocation24_spill] sm:$0xff] }
 0x4e5   :  { %4286 = vmatprep.subr.bf16.mxu0 %v9835_v11  ;;  %4327 = vmatprep.subr.bf16.mxu1 %v9837_v46  ;;  %v3466_v51 = vunpack.c.l.bf16 %v10755_v31 }
 0x4e6   :  { %4316 = vmatprep.mubr.bf16.mxu0 %v10698_v0  ;;  %4357 = vmatprep.mubr.bf16.mxu1 %v10698_v0 }
 0x4e8   :  { %4287 = vmatpush1.bf16.msra.mxu0 %v9839_v29  ;;  %4328 = vmatpush1.bf16.msra.mxu1 %v9841_v35  ;;  %v3465_v29 = vunpack.c.h.bf16 %v10754_v41  ;;  %v3467_v35 = vunpack.c.h.bf16 %v10755_v31  ;;  %v3776_v31 = vunpack.c.h.bf16 %v10757_v18  ;;  %v10167_v18 = vld [vmem:[#allocation9 + $0x84] ss:$16 sps:$4 sm:$0xff]  }
 0x4e9   :  { %4288 = vmatprep.subr.bf16.mxu0 %v9847_v26  ;;  %4329 = vmatprep.subr.bf16.mxu1 %v9849_v30 }
 0x4ec   :  { %4289 = vmatpush1.bf16.msra.mxu0 %v9851_v22  ;;  %4330 = vmatpush1.bf16.msra.mxu1 %v9853_v39 }
 0x4ed   :  { %4290 = vmatprep.subr.bf16.mxu0 %v9859_v34  ;;  %4331 = vmatprep.subr.bf16.mxu1 %v9861_v27 }
 0x4f0   :  { %4291 = vmatpush1.bf16.msra.mxu0 %v9863_v19  ;;  %4332 = vmatpush1.bf16.msra.mxu1 %v9865_v23 }
 0x4f1   :  { %4292 = vmatprep.subr.bf16.mxu0 %v9871_v16  ;;  %4333 = vmatprep.subr.bf16.mxu1 %v9873_v42 }
 0x4f4   :  { %4293 = vmatpush1.bf16.msra.mxu0 %v9875_v36  ;;  %4334 = vmatpush1.bf16.msra.mxu1 %v9877_v14 }
 0x4f5   :  { %4294 = vmatprep.subr.bf16.mxu0 %v9883_v10  ;;  %4335 = vmatprep.subr.bf16.mxu1 %v9885_v52 }
 0x4f8   :  { %4295 = vmatpush1.bf16.msra.mxu0 %v9887_v53  ;;  %4336 = vmatpush1.bf16.msra.mxu1 %v9889_v54 }
 0x4f9   :  { %4296 = vmatprep.subr.bf16.mxu0 %v9895_v55  ;;  %4337 = vmatprep.subr.bf16.mxu1 %v9897_v9 }
 0x4fc   :  { %4297 = vmatpush1.bf16.msra.mxu0 %v9899_v32  ;;  %4338 = vmatpush1.bf16.msra.mxu1 %v9901_v56 }
 0x4fd   :  { %4298 = vmatprep.subr.bf16.mxu0 %v9907_v57  ;;  %4339 = vmatprep.subr.bf16.mxu1 %v9909_v58 }
 0x500   :  { %4299 = vmatpush1.bf16.msra.mxu0 %v9911_v59  ;;  %4340 = vmatpush1.bf16.msra.mxu1 %v9913_v60 }
 0x501   :  { %4593 = vmatprep.subr.bf16.mxu0 %v9919_v61  ;;  %4634 = vmatprep.subr.bf16.mxu1 %v9921_v62  ;;  %v10756_v61 = vld [vmem:[#allocation37_spill] sm:$0xff] }
 0x502   :  { %v3773_v62 = vunpack.c.l.bf16 %v10756_v61 }
 0x596   :  { %v3694_v11 = vpop.f32.mrb[64].mxu0  ;;  %v3735_v46 = vpop.f32.mrb[64].mxu1 }
 0x597   :  { %v3742_v26 = vadd.f32 %v3694_v11, %v3464_v43  ;;  %v3744_v30 = vadd.f32 %v3735_v46, %v3466_v51  ;;  %v3696_v22 = vpop.f32.mrb[65].mxu0  ;;  %v3737_v39 = vpop.f32.mrb[65].mxu1  ;;  %v3774_v43 = vunpack.c.h.bf16 %v10756_v61  ;;  %v10159_v61 = vld [vmem:[#allocation9 + $0x60] ss:$16 sps:$4 sm:$0xff]  }
 0x598   :  { %v3743_v34 = vadd.f32 %v3696_v22, %v3465_v29  ;;  %v3745_v27 = vadd.f32 %v3737_v39, %v3467_v35  ;;  %v3698_v19 = vpop.f32.mrb[66].mxu0  ;;  %v3739_v23 = vpop.f32.mrb[66].mxu1 }
 0x599   :  { %v7530_v16 = vmul.f32 -1.442695, %v3742_v26  ;;  %v3699_v42 = vpop.f32.mrb[67].mxu0  ;;  %v3740_v36 = vpop.f32.mrb[67].mxu1 }
 0x59a   :  { %v7531_v14 = vmul.f32 -1.442695, %v3743_v34  ;;  %v7532_v10 = vmul.f32 -1.442695, %v3745_v27 }
 0x59b   :  { %8454 = vpow2.f32 %v7530_v16 }
 0x59c   :  { %8456 = vpow2.f32 %v7531_v14 }
 0x59d   :  { %8458 = vpow2.f32 %v7532_v10 }
 0x59e   :  { %8460 = vtanh.f32 %v3744_v30 }
 0x5a5   :  { %v8455_v52 = vpop.eup %8454 }
 0x5a6   :  { %v8457_v53 = vpop.eup %8456  ;;  %v3749_v54 = vadd.f32 1.0, %v8455_v52 }
 0x5a7   :  { %v3755_v55 = vadd.f32 1.0, %v8457_v53  ;;  %v8459_v9 = vpop.eup %8458 }
 0x5a8   :  { %8462 = vrcp.f32 %v3749_v54  ;;  %v8461_v32 = vpop.eup %8460  ;;  %v3762_v59 = vadd.f32 1.0, %v8459_v9  ;;  %v10137_v9 = vld [vmem:[#allocation9 + $0x28] ss:$16 sps:$4 sm:$0xff]  }
 0x5a9   :  { %8464 = vrcp.f32 %v3755_v55  ;;  %v10135_v55 = vld [vmem:[#allocation9 + $0x20] ss:$16 sps:$4 sm:$0xff]  }
 0x5aa   :  { %8466 = vrcp.f32 %v3762_v59  ;;  %v10155_v59 = vld [vmem:[#allocation9 + $0x64] ss:$16 sps:$4 sm:$0xff]  }
 0x5b2   :  { %v8463_v56 = vpop.eup %8462 }
 0x5b3   :  { %v8465_v57 = vpop.eup %8464  ;;  %v3766_v58 = vmul.f32 %v8463_v56, %v8461_v32  ;;  %v10143_v32 = vld [vmem:[#allocation9 + $0x44] ss:$16 sps:$4 sm:$0xff]   ;;  %v10145_v56 = vld [vmem:[#allocation9 + $0x4c] ss:$16 sps:$4 sm:$0xff]  }
 0x5b4   :  { %v3765_v60 = vmul.f32 %v8465_v57, %v9932_v6  ;;  %v8467_v19 = vpop.eup %8466  ;;  %v10147_v57 = vld [vmem:[#allocation9 + $0x40] ss:$16 sps:$4 sm:$0xff]  }
 0x5b6   :  { %v10076_v28 = vadd.f32 %v3766_v58, %v3765_v60  ;;  %v4003_v20 = vpop.f32.mrb[68].mxu0  ;;  %v4044_v41 = vpop.f32.mrb[68].mxu1  ;;  %v10149_v58 = vld [vmem:[#allocation9 + $0x48] ss:$16 sps:$4 sm:$0xff]   ;;  %v10157_v60 = vld [vmem:[#allocation9 + $0x6c] ss:$16 sps:$4 sm:$0xff]  }
 0x5b7   :  { %v4051_v51 = vadd.f32 %v4003_v20, %v3773_v62  ;;  %v4053_v11 = vadd.f32 %v4044_v41, %v3775_v13  ;;  %v4005_v46 = vpop.f32.mrb[69].mxu0  ;;  %v4046_v29 = vpop.f32.mrb[69].mxu1  ;;  %v10161_v62 = vld [vmem:[#allocation9 + $0x68] ss:$16 sps:$4 sm:$0xff]   ;;  %v10169_v13 = vld [vmem:[#allocation9 + $0x8c] ss:$16 sps:$4 sm:$0xff]  }
 0x5b8   :  { %v4052_v35 = vadd.f32 %v4005_v46, %v3774_v43  ;;  %v4054_v26 = vadd.f32 %v4046_v29, %v3776_v31  ;;  %v4007_v6 = vpop.f32.mrb[70].mxu0  ;;  %v4048_v30 = vpop.f32.mrb[70].mxu1  ;;  %8468 = vtanh.f32 %v10076_v28  ;;  %v10171_v20 = vld [vmem:[#allocation9 + $0x80] ss:$16 sps:$4 sm:$0xff]   ;;  %v10173_v41 = vld [vmem:[#allocation9 + $0x88] ss:$16 sps:$4 sm:$0xff]  }
 0x5b9   :  { %v7565_v22 = vmul.f32 -1.442695, %v4051_v51  ;;  %v4008_v39 = vpop.f32.mrb[71].mxu0  ;;  %v4049_v34 = vpop.f32.mrb[71].mxu1  ;;  %v10179_v43 = vld [vmem:[#allocation9 + $0xa4] ss:$16 sps:$4 sm:$0xff]  }
 0x5ba   :  { %v7566_v27 = vmul.f32 -1.442695, %v4052_v35  ;;  %v7567_v16 = vmul.f32 -1.442695, %v4054_v26  ;;  %v10181_v31 = vld [vmem:[#allocation9 + $0xac] ss:$16 sps:$4 sm:$0xff]  }
 0x5bb   :  { %8470 = vpow2.f32 %v7565_v22  ;;  %v10183_v51 = vld [vmem:[#allocation9 + $0xa0] ss:$16 sps:$4 sm:$0xff]   ;;  %v10191_v46 = vld [vmem:[#allocation9 + $0xc4] ss:$16 sps:$4 sm:$0xff]   ;;  %v10193_v29 = vld [vmem:[#allocation9 + $0xcc] ss:$16 sps:$4 sm:$0xff]  }
 0x5bc   :  { %8472 = vpow2.f32 %v7566_v27  ;;  %v10195_v35 = vld [vmem:[#allocation9 + $0xc0] ss:$16 sps:$4 sm:$0xff]   ;;  %v10197_v26 = vld [vmem:[#allocation9 + $0xc8] ss:$16 sps:$4 sm:$0xff]   ;;  %v10203_v6 = vld [vmem:[#allocation9 + $0xe4] ss:$16 sps:$4 sm:$0xff]  }
 0x5bd   :  { %8474 = vpow2.f32 %v7567_v16  ;;  %v10205_v30 = vld [vmem:[#allocation9 + $0xec] ss:$16 sps:$4 sm:$0xff]   ;;  %v10207_v22 = vld [vmem:[#allocation9 + $0xe0] ss:$16 sps:$4 sm:$0xff]   ;;  %v10209_v39 = vld [vmem:[#allocation9 + $0xe8] ss:$16 sps:$4 sm:$0xff]  }
 0x5be   :  { %8476 = vtanh.f32 %v4053_v11  ;;  %v10185_v11 = vld [vmem:[#allocation9 + $0xa8] ss:$16 sps:$4 sm:$0xff]   ;;  %v10215_v34 = vld [vmem:[#allocation10 + $0x4] ss:$16 sps:$4 sm:$0xff]   ;;  %v10217_v27 = vld [vmem:[#allocation10 + $0xc] ss:$16 sps:$4 sm:$0xff]  }
 0x5bf   :  { %v10766_v16 = vld [vmem:[#allocation26_spill] sm:$0xff] }
 0x5c2   :  { %v8469_v23 = vpop.eup %8468 }
 0x5c3   :  { %v3769_v42 = vmul.f32 %v8469_v23, %v8467_v19  ;;  %v10765_v19 = vld [vmem:[#allocation25_spill] sm:$0xff] }
 0x5c4   :  { %v4088_v23 = vunpack.c.l.bf16 %v10765_v19 }
 0x5c5   :  { %v8471_v36 = vpop.eup %8470  ;;  %v4079_v14 = vpack.c.bf16 %v3769_v42, %v3769_v42  ;;  %v4090_v42 = vunpack.c.l.bf16 %v10766_v16 }
 0x5c6   :  { %v8473_v10 = vpop.eup %8472  ;;  %v4058_v52 = vadd.f32 1.0, %v8471_v36 }
 0x5c7   :  { %v4064_v53 = vadd.f32 1.0, %v8473_v10  ;;  %4081 = vst [vmem:[#allocation2 + $0x10] sm:$0xf] %v4079_v14  ;;  %4317 = vmatmul.mubr.bf16.vlgmr.msra.gmra.mrb[72].mxu0 %v4079_v14  ;;  %4358 = vmatmul.mubr.bf16.vlgmr.msra.gmra.mrb[72].mxu1 %v4079_v14  ;;  %v4089_v10 = vunpack.c.h.bf16 %v10765_v19 }
 0x5c8   :  { %8478 = vrcp.f32 %v4058_v52  ;;  %4594 = vmatpush1.bf16.msra.mxu0 %v9937_v2  ;;  %4635 = vmatpush1.bf16.msra.mxu1 %v9939_v3  ;;  %v8475_v2 = vpop.eup %8474  ;;  %v4091_v52 = vunpack.c.h.bf16 %v10766_v16 }
 0x5c9   :  { %8480 = vrcp.f32 %v4064_v53  ;;  %4595 = vmatprep.subr.bf16.mxu0 %v9941_v40  ;;  %4636 = vmatprep.subr.bf16.mxu1 %v9943_v17  ;;  %v8477_v3 = vpop.eup %8476 }
 0x5ca   :  { %4625 = vmatprep.mubr.bf16.mxu0 %v10698_v0  ;;  %4666 = vmatprep.mubr.bf16.mxu1 %v10698_v0 }
 0x5cc   :  { %4596 = vmatpush1.bf16.msra.mxu0 %v9947_v44  ;;  %4637 = vmatpush1.bf16.msra.mxu1 %v9949_v24  ;;  %v4071_v44 = vadd.f32 1.0, %v8475_v2 }
 0x5cd   :  { %4597 = vmatprep.subr.bf16.mxu0 %v9953_v45  ;;  %4638 = vmatprep.subr.bf16.mxu1 %v9955_v47  ;;  %v10758_v47 = vld [vmem:[#allocation41_spill] sm:$0xff] }
 0x5ce   :  { %8482 = vrcp.f32 %v4071_v44 }
 0x5d0   :  { %4598 = vmatpush1.bf16.msra.mxu0 %v9961_v15  ;;  %4639 = vmatpush1.bf16.msra.mxu1 %v9963_v49  ;;  %v10759_v15 = vld [vmem:[#allocation42_spill] sm:$0xff]  ;;  %v10760_v49 = vld [vmem:[#allocation19_spill] sm:$0xff] }
 0x5d1   :  { %4599 = vmatprep.subr.bf16.mxu0 %v9967_v50  ;;  %4640 = vmatprep.subr.bf16.mxu1 %v9969_v37  ;;  %v10761_v50 = vld [vmem:[#allocation43_spill] sm:$0xff]  ;;  %v10762_v37 = vld [vmem:[#allocation44_spill] sm:$0xff] }
 0x5d2   :  { %v8479_v40 = vpop.eup %8478 }
 0x5d3   :  { %v8481_v17 = vpop.eup %8480  ;;  %v4075_v54 = vmul.f32 %v8479_v40, %v8477_v3 }
 0x5d4   :  { %v4074_v24 = vmul.f32 %v8481_v17, %v9996_v33  ;;  %4600 = vmatpush1.bf16.msra.mxu0 %v9973_v25  ;;  %4641 = vmatpush1.bf16.msra.mxu1 %v9975_v12  ;;  %v10763_v25 = vld [vmem:[#allocation45_spill] sm:$0xff]  ;;  %v10764_v12 = vld [vmem:[#allocation46_spill] sm:$0xff] }
 0x5d5   :  { %4601 = vmatprep.subr.bf16.mxu0 %v9979_v8  ;;  %4642 = vmatprep.subr.bf16.mxu1 %v9981_v21 }
 0x5d6   :  { %v10100_v45 = vadd.f32 %v4075_v54, %v4074_v24 }
 0x5d8   :  { %4602 = vmatpush1.bf16.msra.mxu0 %v9986_v7  ;;  %4643 = vmatpush1.bf16.msra.mxu1 %v10758_v47  ;;  %8484 = vtanh.f32 %v10100_v45  ;;  %v8483_v8 = vpop.eup %8482 }
 0x5d9   :  { %4603 = vmatprep.subr.bf16.mxu0 %v10759_v15  ;;  %4644 = vmatprep.subr.bf16.mxu1 %v10760_v49 }
 0x5dc   :  { %4604 = vmatpush1.bf16.msra.mxu0 %v10761_v50  ;;  %4645 = vmatpush1.bf16.msra.mxu1 %v10762_v37 }
 0x5dd   :  { %4605 = vmatprep.subr.bf16.mxu0 %v10763_v25  ;;  %4646 = vmatprep.subr.bf16.mxu1 %v10764_v12 }
 0x5e0   :  { %4606 = vmatpush1.bf16.msra.mxu0 %v10013_v63  ;;  %4647 = vmatpush1.bf16.msra.mxu1 %v10015_v1  ;;  %v10119_v63 = vld [vmem:[#allocation9 + $0x4] ss:$16 sps:$4 sm:$0xff]   ;;  %v10121_v1 = vld [vmem:[#allocation9 + $0xc] ss:$16 sps:$4 sm:$0xff]  }
 0x5e1   :  { %4607 = vmatprep.subr.bf16.mxu0 %v10019_v5  ;;  %4648 = vmatprep.subr.bf16.mxu1 %v10021_v38  ;;  %v10123_v5 = vld [vmem:[#allocation9] ss:$16 sps:$4 sm:$0xff]   ;;  %v10125_v38 = vld [vmem:[#allocation9 + $0x8] ss:$16 sps:$4 sm:$0xff]  }
 0x5e2   :  { %v8485_v21 = vpop.eup %8484 }
 0x5e3   :  { %v4078_v7 = vmul.f32 %v8485_v21, %v8483_v8 }
 0x5e4   :  { %4608 = vmatpush1.bf16.msra.mxu0 %v10025_v4  ;;  %4649 = vmatpush1.bf16.msra.mxu1 %v10027_v48  ;;  %v10131_v4 = vld [vmem:[#allocation9 + $0x24] ss:$16 sps:$4 sm:$0xff]   ;;  %v10133_v48 = vld [vmem:[#allocation9 + $0x2c] ss:$16 sps:$4 sm:$0xff]  }
 0x5e5   :  { %v4082_v33 = vpack.c.bf16 %v4078_v7, %v4078_v7  ;;  %4908 = vmatprep.subr.bf16.mxu0 %v10119_v63  ;;  %4949 = vmatprep.subr.bf16.mxu1 %v10121_v1 }
 0x5e7   :  { %4084 = vst [vmem:[#allocation3 + $0xc] sm:$0xf] %v4082_v33  ;;  %4626 = vmatmul.mubr.bf16.vlgmr.msra.gmra.mrb[76].mxu0 %v4082_v33  ;;  %4667 = vmatmul.mubr.bf16.vlgmr.msra.gmra.mrb[76].mxu1 %v4082_v33 }
 0x5e8   :  { %4940 = vmatprep.mubr.bf16.mxu0 %v10698_v0  ;;  %4981 = vmatprep.mubr.bf16.mxu1 %v10698_v0 }
 0x5e9   :  { %4909 = vmatpush1.bf16.msra.mxu0 %v10123_v5  ;;  %4950 = vmatpush1.bf16.msra.mxu1 %v10125_v38 }
 0x5ea   :  { %4910 = vmatprep.subr.bf16.mxu0 %v10131_v4  ;;  %4951 = vmatprep.subr.bf16.mxu1 %v10133_v48 }
 0x5ed   :  { %4911 = vmatpush1.bf16.msra.mxu0 %v10135_v55  ;;  %4952 = vmatpush1.bf16.msra.mxu1 %v10137_v9 }
 0x5ee   :  { %4912 = vmatprep.subr.bf16.mxu0 %v10143_v32  ;;  %4953 = vmatprep.subr.bf16.mxu1 %v10145_v56 }
 0x5f1   :  { %4913 = vmatpush1.bf16.msra.mxu0 %v10147_v57  ;;  %4954 = vmatpush1.bf16.msra.mxu1 %v10149_v58 }
 0x5f2   :  { %4914 = vmatprep.subr.bf16.mxu0 %v10155_v59  ;;  %4955 = vmatprep.subr.bf16.mxu1 %v10157_v60 }
 0x5f5   :  { %4915 = vmatpush1.bf16.msra.mxu0 %v10159_v61  ;;  %4956 = vmatpush1.bf16.msra.mxu1 %v10161_v62 }
 0x5f6   :  { %4916 = vmatprep.subr.bf16.mxu0 %v10167_v18  ;;  %4957 = vmatprep.subr.bf16.mxu1 %v10169_v13 }
 0x5f9   :  { %4917 = vmatpush1.bf16.msra.mxu0 %v10171_v20  ;;  %4958 = vmatpush1.bf16.msra.mxu1 %v10173_v41 }
 0x5fa   :  { %4918 = vmatprep.subr.bf16.mxu0 %v10179_v43  ;;  %4959 = vmatprep.subr.bf16.mxu1 %v10181_v31 }
 0x5fd   :  { %4919 = vmatpush1.bf16.msra.mxu0 %v10183_v51  ;;  %4960 = vmatpush1.bf16.msra.mxu1 %v10185_v11 }
 0x5fe   :  { %4920 = vmatprep.subr.bf16.mxu0 %v10191_v46  ;;  %4961 = vmatprep.subr.bf16.mxu1 %v10193_v29 }
 0x601   :  { %4921 = vmatpush1.bf16.msra.mxu0 %v10195_v35  ;;  %4962 = vmatpush1.bf16.msra.mxu1 %v10197_v26 }
 0x602   :  { %4922 = vmatprep.subr.bf16.mxu0 %v10203_v6  ;;  %4963 = vmatprep.subr.bf16.mxu1 %v10205_v30 }
 0x605   :  { %4923 = vmatpush1.bf16.msra.mxu0 %v10207_v22  ;;  %4964 = vmatpush1.bf16.msra.mxu1 %v10209_v39 }
 0x606   :  { %5217 = vmatprep.subr.bf16.mxu0 %v10215_v34  ;;  %5258 = vmatprep.subr.bf16.mxu1 %v10217_v27 }
 0x69a   :  { %v4318_v36 = vpop.f32.mrb[72].mxu0  ;;  %v4359_v14 = vpop.f32.mrb[72].mxu1 }
 0x69b   :  { %v4366_v53 = vadd.f32 %v4318_v36, %v4088_v23  ;;  %v4368_v2 = vadd.f32 %v4359_v14, %v4090_v42  ;;  %v4320_v3 = vpop.f32.mrb[73].mxu0  ;;  %v4361_v40 = vpop.f32.mrb[73].mxu1  ;;  %v10767_v14 = vld [vmem:[#allocation35_spill] sm:$0xff] }
 0x69c   :  { %v4367_v17 = vadd.f32 %v4320_v3, %v4089_v10  ;;  %v4369_v54 = vadd.f32 %v4361_v40, %v4091_v52  ;;  %v4322_v44 = vpop.f32.mrb[74].mxu0  ;;  %v4363_v24 = vpop.f32.mrb[74].mxu1  ;;  %v4397_v10 = vunpack.c.l.bf16 %v10767_v14  ;;  %v10768_v52 = vld [vmem:[#allocation36_spill] sm:$0xff] }
 0x69d   :  { %v7600_v47 = vmul.f32 -1.442695, %v4366_v53  ;;  %v4323_v15 = vpop.f32.mrb[75].mxu0  ;;  %v4364_v49 = vpop.f32.mrb[75].mxu1  ;;  %v4399_v53 = vunpack.c.l.bf16 %v10768_v52 }
 0x69e   :  { %v7601_v50 = vmul.f32 -1.442695, %v4367_v17  ;;  %v7602_v37 = vmul.f32 -1.442695, %v4369_v54  ;;  %v4400_v54 = vunpack.c.h.bf16 %v10768_v52  ;;  %v10239_v52 = vld [vmem:[#allocation10 + $0x2c] ss:$16 sps:$4 sm:$0xff]  }
 0x69f   :  { %8486 = vpow2.f32 %v7600_v47 }
 0x6a0   :  { %8488 = vpow2.f32 %v7601_v50 }
 0x6a1   :  { %8490 = vpow2.f32 %v7602_v37 }
 0x6a2   :  { %8492 = vtanh.f32 %v4368_v2  ;;  %v4398_v2 = vunpack.c.h.bf16 %v10767_v14 }
 0x6a9   :  { %v8487_v25 = vpop.eup %8486 }
 0x6aa   :  { %v8489_v12 = vpop.eup %8488  ;;  %v4373_v8 = vadd.f32 1.0, %v8487_v25 }
 0x6ab   :  { %v4379_v21 = vadd.f32 1.0, %v8489_v12  ;;  %v8491_v7 = vpop.eup %8490 }
 0x6ac   :  { %8494 = vrcp.f32 %v4373_v8  ;;  %v8493_v33 = vpop.eup %8492  ;;  %v4386_v42 = vadd.f32 1.0, %v8491_v7 }
 0x6ad   :  { %8496 = vrcp.f32 %v4379_v21 }
 0x6ae   :  { %8498 = vrcp.f32 %v4386_v42  ;;  %v10235_v42 = vld [vmem:[#allocation10 + $0x8] ss:$16 sps:$4 sm:$0xff]  }
 0x6b6   :  { %v8495_v19 = vpop.eup %8494 }
 0x6b7   :  { %v8497_v23 = vpop.eup %8496  ;;  %v4390_v16 = vmul.f32 %v8495_v19, %v8493_v33 }
 0x6b8   :  { %v4389_v36 = vmul.f32 %v8497_v23, %v10076_v28  ;;  %v8499_v7 = vpop.eup %8498 }
 0x6ba   :  { %v10228_v3 = vadd.f32 %v4390_v16, %v4389_v36  ;;  %v4627_v40 = vpop.f32.mrb[76].mxu0  ;;  %v4668_v17 = vpop.f32.mrb[76].mxu1  ;;  %v10233_v16 = vld [vmem:[#allocation10] ss:$16 sps:$4 sm:$0xff]  }
 0x6bb   :  { %v4675_v44 = vadd.f32 %v4627_v40, %v4397_v10  ;;  %v4677_v24 = vadd.f32 %v4668_v17, %v4399_v53  ;;  %v4629_v47 = vpop.f32.mrb[77].mxu0  ;;  %v4670_v15 = vpop.f32.mrb[77].mxu1  ;;  %v10237_v10 = vld [vmem:[#allocation10 + $0x24] ss:$16 sps:$4 sm:$0xff]  }
 0x6bc   :  { %v4676_v49 = vadd.f32 %v4629_v47, %v4398_v2  ;;  %v4678_v50 = vadd.f32 %v4670_v15, %v4400_v54  ;;  %v4631_v28 = vpop.f32.mrb[78].mxu0  ;;  %v4672_v37 = vpop.f32.mrb[78].mxu1  ;;  %8500 = vtanh.f32 %v10228_v3  ;;  %v10243_v2 = vld [vmem:[#allocation10 + $0x20] ss:$16 sps:$4 sm:$0xff]   ;;  %v10245_v54 = vld [vmem:[#allocation10 + $0x28] ss:$16 sps:$4 sm:$0xff]  }
 0x6bd   :  { %v7635_v25 = vmul.f32 -1.442695, %v4675_v44  ;;  %v4632_v12 = vpop.f32.mrb[79].mxu0  ;;  %v4673_v8 = vpop.f32.mrb[79].mxu1  ;;  %v10249_v44 = vld [vmem:[#allocation10 + $0x44] ss:$16 sps:$4 sm:$0xff]  }
 0x6be   :  { %v7636_v21 = vmul.f32 -1.442695, %v4676_v49  ;;  %v7637_v19 = vmul.f32 -1.442695, %v4678_v50  ;;  %v10257_v47 = vld [vmem:[#allocation10 + $0x40] ss:$16 sps:$4 sm:$0xff]  }
 0x6bf   :  { %8502 = vpow2.f32 %v7635_v25  ;;  %v10259_v15 = vld [vmem:[#allocation10 + $0x48] ss:$16 sps:$4 sm:$0xff]   ;;  %v10263_v49 = vld [vmem:[#allocation10 + $0x64] ss:$16 sps:$4 sm:$0xff]   ;;  %v10265_v50 = vld [vmem:[#allocation10 + $0x6c] ss:$16 sps:$4 sm:$0xff]  }
 0x6c0   :  { %8504 = vpow2.f32 %v7636_v21  ;;  %v10269_v37 = vld [vmem:[#allocation10 + $0x60] ss:$16 sps:$4 sm:$0xff]   ;;  %v10271_v25 = vld [vmem:[#allocation10 + $0x68] ss:$16 sps:$4 sm:$0xff]   ;;  %v10275_v8 = vld [vmem:[#allocation10 + $0x84] ss:$16 sps:$4 sm:$0xff]  }
 0x6c1   :  { %8506 = vpow2.f32 %v7637_v19  ;;  %v10277_v21 = vld [vmem:[#allocation10 + $0x8c] ss:$16 sps:$4 sm:$0xff]  }
 0x6c2   :  { %8508 = vtanh.f32 %v4677_v24  ;;  %v10251_v24 = vld [vmem:[#allocation10 + $0x4c] ss:$16 sps:$4 sm:$0xff]  }
 0x6c6   :  { %v8501_v33 = vpop.eup %8500 }
 0x6c7   :  { %v4393_v23 = vmul.f32 %v8501_v33, %v8499_v7 }
 0x6c9   :  { %v8503_v36 = vpop.eup %8502  ;;  %v4703_v14 = vpack.c.bf16 %v4393_v23, %v4393_v23 }
 0x6ca   :  { %v8505_v53 = vpop.eup %8504  ;;  %v4682_v40 = vadd.f32 1.0, %v8503_v36 }
 0x6cb   :  { %v4688_v17 = vadd.f32 1.0, %v8505_v53  ;;  %4705 = vst [vmem:[#allocation2 + $0x14] sm:$0xf] %v4703_v14  ;;  %4941 = vmatmul.mubr.bf16.vlgmr.msra.gmra.mrb[80].mxu0 %v4703_v14  ;;  %4982 = vmatmul.mubr.bf16.vlgmr.msra.gmra.mrb[80].mxu1 %v4703_v14  ;;  %v8507_v28 = vpop.eup %8506  ;;  %v10282_v14 = vld [vmem:[#allocation10 + $0x80] ss:$16 sps:$4 sm:$0xff]  }
 0x6cc   :  { %8510 = vrcp.f32 %v4682_v40  ;;  %5218 = vmatpush1.bf16.msra.mxu0 %v10233_v16  ;;  %5259 = vmatpush1.bf16.msra.mxu1 %v10235_v42  ;;  %v8509_v12 = vpop.eup %8508  ;;  %v4695_v23 = vadd.f32 1.0, %v8507_v28  ;;  %v10284_v53 = vld [vmem:[#allocation10 + $0x88] ss:$16 sps:$4 sm:$0xff]   ;;  %v10288_v40 = vld [vmem:[#allocation10 + $0xa4] ss:$16 sps:$4 sm:$0xff]  }
 0x6cd   :  { %8512 = vrcp.f32 %v4688_v17  ;;  %5219 = vmatprep.subr.bf16.mxu0 %v10237_v10  ;;  %5260 = vmatprep.subr.bf16.mxu1 %v10239_v52  ;;  %10769 = vst [vmem:[#allocation47_spill] sm:$0xff] %v10284_v53  ;;  %10770 = vst [vmem:[#allocation48_spill] sm:$0xff] %v10288_v40  ;;  %v10290_v17 = vld [vmem:[#allocation10 + $0xac] ss:$16 sps:$4 sm:$0xff]   ;;  %v10298_v28 = vld [vmem:[#allocation10 + $0xa8] ss:$16 sps:$4 sm:$0xff]  }
 0x6ce   :  { %5249 = vmatprep.mubr.bf16.mxu0 %v10698_v0  ;;  %5290 = vmatprep.mubr.bf16.mxu1 %v10698_v0  ;;  %10771 = vst [vmem:[#allocation49_spill] sm:$0xff] %v10290_v17  ;;  %8514 = vrcp.f32 %v4695_v23  ;;  %10773 = vst [vmem:[#allocation21_spill] sm:$0xff] %v10298_v28  ;;  %v10311_v23 = vld [vmem:[#allocation10 + $0xc8] ss:$16 sps:$4 sm:$0xff]  }
 0x6d0   :  { %5220 = vmatpush1.bf16.msra.mxu0 %v10243_v2  ;;  %5261 = vmatpush1.bf16.msra.mxu1 %v10245_v54 }
 0x6d1   :  { %5221 = vmatprep.subr.bf16.mxu0 %v10249_v44  ;;  %5262 = vmatprep.subr.bf16.mxu1 %v10251_v24 }
 0x6d4   :  { %5222 = vmatpush1.bf16.msra.mxu0 %v10257_v47  ;;  %5263 = vmatpush1.bf16.msra.mxu1 %v10259_v15 }
 0x6d5   :  { %5223 = vmatprep.subr.bf16.mxu0 %v10263_v49  ;;  %5264 = vmatprep.subr.bf16.mxu1 %v10265_v50 }
 0x6d6   :  { %v8511_v7 = vpop.eup %8510 }
 0x6d7   :  { %v8513_v33 = vpop.eup %8512  ;;  %v4699_v19 = vmul.f32 %v8511_v7, %v8509_v12  ;;  %v10303_v7 = vld [vmem:[#allocation10 + $0xc4] ss:$16 sps:$4 sm:$0xff]  }
 0x6d8   :  { %v4698_v36 = vmul.f32 %v8513_v33, %v10100_v45  ;;  %5224 = vmatpush1.bf16.msra.mxu0 %v10269_v37  ;;  %5265 = vmatpush1.bf16.msra.mxu1 %v10271_v25  ;;  %v10296_v45 = vld [vmem:[#allocation10 + $0xa0] ss:$16 sps:$4 sm:$0xff]   ;;  %10774 = vst [vmem:[#allocation22_spill] sm:$0xff] %v10303_v7  ;;  %v10305_v33 = vld [vmem:[#allocation10 + $0xcc] ss:$16 sps:$4 sm:$0xff]  }
 0x6d9   :  { %5225 = vmatprep.subr.bf16.mxu0 %v10275_v8  ;;  %5266 = vmatprep.subr.bf16.mxu1 %v10277_v21  ;;  %10772 = vst [vmem:[#allocation50_spill] sm:$0xff] %v10296_v45  ;;  %10775 = vst [vmem:[#allocation39_spill] sm:$0xff] %v10305_v33 }
 0x6da   :  { %v10292_v12 = vadd.f32 %v4699_v19, %v4698_v36  ;;  %v10309_v19 = vld [vmem:[#allocation10 + $0xc0] ss:$16 sps:$4 sm:$0xff]   ;;  %v10315_v36 = vld [vmem:[#allocation10 + $0xe4] ss:$16 sps:$4 sm:$0xff]  }
 0x6dc   :  { %5226 = vmatpush1.bf16.msra.mxu0 %v10282_v14  ;;  %5267 = vmatpush1.bf16.msra.mxu1 %v10284_v53  ;;  %8516 = vtanh.f32 %v10292_v12 }
 0x6dd   :  { %5227 = vmatprep.subr.bf16.mxu0 %v10288_v40  ;;  %5268 = vmatprep.subr.bf16.mxu1 %v10290_v17  ;;  %v10317_v40 = vld [vmem:[#allocation10 + $0xec] ss:$16 sps:$4 sm:$0xff]   ;;  %v10321_v17 = vld [vmem:[#allocation10 + $0xe0] ss:$16 sps:$4 sm:$0xff]  }
 0x6e0   :  { %5228 = vmatpush1.bf16.msra.mxu0 %v10296_v45  ;;  %5269 = vmatpush1.bf16.msra.mxu1 %v10298_v28  ;;  %v10323_v45 = vld [vmem:[#allocation10 + $0xe8] ss:$16 sps:$4 sm:$0xff]   ;;  %v8515_v28 = vpop.eup %8514 }
 0x6e1   :  { %5229 = vmatprep.subr.bf16.mxu0 %v10303_v7  ;;  %5270 = vmatprep.subr.bf16.mxu1 %v10305_v33 }
 0x6e4   :  { %5230 = vmatpush1.bf16.msra.mxu0 %v10309_v19  ;;  %5271 = vmatpush1.bf16.msra.mxu1 %v10311_v23 }
 0x6e5   :  { %5231 = vmatprep.subr.bf16.mxu0 %v10315_v36  ;;  %5272 = vmatprep.subr.bf16.mxu1 %v10317_v40 }
 0x6e6   :  { %v8517_v7 = vpop.eup %8516 }
 0x6e7   :  { %v4702_v53 = vmul.f32 %v8517_v7, %v8515_v28 }
 0x6e8   :  { %5232 = vmatpush1.bf16.msra.mxu0 %v10321_v17  ;;  %5273 = vmatpush1.bf16.msra.mxu1 %v10323_v45 }
 0x6e9   :  { %v4706_v33 = vpack.c.bf16 %v4702_v53, %v4702_v53  ;;  %5532 = vmatprep.subr.bf16.mxu0 %v10119_v63  ;;  %5573 = vmatprep.subr.bf16.mxu1 %v10121_v1  ;;  %v10776_v63 = vld [vmem:[#allocation27_spill] sm:$0xff]  ;;  %v10779_v53 = vld [vmem:[#allocation34_spill] sm:$0xff] }
 0x6ea   :  { %v4712_v1 = vunpack.c.l.bf16 %v10776_v63  ;;  %v5023_v28 = vunpack.c.l.bf16 %v10779_v53 }
 0x6eb   :  { %4708 = vst [vmem:[#allocation3 + $0x8] sm:$0xf] %v4706_v33  ;;  %5250 = vmatmul.mubr.bf16.vlgmr.msra.gmra.mrb[84].mxu0 %v4706_v33  ;;  %5291 = vmatmul.mubr.bf16.vlgmr.msra.gmra.mrb[84].mxu1 %v4706_v33 }
 0x6ec   :  { %5533 = vmatpush1.bf16.msra.mxu0 %v10123_v5  ;;  %5574 = vmatpush1.bf16.msra.mxu1 %v10125_v38  ;;  %v10777_v5 = vld [vmem:[#allocation28_spill] sm:$0xff] }
 0x6ed   :  { %5534 = vmatprep.subr.bf16.mxu0 %v10131_v4  ;;  %5575 = vmatprep.subr.bf16.mxu1 %v10133_v48  ;;  %v4714_v38 = vunpack.c.l.bf16 %v10777_v5 }
 0x6ee   :  { %5564 = vmatprep.mubr.bf16.mxu0 %v10698_v0  ;;  %5605 = vmatprep.mubr.bf16.mxu1 %v10698_v0 }
 0x6f0   :  { %5535 = vmatpush1.bf16.msra.mxu0 %v10135_v55  ;;  %5576 = vmatpush1.bf16.msra.mxu1 %v10137_v9  ;;  %v4713_v55 = vunpack.c.h.bf16 %v10776_v63  ;;  %v4715_v9 = vunpack.c.h.bf16 %v10777_v5  ;;  %v5024_v5 = vunpack.c.h.bf16 %v10779_v53 }
 0x6f1   :  { %5536 = vmatprep.subr.bf16.mxu0 %v10143_v32  ;;  %5577 = vmatprep.subr.bf16.mxu1 %v10145_v56 }
 0x6f4   :  { %5537 = vmatpush1.bf16.msra.mxu0 %v10147_v57  ;;  %5578 = vmatpush1.bf16.msra.mxu1 %v10149_v58 }
 0x6f5   :  { %5538 = vmatprep.subr.bf16.mxu0 %v10155_v59  ;;  %5579 = vmatprep.subr.bf16.mxu1 %v10157_v60 }
 0x6f8   :  { %5539 = vmatpush1.bf16.msra.mxu0 %v10159_v61  ;;  %5580 = vmatpush1.bf16.msra.mxu1 %v10161_v62 }
 0x6f9   :  { %5540 = vmatprep.subr.bf16.mxu0 %v10167_v18  ;;  %5581 = vmatprep.subr.bf16.mxu1 %v10169_v13 }
 0x6fc   :  { %5541 = vmatpush1.bf16.msra.mxu0 %v10171_v20  ;;  %5582 = vmatpush1.bf16.msra.mxu1 %v10173_v41 }
 0x6fd   :  { %5542 = vmatprep.subr.bf16.mxu0 %v10179_v43  ;;  %5583 = vmatprep.subr.bf16.mxu1 %v10181_v31 }
 0x700   :  { %5543 = vmatpush1.bf16.msra.mxu0 %v10183_v51  ;;  %5584 = vmatpush1.bf16.msra.mxu1 %v10185_v11 }
 0x701   :  { %5544 = vmatprep.subr.bf16.mxu0 %v10191_v46  ;;  %5585 = vmatprep.subr.bf16.mxu1 %v10193_v29 }
 0x704   :  { %5545 = vmatpush1.bf16.msra.mxu0 %v10195_v35  ;;  %5586 = vmatpush1.bf16.msra.mxu1 %v10197_v26 }
 0x705   :  { %5546 = vmatprep.subr.bf16.mxu0 %v10203_v6  ;;  %5587 = vmatprep.subr.bf16.mxu1 %v10205_v30 }
 0x708   :  { %5547 = vmatpush1.bf16.msra.mxu0 %v10207_v22  ;;  %5588 = vmatpush1.bf16.msra.mxu1 %v10209_v39 }
 0x709   :  { %5840 = vmatprep.subr.bf16.mxu0 %v10215_v34  ;;  %5881 = vmatprep.subr.bf16.mxu1 %v10217_v27  ;;  %v10778_v34 = vld [vmem:[#allocation33_spill] sm:$0xff] }
 0x70a   :  { %v5021_v27 = vunpack.c.l.bf16 %v10778_v34 }
 0x79e   :  { %v4942_v4 = vpop.f32.mrb[80].mxu0  ;;  %v4983_v48 = vpop.f32.mrb[80].mxu1 }
 0x79f   :  { %v4990_v32 = vadd.f32 %v4942_v4, %v4712_v1  ;;  %v4992_v56 = vadd.f32 %v4983_v48, %v4714_v38  ;;  %v4944_v57 = vpop.f32.mrb[81].mxu0  ;;  %v4985_v58 = vpop.f32.mrb[81].mxu1  ;;  %v5022_v1 = vunpack.c.h.bf16 %v10778_v34 }
 0x7a0   :  { %v4991_v59 = vadd.f32 %v4944_v57, %v4713_v55  ;;  %v4993_v60 = vadd.f32 %v4985_v58, %v4715_v9  ;;  %v4946_v61 = vpop.f32.mrb[82].mxu0  ;;  %v4987_v62 = vpop.f32.mrb[82].mxu1 }
 0x7a1   :  { %v7670_v18 = vmul.f32 -1.442695, %v4990_v32  ;;  %v4947_v13 = vpop.f32.mrb[83].mxu0  ;;  %v4988_v20 = vpop.f32.mrb[83].mxu1 }
 0x7a2   :  { %v7671_v41 = vmul.f32 -1.442695, %v4991_v59  ;;  %v7672_v43 = vmul.f32 -1.442695, %v4993_v60 }
 0x7a3   :  { %8518 = vpow2.f32 %v7670_v18 }
 0x7a4   :  { %8520 = vpow2.f32 %v7671_v41 }
 0x7a5   :  { %8522 = vpow2.f32 %v7672_v43 }
 0x7a6   :  { %8524 = vtanh.f32 %v4992_v56 }
 0x7ad   :  { %v8519_v31 = vpop.eup %8518 }
 0x7ae   :  { %v8521_v51 = vpop.eup %8520  ;;  %v4997_v11 = vadd.f32 1.0, %v8519_v31 }
 0x7af   :  { %v5003_v46 = vadd.f32 1.0, %v8521_v51  ;;  %v8523_v29 = vpop.eup %8522 }
 0x7b0   :  { %8526 = vrcp.f32 %v4997_v11  ;;  %v8525_v35 = vpop.eup %8524  ;;  %v5010_v22 = vadd.f32 1.0, %v8523_v29  ;;  %v10787_v11 = vld [vmem:[#allocation29_spill] sm:$0xff] }
 0x7b1   :  { %8528 = vrcp.f32 %v5003_v46  ;;  %v5336_v46 = vunpack.c.l.bf16 %v10787_v11 }
 0x7b2   :  { %8530 = vrcp.f32 %v5010_v22 }
 0x7ba   :  { %v8527_v26 = vpop.eup %8526 }
 0x7bb   :  { %v8529_v6 = vpop.eup %8528  ;;  %v5014_v30 = vmul.f32 %v8527_v26, %v8525_v35 }
 0x7bc   :  { %v5013_v39 = vmul.f32 %v8529_v6, %v10228_v3  ;;  %v8531_v61 = vpop.eup %8530 }
 0x7be   :  { %v10372_v7 = vadd.f32 %v5014_v30, %v5013_v39  ;;  %v5251_v33 = vpop.f32.mrb[84].mxu0  ;;  %v5292_v63 = vpop.f32.mrb[84].mxu1 }
 0x7bf   :  { %v5299_v38 = vadd.f32 %v5251_v33, %v5021_v27  ;;  %v5301_v4 = vadd.f32 %v5292_v63, %v5023_v28  ;;  %v5253_v48 = vpop.f32.mrb[85].mxu0  ;;  %v5294_v55 = vpop.f32.mrb[85].mxu1 }
 0x7c0   :  { %v5300_v9 = vadd.f32 %v5253_v48, %v5022_v1  ;;  %v5302_v32 = vadd.f32 %v5294_v55, %v5024_v5  ;;  %v5255_v3 = vpop.f32.mrb[86].mxu0  ;;  %v5296_v56 = vpop.f32.mrb[86].mxu1  ;;  %8532 = vtanh.f32 %v10372_v7 }
 0x7c1   :  { %v7705_v57 = vmul.f32 -1.442695, %v5299_v38  ;;  %v5256_v58 = vpop.f32.mrb[87].mxu0  ;;  %v5297_v59 = vpop.f32.mrb[87].mxu1 }
 0x7c2   :  { %v7706_v60 = vmul.f32 -1.442695, %v5300_v9  ;;  %v7707_v18 = vmul.f32 -1.442695, %v5302_v32  ;;  %v10789_v58 = vld [vmem:[#allocation31_spill] sm:$0xff] }
 0x7c3   :  { %8534 = vpow2.f32 %v7705_v57  ;;  %v5644_v59 = vunpack.c.l.bf16 %v10789_v58 }
 0x7c4   :  { %8536 = vpow2.f32 %v7706_v60  ;;  %v10790_v60 = vld [vmem:[#allocation32_spill] sm:$0xff] }
 0x7c5   :  { %8538 = vpow2.f32 %v7707_v18 }
 0x7c6   :  { %8540 = vtanh.f32 %v5301_v4 }
 0x7ca   :  { %v8533_v62 = vpop.eup %8532 }
 0x7cb   :  { %v5017_v13 = vmul.f32 %v8533_v62, %v8531_v61  ;;  %v5646_v61 = vunpack.c.l.bf16 %v10790_v60 }
 0x7cd   :  { %v8535_v20 = vpop.eup %8534  ;;  %v5327_v41 = vpack.c.bf16 %v5017_v13, %v5017_v13 }
 0x7ce   :  { %v8537_v43 = vpop.eup %8536  ;;  %v5306_v31 = vadd.f32 1.0, %v8535_v20  ;;  %v5645_v20 = vunpack.c.h.bf16 %v10789_v58  ;;  %v10462_v58 = vld [vmem:[%s10638_s6 + $0x34] ss:$8 sps:$4 sm:$0xff]  }
 0x7cf   :  { %v5312_v51 = vadd.f32 1.0, %v8537_v43  ;;  %5329 = vst [vmem:[#allocation2 + $0x18] sm:$0xf] %v5327_v41  ;;  %5565 = vmatmul.mubr.bf16.vlgmr.msra.gmra.mrb[88].mxu0 %v5327_v41  ;;  %5606 = vmatmul.mubr.bf16.vlgmr.msra.gmra.mrb[88].mxu1 %v5327_v41  ;;  %v5647_v41 = vunpack.c.h.bf16 %v10790_v60  ;;  %v8606_v60 = vld [vmem:[#allocation12 + $0x84] ss:$8 sps:$4 sm:$0xff]  }
 0x7d0   :  { %8542 = vrcp.f32 %v5306_v31  ;;  %5841 = vmatpush1.bf16.msra.mxu0 %v10233_v16  ;;  %5882 = vmatpush1.bf16.msra.mxu1 %v10235_v42  ;;  %v8539_v16 = vpop.eup %8538 }
 0x7d1   :  { %8544 = vrcp.f32 %v5312_v51  ;;  %5842 = vmatprep.subr.bf16.mxu0 %v10237_v10  ;;  %5883 = vmatprep.subr.bf16.mxu1 %v10239_v52  ;;  %v8541_v42 = vpop.eup %8540 }
 0x7d2   :  { %5872 = vmatprep.mubr.bf16.mxu0 %v10698_v0  ;;  %5913 = vmatprep.mubr.bf16.mxu1 %v10698_v0 }
 0x7d4   :  { %5843 = vmatpush1.bf16.msra.mxu0 %v10243_v2  ;;  %5884 = vmatpush1.bf16.msra.mxu1 %v10245_v54  ;;  %v5319_v2 = vadd.f32 1.0, %v8539_v16 }
 0x7d5   :  { %5844 = vmatprep.subr.bf16.mxu0 %v10249_v44  ;;  %5885 = vmatprep.subr.bf16.mxu1 %v10251_v24  ;;  %v10780_v24 = vld [vmem:[#allocation47_spill] sm:$0xff] }
 0x7d6   :  { %8546 = vrcp.f32 %v5319_v2 }
 0x7d8   :  { %5845 = vmatpush1.bf16.msra.mxu0 %v10257_v47  ;;  %5886 = vmatpush1.bf16.msra.mxu1 %v10259_v15  ;;  %v10781_v47 = vld [vmem:[#allocation48_spill] sm:$0xff]  ;;  %v10782_v15 = vld [vmem:[#allocation49_spill] sm:$0xff] }
 0x7d9   :  { %5846 = vmatprep.subr.bf16.mxu0 %v10263_v49  ;;  %5887 = vmatprep.subr.bf16.mxu1 %v10265_v50  ;;  %v10783_v49 = vld [vmem:[#allocation50_spill] sm:$0xff]  ;;  %v10784_v50 = vld [vmem:[#allocation21_spill] sm:$0xff] }
 0x7da   :  { %v8543_v10 = vpop.eup %8542 }
 0x7db   :  { %v8545_v0 = vpop.eup %8544  ;;  %v5323_v52 = vmul.f32 %v8543_v10, %v8541_v42 }
 0x7dc   :  { %v5322_v54 = vmul.f32 %v8545_v0, %v10292_v12  ;;  %5847 = vmatpush1.bf16.msra.mxu0 %v10269_v37  ;;  %5888 = vmatpush1.bf16.msra.mxu1 %v10271_v25  ;;  %v10785_v37 = vld [vmem:[#allocation22_spill] sm:$0xff]  ;;  %v10786_v25 = vld [vmem:[#allocation39_spill] sm:$0xff] }
 0x7dd   :  { %5848 = vmatprep.subr.bf16.mxu0 %v10275_v8  ;;  %5889 = vmatprep.subr.bf16.mxu1 %v10277_v21 }
 0x7de   :  { %v10396_v44 = vadd.f32 %v5323_v52, %v5322_v54 }
 0x7e0   :  { %5849 = vmatpush1.bf16.msra.mxu0 %v10282_v14  ;;  %5890 = vmatpush1.bf16.msra.mxu1 %v10780_v24  ;;  %8548 = vtanh.f32 %v10396_v44  ;;  %v8547_v8 = vpop.eup %8546 }
 0x7e1   :  { %5850 = vmatprep.subr.bf16.mxu0 %v10781_v47  ;;  %5891 = vmatprep.subr.bf16.mxu1 %v10782_v15 }
 0x7e4   :  { %5851 = vmatpush1.bf16.msra.mxu0 %v10783_v49  ;;  %5892 = vmatpush1.bf16.msra.mxu1 %v10784_v50 }
 0x7e5   :  { %5852 = vmatprep.subr.bf16.mxu0 %v10785_v37  ;;  %5893 = vmatprep.subr.bf16.mxu1 %v10786_v25 }
 0x7e8   :  { %5853 = vmatpush1.bf16.msra.mxu0 %v10309_v19  ;;  %5894 = vmatpush1.bf16.msra.mxu1 %v10311_v23  ;;  %v10788_v19 = vld [vmem:[#allocation30_spill] sm:$0xff] }
 0x7e9   :  { %5854 = vmatprep.subr.bf16.mxu0 %v10315_v36  ;;  %5895 = vmatprep.subr.bf16.mxu1 %v10317_v40  ;;  %v5338_v29 = vunpack.c.l.bf16 %v10788_v19  ;;  %v5337_v36 = vunpack.c.h.bf16 %v10787_v11  ;;  %v5339_v40 = vunpack.c.h.bf16 %v10788_v19 }
 0x7ea   :  { %v8549_v21 = vpop.eup %8548 }
 0x7eb   :  { %v5326_v14 = vmul.f32 %v8549_v21, %v8547_v8 }
 0x7ec   :  { %5855 = vmatpush1.bf16.msra.mxu0 %v10321_v17  ;;  %5896 = vmatpush1.bf16.msra.mxu1 %v10323_v45 }
 0x7ed   :  { %v5330_v12 = vpack.c.bf16 %v5326_v14, %v5326_v14 }
 0x7ef   :  { %5332 = vst [vmem:[#allocation3 + $0x4] sm:$0xf] %v5330_v12  ;;  %5873 = vmatmul.mubr.bf16.vlgmr.msra.gmra.mrb[92].mxu0 %v5330_v12  ;;  %5914 = vmatmul.mubr.bf16.vlgmr.msra.gmra.mrb[92].mxu1 %v5330_v12 }
 0x8a2   :  { %v5566_v23 = vpop.f32.mrb[88].mxu0  ;;  %v5607_v35 = vpop.f32.mrb[88].mxu1 }
 0x8a3   :  { %v5614_v26 = vadd.f32 %v5566_v23, %v5336_v46  ;;  %v5616_v6 = vadd.f32 %v5607_v35, %v5338_v29  ;;  %v5568_v30 = vpop.f32.mrb[89].mxu0  ;;  %v5609_v17 = vpop.f32.mrb[89].mxu1 }
 0x8a4   :  { %v5615_v22 = vadd.f32 %v5568_v30, %v5337_v36  ;;  %v5617_v45 = vadd.f32 %v5609_v17, %v5339_v40  ;;  %v5570_v39 = vpop.f32.mrb[90].mxu0  ;;  %v5611_v34 = vpop.f32.mrb[90].mxu1  ;;  %v8582_v17 = vld [vmem:[#allocation12 + $0x4] ss:$8 sps:$4 sm:$0xff]  }
 0x8a5   :  { %v7740_v27 = vmul.f32 -1.442695, %v5614_v26  ;;  %v5571_v53 = vpop.f32.mrb[91].mxu0  ;;  %v5612_v28 = vpop.f32.mrb[91].mxu1  ;;  %6223 = vmatprep.subr.bf16.mxu0 %v8582_v17  ;;  %v8585_v39 = vld [vmem:[#allocation12 + $0x14] ss:$8 sps:$4 sm:$0xff]  }
 0x8a6   :  { %v7741_v33 = vmul.f32 -1.442695, %v5615_v22  ;;  %v7742_v63 = vmul.f32 -1.442695, %v5617_v45  ;;  %v8584_v22 = vld [vmem:[#allocation12] ss:$8 sps:$4 sm:$0xff]  }
 0x8a7   :  { %8550 = vpow2.f32 %v7740_v27  ;;  %v8886_v45 = vmov 0   ;;  %6224 = vmatpush1.bf16.msra.mxu0 %v8584_v22  ;;  %v8587_v34 = vld [vmem:[#allocation12 + $0x10] ss:$8 sps:$4 sm:$0xff]   ;;  %v8588_v27 = vld [vmem:[#allocation12 + $0x24] ss:$8 sps:$4 sm:$0xff]  }
 0x8a8   :  { %8552 = vpow2.f32 %v7741_v33  ;;  %6398 = vmatprep.mubr.bf16.mxu1 %v8886_v45  ;;  %6225 = vmatprep.subr.bf16.mxu0 %v8585_v39  ;;  %v8591_v53 = vld [vmem:[#allocation12 + $0x34] ss:$8 sps:$4 sm:$0xff]   ;;  %v8593_v28 = vld [vmem:[#allocation12 + $0x30] ss:$8 sps:$4 sm:$0xff]   ;;  %v8594_v33 = vld [vmem:[#allocation12 + $0x44] ss:$8 sps:$4 sm:$0xff]  }
 0x8a9   :  { %8554 = vpow2.f32 %v7742_v63  ;;  %v8596_v63 = vld [vmem:[#allocation12 + $0x40] ss:$8 sps:$4 sm:$0xff]  }
 0x8aa   :  { %8556 = vtanh.f32 %v5616_v6 }
 0x8ab   :  { %6226 = vmatpush1.bf16.msra.mxu0 %v8587_v34 }
 0x8ac   :  { %6227 = vmatprep.subr.bf16.mxu0 %v8588_v27 }
 0x8b1   :  { %v8551_v1 = vpop.eup %8550 }
 0x8b2   :  { %v8553_v5 = vpop.eup %8552  ;;  %v5621_v38 = vadd.f32 1.0, %v8551_v1  ;;  %v8597_v1 = vld [vmem:[#allocation12 + $0x54] ss:$8 sps:$4 sm:$0xff]  }
 0x8b3   :  { %v5627_v4 = vadd.f32 1.0, %v8553_v5  ;;  %v8555_v48 = vpop.eup %8554  ;;  %v10427_v5 = vld [vmem:[%s10638_s6 + $0x4] ss:$8 sps:$4 sm:$0xff]  }
 0x8b4   :  { %8558 = vrcp.f32 %v5621_v38  ;;  %v8557_v55 = vpop.eup %8556  ;;  %v5634_v56 = vadd.f32 1.0, %v8555_v48  ;;  %v8599_v38 = vld [vmem:[#allocation12 + $0x50] ss:$8 sps:$4 sm:$0xff]   ;;  %6366 = vmatprep.subr.bf16.mxu1 %v10427_v5 }
 0x8b5   :  { %8560 = vrcp.f32 %v5627_v4  ;;  %v10433_v4 = vld [vmem:[%s10638_s6] ss:$8 sps:$4 sm:$0xff]   ;;  %v10438_v48 = vld [vmem:[%s10638_s6 + $0x14] ss:$8 sps:$4 sm:$0xff]  }
 0x8b6   :  { %8562 = vrcp.f32 %v5634_v56  ;;  %6367 = vmatpush1.bf16.msra.mxu1 %v10433_v4  ;;  %v8603_v56 = vld [vmem:[#allocation12 + $0x74] ss:$8 sps:$4 sm:$0xff]  }
 0x8b7   :  { %6368 = vmatprep.subr.bf16.mxu1 %v10438_v48 }
 0x8be   :  { %v8559_v9 = vpop.eup %8558 }
 0x8bf   :  { %v8561_v32 = vpop.eup %8560  ;;  %v5638_v3 = vmul.f32 %v8559_v9, %v8557_v55  ;;  %v8600_v55 = vld [vmem:[#allocation12 + $0x64] ss:$8 sps:$4 sm:$0xff]  }
 0x8c0   :  { %v5637_v57 = vmul.f32 %v8561_v32, %v10372_v7  ;;  %v8563_v47 = vpop.eup %8562  ;;  %v10444_v9 = vld [vmem:[%s10638_s6 + $0x10] ss:$8 sps:$4 sm:$0xff]   ;;  %v10450_v32 = vld [vmem:[%s10638_s6 + $0x24] ss:$8 sps:$4 sm:$0xff]  }
 0x8c1   :  { %6369 = vmatpush1.bf16.msra.mxu1 %v10444_v9 }
 0x8c2   :  { %v5639_v62 = vadd.f32 %v5638_v3, %v5637_v57  ;;  %v5874_v18 = vpop.f32.mrb[92].mxu0  ;;  %v5915_v13 = vpop.f32.mrb[92].mxu1  ;;  %v8602_v3 = vld [vmem:[#allocation12 + $0x60] ss:$8 sps:$4 sm:$0xff]   ;;  %6370 = vmatprep.subr.bf16.mxu1 %v10450_v32 }
 0x8c3   :  { %v5922_v43 = vadd.f32 %v5874_v18, %v5644_v59  ;;  %v5924_v31 = vadd.f32 %v5915_v13, %v5646_v61  ;;  %v5876_v51 = vpop.f32.mrb[93].mxu0  ;;  %v5917_v16 = vpop.f32.mrb[93].mxu1  ;;  %v10456_v57 = vld [vmem:[%s10638_s6 + $0x20] ss:$8 sps:$4 sm:$0xff]   ;;  %v8605_v59 = vld [vmem:[#allocation12 + $0x70] ss:$8 sps:$4 sm:$0xff]  }
 0x8c4   :  { %8564 = vtanh.f32 %v5639_v62  ;;  %v5923_v42 = vadd.f32 %v5876_v51, %v5645_v20  ;;  %v5925_v10 = vadd.f32 %v5917_v16, %v5647_v41  ;;  %v5878_v7 = vpop.f32.mrb[94].mxu0  ;;  %v5919_v0 = vpop.f32.mrb[94].mxu1  ;;  %v10468_v62 = vld [vmem:[%s10638_s6 + $0x30] ss:$8 sps:$4 sm:$0xff]   ;;  %v8608_v18 = vld [vmem:[#allocation12 + $0x80] ss:$8 sps:$4 sm:$0xff]  }
 0x8c5   :  { %v7775_v52 = vmul.f32 -1.442695, %v5922_v43  ;;  %v5879_v2 = vpop.f32.mrb[95].mxu0  ;;  %v5920_v54 = vpop.f32.mrb[95].mxu1  ;;  %6371 = vmatpush1.bf16.msra.mxu1 %v10456_v57  ;;  %v8609_v13 = vld [vmem:[#allocation12 + $0x94] ss:$8 sps:$4 sm:$0xff]  }
 0x8c6   :  { %v7776_v24 = vmul.f32 -1.442695, %v5923_v42  ;;  %v7777_v49 = vmul.f32 -1.442695, %v5925_v10  ;;  %6372 = vmatprep.subr.bf16.mxu1 %v10462_v58  ;;  %v8611_v20 = vld [vmem:[#allocation12 + $0x90] ss:$8 sps:$4 sm:$0xff]  }
 0x8c7   :  { %8566 = vpow2.f32 %v7775_v52  ;;  %v8612_v41 = vld [vmem:[#allocation12 + $0xa4] ss:$8 sps:$4 sm:$0xff]   ;;  %v8614_v43 = vld [vmem:[#allocation12 + $0xa0] ss:$8 sps:$4 sm:$0xff]   ;;  %v8617_v51 = vld [vmem:[#allocation12 + $0xb0] ss:$8 sps:$4 sm:$0xff]  }
 0x8c8   :  { %8568 = vpow2.f32 %v7776_v24  ;;  %v8620_v16 = vld [vmem:[#allocation12 + $0xc4] ss:$8 sps:$4 sm:$0xff]   ;;  %v8623_v42 = vld [vmem:[#allocation12 + $0xc0] ss:$8 sps:$4 sm:$0xff]   ;;  %v8626_v10 = vld [vmem:[#allocation12 + $0xd4] ss:$8 sps:$4 sm:$0xff]  }
 0x8c9   :  { %8570 = vpow2.f32 %v7777_v49  ;;  %6373 = vmatpush1.bf16.msra.mxu1 %v10468_v62  ;;  %v8629_v7 = vld [vmem:[#allocation12 + $0xd0] ss:$8 sps:$4 sm:$0xff]   ;;  %v8632_v0 = vld [vmem:[#allocation12 + $0xe4] ss:$8 sps:$4 sm:$0xff]   ;;  %v8635_v52 = vld [vmem:[#allocation12 + $0xe0] ss:$8 sps:$4 sm:$0xff]  }
 0x8ca   :  { %8572 = vtanh.f32 %v5924_v31  ;;  %6442 = vmatprep.subr.bf16.mxu1 %v10427_v5  ;;  %v8615_v31 = vld [vmem:[#allocation12 + $0xb4] ss:$8 sps:$4 sm:$0xff]   ;;  %v8641_v54 = vld [vmem:[#allocation12 + $0xf0] ss:$8 sps:$4 sm:$0xff]  }
 0x8cb   :  { %v8638_v2 = vld [vmem:[#allocation12 + $0xf4] ss:$8 sps:$4 sm:$0xff]  }
 0x8cc   :  { %6399 = vmatmul.mubr.bf16.vlgmr.msra.gmra.mrb[96].mxu1 %v8886_v45  ;;  %v8643_v24 = vld [vmem:[#allocation2] sm:$0xff]  }
 0x8cd   :  { %6443 = vmatpush1.bf16.msra.mxu1 %v10433_v4  ;;  %6474 = vmatprep.mubr.bf16.mxu1 %v8886_v45 }
 0x8ce   :  { %v8565_v15 = vpop.eup %8564  ;;  %6444 = vmatprep.subr.bf16.mxu1 %v10438_v48 }
 0x8cf   :  { %v5641_v50 = vmul.f32 %v8565_v15, %v8563_v47 }
 0x8d1   :  { %v8567_v37 = vpop.eup %8566  ;;  %v5950_v25 = vpack.c.bf16 %v5641_v50, %v5641_v50  ;;  %6445 = vmatpush1.bf16.msra.mxu1 %v10444_v9 }
 0x8d2   :  { %v8569_v8 = vpop.eup %8568  ;;  %v5929_v21 = vadd.f32 1.0, %v8567_v37  ;;  %6446 = vmatprep.subr.bf16.mxu1 %v10450_v32  ;;  %v6051_v37 = vld [vmem:[%s10639_s7] sm:$0x3]  ;;  %s8887_s7 = smov 64  }
 0x8d3   :  { %5952 = vst [vmem:[#allocation2 + $0x1c] sm:$0xf] %v5950_v25  ;;  %v5935_v14 = vadd.f32 1.0, %v8569_v8  ;;  %v8571_v12 = vpop.eup %8570  ;;  %v10791_v25 = vld [vmem:[#allocation20_spill] sm:$0xff] }
 0x8d4   :  { %8574 = vrcp.f32 %v5929_v21  ;;  %v8573_v11 = vpop.eup %8572  ;;  %v5942_v23 = vadd.f32 1.0, %v8571_v12  ;;  %v10792_v8 = vsub.s32 0, %v10791_v25 }
 0x8d5   :  { %8576 = vrcp.f32 %v5935_v14  ;;  %6447 = vmatpush1.bf16.msra.mxu1 %v10456_v57  ;;  %v10793_v14 = vsub.s32 1, %v10791_v25 }
 0x8d6   :  { %8578 = vrcp.f32 %v5942_v23  ;;  %6448 = vmatprep.subr.bf16.mxu1 %v10462_v58  ;;  %v10497_v21 = vrot.slane %v6051_v37, %v10792_v8 }
 0x8d7   :  { %v10501_v12 = vrot.slane %v6051_v37, %v10793_v14 }
 0x8d9   :  { %6449 = vmatpush1.bf16.msra.mxu1 %v10468_v62 }
 0x8da   :  { %6518 = vmatprep.subr.bf16.mxu1 %v10427_v5 }
 0x8de   :  { %v8575_v46 = vpop.eup %8574 }
 0x8df   :  { %v8577_v19 = vpop.eup %8576  ;;  %v5946_v29 = vmul.f32 %v8575_v46, %v8573_v11 }
 0x8e0   :  { %v5945_v35 = vmul.f32 %v8577_v19, %v10396_v44  ;;  %v8579_v40 = vpop.eup %8578  ;;  %v8590_v44 = vld [vmem:[#allocation12 + $0x20] ss:$8 sps:$4 sm:$0xff]  }
 0x8e1   :  { %6228 = vmatpush1.bf16.msra.mxu0 %v8590_v44 }
 0x8e2   :  { %v5947_v36 = vadd.f32 %v5946_v29, %v5945_v35  ;;  %6229 = vmatprep.subr.bf16.mxu0 %v8591_v53 }
 0x8e4   :  { %8580 = vtanh.f32 %v5947_v36 }
 0x8e5   :  { %6230 = vmatpush1.bf16.msra.mxu0 %v8593_v28 }
 0x8e6   :  { %6231 = vmatprep.subr.bf16.mxu0 %v8594_v33 }
 0x8e9   :  { %6232 = vmatpush1.bf16.msra.mxu0 %v8596_v63 }
 0x8ea   :  { %6233 = vmatprep.subr.bf16.mxu0 %v8597_v1 }
 0x8ed   :  { %6234 = vmatpush1.bf16.msra.mxu0 %v8599_v38 }
 0x8ee   :  { %v8581_v26 = vpop.eup %8580  ;;  %6235 = vmatprep.subr.bf16.mxu0 %v8600_v55 }
 0x8ef   :  { %v5949_v6 = vmul.f32 %v8581_v26, %v8579_v40 }
 0x8f1   :  { %v5953_v30 = vpack.c.bf16 %v5949_v6, %v5949_v6  ;;  %6236 = vmatpush1.bf16.msra.mxu0 %v8602_v3 }
 0x8f2   :  { %6237 = vmatprep.subr.bf16.mxu0 %v8603_v56 }
 0x8f3   :  { %5954 = vst [vmem:[#allocation3] sm:$0xf] %v5953_v30 }
 0x8f5   :  { %6238 = vmatpush1.bf16.msra.mxu0 %v8605_v59 }
 0x8f6   :  { %6239 = vmatprep.subr.bf16.mxu0 %v8606_v60 }
 0x8f9   :  { %6240 = vmatpush1.bf16.msra.mxu0 %v8608_v18 }
 0x8fa   :  { %v8642_v61 = vld [vmem:[#allocation3] sm:$0xff]   ;;  %6241 = vmatprep.subr.bf16.mxu0 %v8609_v13 }
 0x8fb   :  { %6255 = vmatprep.mubr.bf16.mxu0 %v8642_v61 }
 0x8fd   :  { %6242 = vmatpush1.bf16.msra.mxu0 %v8611_v20 }
 0x8fe   :  { %6243 = vmatprep.subr.bf16.mxu0 %v8612_v41 }
 0x901   :  { %6244 = vmatpush1.bf16.msra.mxu0 %v8614_v43 }
 0x902   :  { %6245 = vmatprep.subr.bf16.mxu0 %v8615_v31 }
 0x905   :  { %6246 = vmatpush1.bf16.msra.mxu0 %v8617_v51 }
 0x906   :  { %6247 = vmatprep.subr.bf16.mxu0 %v8620_v16 }
 0x909   :  { %6248 = vmatpush1.bf16.msra.mxu0 %v8623_v42 }
 0x90a   :  { %6249 = vmatprep.subr.bf16.mxu0 %v8626_v10 }
 0x90d   :  { %6250 = vmatpush1.bf16.msra.mxu0 %v8629_v7  ;;  %v8644_v7 = vld [vmem:[#allocation3 + $0x8] sm:$0xff]  }
 0x90e   :  { %6251 = vmatprep.subr.bf16.mxu0 %v8632_v0  ;;  %v8645_v0 = vld [vmem:[#allocation2 + $0x8] sm:$0xff]  }
 0x911   :  { %6252 = vmatpush1.bf16.msra.mxu0 %v8635_v52 }
 0x912   :  { %6253 = vmatprep.subr.bf16.mxu0 %v8638_v2 }
 0x915   :  { %6254 = vmatpush1.bf16.msra.mxu0 %v8641_v54 }
 0x916   :  { %6746 = vmatprep.subr.bf16.mxu0 %v10427_v5 }
 0x918   :  { %6256 = vmatmul.mubr.bf16.vlgmr.msra.gmra.mrb[96].mxu0 %v8643_v24 }
 0x919   :  { %6747 = vmatpush1.bf16.msra.mxu0 %v10433_v4  ;;  %6265 = vmatprep.mubr.bf16.mxu0 %v8644_v7 }
 0x91a   :  { %6748 = vmatprep.subr.bf16.mxu0 %v10438_v48 }
 0x91d   :  { %6749 = vmatpush1.bf16.msra.mxu0 %v10444_v9 }
 0x91e   :  { %6750 = vmatprep.subr.bf16.mxu0 %v10450_v32 }
 0x920   :  { %6266 = vmatmul.mubr.bf16.gmra.mrb[100].mxu0 %v8645_v0 }
 0x921   :  { %6751 = vmatpush1.bf16.msra.mxu0 %v10456_v57 }
 0x922   :  { %6752 = vmatprep.subr.bf16.mxu0 %v10462_v58 }
 0x925   :  { %6753 = vmatpush1.bf16.msra.mxu0 %v10468_v62 }
 0x926   :  { %6898 = vmatprep.subr.bf16.mxu0 %v10427_v5 }
 0x99f   :  { %v6400_v47 = vpop.f32.mrb[96].mxu1 }
 0x9a0   :  { %v6402_v15 = vpop.f32.mrb[97].mxu1 }
 0x9a1   :  { %v6404_v49 = vpop.f32.mrb[98].mxu1 }
 0x9a2   :  { %v6405_v50 = vpop.f32.mrb[99].mxu1 }
 0x9eb   :  { %v6257_v11 = vpop.f32.mrb[96].mxu0 }
 0x9ec   :  { %v6258_v46 = vadd.f32 %v6257_v11, %v10497_v21  ;;  %v6259_v19 = vpop.f32.mrb[97].mxu0 }
 0x9ed   :  { %v6260_v29 = vadd.f32 %v6259_v19, %v10501_v12  ;;  %v6261_v23 = vpop.f32.mrb[98].mxu0 }
 0x9ee   :  { %v6407_v35 = vadd.f32 %v6400_v47, %v6258_v46  ;;  %v6263_v36 = vpop.f32.mrb[99].mxu0  ;;  %v6262_v56 = vadd.f32 %v6261_v23, %v10497_v21 }
 0x9ef   :  { %v6408_v40 = vadd.f32 %v6402_v15, %v6260_v29  ;;  %v6264_v59 = vadd.f32 %v6263_v36, %v10501_v12 }
 0x9f0   :  { %v7826_v26 = vmul.f32 -1.442695, %v6407_v35 }
 0x9f1   :  { %v7827_v34 = vmul.f32 -1.442695, %v6408_v40 }
 0x9f2   :  { %8656 = vpow2.f32 %v7826_v26 }
 0x9f3   :  { %8658 = vtanh.f32 %v6408_v40  ;;  %v6267_v11 = vpop.f32.mrb[100].mxu0 }
 0x9f4   :  { %v6269_v46 = vpop.f32.mrb[101].mxu0  ;;  %v6268_v35 = vadd.f32 %v6267_v11, %v10497_v21 }
 0x9f5   :  { %v6271_v19 = vpop.f32.mrb[102].mxu0  ;;  %v6270_v36 = vadd.f32 %v6269_v46, %v10501_v12 }
 0x9f6   :  { %v6273_v29 = vpop.f32.mrb[103].mxu0 }
 0x9fc   :  { %v8657_v6 = vpop.eup %8656 }
 0x9fd   :  { %v6412_v30 = vadd.f32 1.0, %v8657_v6  ;;  %v8659_v17 = vpop.eup %8658 }
 0x9ff   :  { %8660 = vrcp.f32 %v6412_v30 }
 0xa00   :  { %8662 = vpow2.f32 %v7827_v34 }
 0xa09   :  { %v8661_v22 = vpop.eup %8660 }
 0xa0a   :  { %v6423_v39 = vmul.f32 %v8661_v22, %v8659_v17  ;;  %v8663_v27 = vpop.eup %8662  ;;  %v6422_v53 = vmul.f32 0.0, %v8661_v22 }
 0xa0b   :  { %v6419_v44 = vadd.f32 1.0, %v8663_v27 }
 0xa0c   :  { %6425 = vrot.lane.b32.xlu0 %v6423_v39, %s8887_s7 }
 0xa0d   :  { %8664 = vrcp.f32 %v6419_v44 }
 0xa17   :  { %v8665_v63 = vpop.eup %8664 }
 0xa7e   :  { %v6426_v28 = vpop.permute.xlu0 %6425 }
 0xa7f   :  { %v6428_v33 = vadd.f32 %v6426_v28, %v6422_v53 }
 0xa81   :  { %8666 = vtanh.f32 %v6428_v33 }
 0xa8b   :  { %v8667_v1 = vpop.eup %8666 }
 0xa8c   :  { %v6430_v38 = vmul.f32 %v8667_v1, %v8665_v63 }
 0xa8e   :  { %v6435_v55 = vpack.c.bf16 %v6430_v38, %v6430_v38  ;;  %v6431_v37 = vmax.f32 %v6430_v38, -1e+30 }
 0xa90   :  { %6437 = vrot.lane.b32.xlu0 %v6435_v55, %s8887_s7 }
 0xb02   :  { %v6438_v3 = vpop.permute.xlu0 %6437 }
 0xb03   :  { %7828 = vmatmul.mubr.msk.bf16.vlgmr.msra.gmra.mrb[100].mxu1 %vm374_vm0, %v6438_v3 }
 0xb04   :  { %6519 = vmatpush1.bf16.msra.mxu1 %v10433_v4  ;;  %6550 = vmatprep.mubr.bf16.mxu1 %v8886_v45 }
 0xb05   :  { %6520 = vmatprep.subr.bf16.mxu1 %v10438_v48 }
 0xb08   :  { %6521 = vmatpush1.bf16.msra.mxu1 %v10444_v9 }
 0xb09   :  { %6522 = vmatprep.subr.bf16.mxu1 %v10450_v32 }
 0xb0c   :  { %6523 = vmatpush1.bf16.msra.mxu1 %v10456_v57 }
 0xb0d   :  { %6524 = vmatprep.subr.bf16.mxu1 %v10462_v58 }
 0xb10   :  { %6525 = vmatpush1.bf16.msra.mxu1 %v10468_v62 }
 0xb11   :  { %6594 = vmatprep.subr.bf16.mxu1 %v10427_v5 }
 0xbd6   :  { %v6476_v60 = vpop.f32.mrb[100].mxu1 }
 0xbd7   :  { %v6483_v61 = vadd.f32 %v6476_v60, %v6262_v56  ;;  %v6478_v18 = vpop.f32.mrb[101].mxu1 }
 0xbd8   :  { %v6484_v13 = vadd.f32 %v6478_v18, %v6264_v59  ;;  %v6480_v20 = vpop.f32.mrb[102].mxu1 }
 0xbd9   :  { %v7829_v41 = vmul.f32 -1.442695, %v6483_v61  ;;  %v6481_v43 = vpop.f32.mrb[103].mxu1  ;;  %v6272_v20 = vadd.f32 %v6271_v19, %v10497_v21 }
 0xbda   :  { %v7830_v52 = vmul.f32 -1.442695, %v6484_v13 }
 0xbdb   :  { %8668 = vpow2.f32 %v7829_v41  ;;  %v6274_v41 = vadd.f32 %v6273_v29, %v10501_v12 }
 0xbdc   :  { %8670 = vtanh.f32 %v6484_v13 }
 0xbe5   :  { %v8669_v31 = vpop.eup %8668 }
 0xbe6   :  { %v6488_v51 = vadd.f32 1.0, %v8669_v31  ;;  %v8671_v16 = vpop.eup %8670 }
 0xbe8   :  { %8672 = vrcp.f32 %v6488_v51 }
 0xbe9   :  { %8674 = vpow2.f32 %v7830_v52 }
 0xbf2   :  { %v8673_v42 = vpop.eup %8672 }
 0xbf3   :  { %v6499_v10 = vmul.f32 %v8673_v42, %v8671_v16  ;;  %v8675_v2 = vpop.eup %8674  ;;  %v6498_v24 = vmul.f32 %v8673_v42, %v6428_v33 }
 0xbf4   :  { %v6495_v54 = vadd.f32 1.0, %v8675_v2 }
 0xbf5   :  { %6501 = vrot.lane.b32.xlu1 %v6499_v10, %s8887_s7 }
 0xbf6   :  { %8676 = vrcp.f32 %v6495_v54 }
 0xc00   :  { %v8677_v49 = vpop.eup %8676 }
 0xc67   :  { %v6502_v47 = vpop.permute.xlu1 %6501 }
 0xc68   :  { %v6504_v15 = vadd.f32 %v6502_v47, %v6498_v24  ;;  %v8647_v47 = vld [vmem:[#allocation2 + $0x10] sm:$0xff]  }
 0xc6a   :  { %8678 = vtanh.f32 %v6504_v15 }
 0xc74   :  { %v8679_v50 = vpop.eup %8678 }
 0xc75   :  { %v6506_v25 = vmul.f32 %v8679_v50, %v8677_v49 }
 0xc77   :  { %v6511_v8 = vpack.c.bf16 %v6506_v25, %v6506_v25  ;;  %v10520_v14 = vmax.f32 %v6431_v37, %v6506_v25 }
 0xc79   :  { %6513 = vrot.lane.b32.xlu1 %v6511_v8, %s8887_s7 }
 0xceb   :  { %v6514_v23 = vpop.permute.xlu1 %6513 }
 0xcec   :  { %7831 = vmatmul.mubr.msk.bf16.vlgmr.msra.gmra.mrb[104].mxu1 %vm374_vm0, %v6514_v23 }
 0xced   :  { %6595 = vmatpush1.bf16.msra.mxu1 %v10433_v4  ;;  %6626 = vmatprep.mubr.bf16.mxu1 %v8886_v45 }
 0xcee   :  { %6596 = vmatprep.subr.bf16.mxu1 %v10438_v48 }
 0xcf1   :  { %6597 = vmatpush1.bf16.msra.mxu1 %v10444_v9 }
 0xcf2   :  { %6598 = vmatprep.subr.bf16.mxu1 %v10450_v32 }
 0xcf5   :  { %6599 = vmatpush1.bf16.msra.mxu1 %v10456_v57 }
 0xcf6   :  { %6600 = vmatprep.subr.bf16.mxu1 %v10462_v58 }
 0xcf9   :  { %6601 = vmatpush1.bf16.msra.mxu1 %v10468_v62 }
 0xcfa   :  { %6670 = vmatprep.subr.bf16.mxu1 %v10427_v5 }
 0xdbf   :  { %v6552_v40 = vpop.f32.mrb[104].mxu1 }
 0xdc0   :  { %v6559_v26 = vadd.f32 %v6552_v40, %v6268_v35  ;;  %v6554_v6 = vpop.f32.mrb[105].mxu1 }
 0xdc1   :  { %v6560_v30 = vadd.f32 %v6554_v6, %v6270_v36  ;;  %v6556_v17 = vpop.f32.mrb[106].mxu1 }
 0xdc2   :  { %v7832_v22 = vmul.f32 -1.442695, %v6559_v26  ;;  %v6557_v39 = vpop.f32.mrb[107].mxu1 }
 0xdc3   :  { %v7833_v33 = vmul.f32 -1.442695, %v6560_v30 }
 0xdc4   :  { %8680 = vpow2.f32 %v7832_v22 }
 0xdc5   :  { %8682 = vtanh.f32 %v6560_v30 }
 0xdce   :  { %v8681_v34 = vpop.eup %8680 }
 0xdcf   :  { %v6564_v27 = vadd.f32 1.0, %v8681_v34  ;;  %v8683_v44 = vpop.eup %8682 }
 0xdd1   :  { %8684 = vrcp.f32 %v6564_v27 }
 0xdd2   :  { %8686 = vpow2.f32 %v7833_v33 }
 0xddb   :  { %v8685_v53 = vpop.eup %8684 }
 0xddc   :  { %v6575_v28 = vmul.f32 %v8685_v53, %v8683_v44  ;;  %v8687_v63 = vpop.eup %8686  ;;  %v6574_v38 = vmul.f32 %v8685_v53, %v6504_v15 }
 0xddd   :  { %v6571_v1 = vadd.f32 1.0, %v8687_v63 }
 0xdde   :  { %6577 = vrot.lane.b32.xlu0 %v6575_v28, %s8887_s7 }
 0xddf   :  { %8688 = vrcp.f32 %v6571_v1 }
 0xde9   :  { %v8689_v56 = vpop.eup %8688 }
 0xe50   :  { %v6578_v55 = vpop.permute.xlu0 %6577 }
 0xe51   :  { %v6580_v3 = vadd.f32 %v6578_v55, %v6574_v38  ;;  %v8648_v55 = vld [vmem:[#allocation3 + $0x18] sm:$0xff]  }
 0xe53   :  { %8690 = vtanh.f32 %v6580_v3 }
 0xe5d   :  { %v8691_v59 = vpop.eup %8690 }
 0xe5e   :  { %v6582_v60 = vmul.f32 %v8691_v59, %v8689_v56 }
 0xe60   :  { %v6587_v61 = vpack.c.bf16 %v6582_v60, %v6582_v60  ;;  %v6583_v18 = vmax.f32 %v10520_v14, %v6582_v60 }
 0xe62   :  { %6589 = vrot.lane.b32.xlu1 %v6587_v61, %s8887_s7 }
 0xed4   :  { %v6590_v13 = vpop.permute.xlu1 %6589 }
 0xed5   :  { %7834 = vmatmul.mubr.msk.bf16.vlgmr.msra.gmra.mrb[108].mxu1 %vm374_vm0, %v6590_v13 }
 0xed6   :  { %6671 = vmatpush1.bf16.msra.mxu1 %v10433_v4  ;;  %6702 = vmatprep.mubr.bf16.mxu1 %v8886_v45 }
 0xed7   :  { %6672 = vmatprep.subr.bf16.mxu1 %v10438_v48 }
 0xeda   :  { %6673 = vmatpush1.bf16.msra.mxu1 %v10444_v9 }
 0xedb   :  { %6674 = vmatprep.subr.bf16.mxu1 %v10450_v32 }
 0xede   :  { %6675 = vmatpush1.bf16.msra.mxu1 %v10456_v57 }
 0xedf   :  { %6676 = vmatprep.subr.bf16.mxu1 %v10462_v58 }
 0xee2   :  { %6677 = vmatpush1.bf16.msra.mxu1 %v10468_v62 }
 0xee3   :  { %6822 = vmatprep.subr.bf16.mxu1 %v10427_v5  ;;  %v8646_v5 = vld [vmem:[#allocation3 + $0x10] sm:$0xff]  }
 0xee4   :  { %6275 = vmatprep.mubr.bf16.mxu0 %v8646_v5 }
 0xee5   :  { %6276 = vmatmul.mubr.bf16.gmra.mrb[104].mxu0 %v8647_v47 }
 0xee6   :  { %6285 = vmatprep.mubr.bf16.mxu0 %v8648_v55 }
 0xfa8   :  { %v6628_v43 = vpop.f32.mrb[108].mxu1 }
 0xfa9   :  { %v6635_v31 = vadd.f32 %v6628_v43, %v6272_v20  ;;  %v6630_v51 = vpop.f32.mrb[109].mxu1 }
 0xfaa   :  { %v6636_v16 = vadd.f32 %v6630_v51, %v6274_v41  ;;  %v6632_v42 = vpop.f32.mrb[110].mxu1 }
 0xfab   :  { %v7835_v10 = vmul.f32 -1.442695, %v6635_v31  ;;  %v6633_v7 = vpop.f32.mrb[111].mxu1 }
 0xfac   :  { %v7836_v15 = vmul.f32 -1.442695, %v6636_v16 }
 0xfad   :  { %8692 = vpow2.f32 %v7835_v10 }
 0xfae   :  { %8694 = vtanh.f32 %v6636_v16 }
 0xfb7   :  { %v8693_v0 = vpop.eup %8692 }
 0xfb8   :  { %v6640_v52 = vadd.f32 1.0, %v8693_v0  ;;  %v8695_v2 = vpop.eup %8694  ;;  %v6277_v23 = vpop.f32.mrb[104].mxu0 }
 0xfb9   :  { %v6279_v35 = vpop.f32.mrb[105].mxu0  ;;  %v6278_v6 = vadd.f32 %v6277_v23, %v10497_v21 }
 0xfba   :  { %8696 = vrcp.f32 %v6640_v52  ;;  %v10554_v36 = vpop.f32.mrb[106].mxu0  ;;  %v6280_v30 = vadd.f32 %v6279_v35, %v10501_v12 }
 0xfbb   :  { %8698 = vpow2.f32 %v7836_v15  ;;  %v10556_v40 = vpop.f32.mrb[107].mxu0  ;;  %v6282_v52 = vadd.f32 %v10554_v36, %v10497_v21 }
 0xfc4   :  { %v8697_v54 = vpop.eup %8696 }
 0xfc5   :  { %v6651_v24 = vmul.f32 %v8697_v54, %v8695_v2  ;;  %v8699_v49 = vpop.eup %8698  ;;  %v6650_v37 = vmul.f32 %v8697_v54, %v6580_v3  ;;  %v8649_v3 = vld [vmem:[#allocation2 + $0x18] sm:$0xff]  }
 0xfc6   :  { %v6647_v50 = vadd.f32 1.0, %v8699_v49  ;;  %6286 = vmatmul.mubr.bf16.gmra.mrb[108].mxu0 %v8649_v3 }
 0xfc7   :  { %6653 = vrot.lane.b32.xlu0 %v6651_v24, %s8887_s7  ;;  %6778 = vmatprep.mubr.bf16.mxu0 %v8886_v45 }
 0xfc8   :  { %8700 = vrcp.f32 %v6647_v50 }
 0xfd2   :  { %v8701_v14 = vpop.eup %8700 }
0x1039   :  { %v6654_v25 = vpop.permute.xlu0 %6653 }
0x103a   :  { %v6656_v8 = vadd.f32 %v6654_v25, %v6650_v37 }
0x103c   :  { %8702 = vtanh.f32 %v6656_v8 }
0x1046   :  { %v8703_v11 = vpop.eup %8702 }
0x1047   :  { %v6658_v46 = vmul.f32 %v8703_v11, %v8701_v14 }
0x1049   :  { %v6663_v19 = vpack.c.bf16 %v6658_v46, %v6658_v46  ;;  %v10551_v29 = vmax.f32 %v6583_v18, %v6658_v46 }
0x104b   :  { %6665 = vrot.lane.b32.xlu1 %v6663_v19, %s8887_s7 }
0x1099   :  { %v6287_v16 = vpop.f32.mrb[108].mxu0 }
0x109a   :  { %v6289_v42 = vpop.f32.mrb[109].mxu0  ;;  %v6288_v35 = vadd.f32 %v6287_v16, %v10497_v21 }
0x109b   :  { %v10573_v10 = vpop.f32.mrb[110].mxu0  ;;  %v6290_v36 = vadd.f32 %v6289_v42, %v10501_v12 }
0x109c   :  { %v10575_v7 = vpop.f32.mrb[111].mxu0 }
0x10bd   :  { %v6666_v26 = vpop.permute.xlu1 %6665 }
0x10be   :  { %7837 = vmatmul.mubr.msk.bf16.vlgmr.msra.gmra.mrb[112].mxu1 %vm374_vm0, %v6666_v26 }
0x10bf   :  { %6823 = vmatpush1.bf16.msra.mxu1 %v10433_v4  ;;  %6854 = vmatprep.mubr.bf16.mxu1 %v8886_v45 }
0x10c0   :  { %6824 = vmatprep.subr.bf16.mxu1 %v10438_v48 }
0x10c3   :  { %6825 = vmatpush1.bf16.msra.mxu1 %v10444_v9 }
0x10c4   :  { %6826 = vmatprep.subr.bf16.mxu1 %v10450_v32 }
0x10c7   :  { %6827 = vmatpush1.bf16.msra.mxu1 %v10456_v57 }
0x10c8   :  { %6828 = vmatprep.subr.bf16.mxu1 %v10462_v58 }
0x10cb   :  { %6829 = vmatpush1.bf16.msra.mxu1 %v10468_v62 }
0x1191   :  { %v6704_v17 = vpop.f32.mrb[112].mxu1 }
0x1192   :  { %v6711_v22 = vadd.f32 %v6704_v17, %v6278_v6  ;;  %v6706_v39 = vpop.f32.mrb[113].mxu1 }
0x1193   :  { %v6712_v34 = vadd.f32 %v6706_v39, %v6280_v30  ;;  %v6708_v27 = vpop.f32.mrb[114].mxu1 }
0x1194   :  { %v7838_v44 = vmul.f32 -1.442695, %v6711_v22  ;;  %v6709_v53 = vpop.f32.mrb[115].mxu1 }
0x1195   :  { %v7839_v56 = vmul.f32 -1.442695, %v6712_v34 }
0x1196   :  { %8704 = vpow2.f32 %v7838_v44 }
0x1197   :  { %8706 = vtanh.f32 %v6712_v34 }
0x11a0   :  { %v8705_v28 = vpop.eup %8704 }
0x11a1   :  { %v6716_v33 = vadd.f32 1.0, %v8705_v28  ;;  %v8707_v63 = vpop.eup %8706 }
0x11a3   :  { %8708 = vrcp.f32 %v6716_v33 }
0x11a4   :  { %8710 = vpow2.f32 %v7839_v56 }
0x11ad   :  { %v8709_v1 = vpop.eup %8708 }
0x11ae   :  { %v6727_v38 = vmul.f32 %v8709_v1, %v8707_v63  ;;  %v8711_v59 = vpop.eup %8710  ;;  %v6726_v61 = vmul.f32 %v8709_v1, %v6656_v8 }
0x11af   :  { %v6723_v60 = vadd.f32 1.0, %v8711_v59 }
0x11b0   :  { %6729 = vrot.lane.b32.xlu0 %v6727_v38, %s8887_s7 }
0x11b1   :  { %8712 = vrcp.f32 %v6723_v60 }
0x11bb   :  { %v8713_v20 = vpop.eup %8712 }
0x1222   :  { %v6730_v18 = vpop.permute.xlu0 %6729 }
0x1223   :  { %v6732_v13 = vadd.f32 %v6730_v18, %v6726_v61 }
0x1225   :  { %8714 = vtanh.f32 %v6732_v13 }
0x122f   :  { %v8715_v41 = vpop.eup %8714 }
0x1230   :  { %v6734_v43 = vmul.f32 %v8715_v41, %v8713_v20  ;;  %v6292_v20 = vadd.f32 %v10573_v10, %v10497_v21  ;;  %v6294_v41 = vadd.f32 %v10575_v7, %v10501_v12  ;;  %v8650_v21 = vld [vmem:[%s10640_s8] sm:$0xff]   ;;  %v8651_v10 = vld [vmem:[%s10640_s8 + $0x8] sm:$0xff]   ;;  %v8652_v7 = vld [vmem:[%s10640_s8 + $0x10] sm:$0xff]  }
0x1232   :  { %v6739_v31 = vpack.c.bf16 %v6734_v43, %v6734_v43  ;;  %v6735_v51 = vmax.f32 %v10551_v29, %v6734_v43 }
0x1234   :  { %6741 = vrot.lane.b32.xlu1 %v6739_v31, %s8887_s7 }
0x12a6   :  { %v6742_v0 = vpop.permute.xlu1 %6741 }
0x12a7   :  { %7840 = vmatmul.mubr.msk.bf16.vlgmr.msra.gmra.mrb[112].mxu0 %vm374_vm0, %v6742_v0 }
0x12a8   :  { %6899 = vmatpush1.bf16.msra.mxu0 %v10433_v4  ;;  %6930 = vmatprep.mubr.bf16.mxu0 %v8886_v45  ;;  %v6284_v4 = vadd.f32 %v10556_v40, %v10501_v12  ;;  %v8888_v12 = vmov 0.0  }
0x12a9   :  { %6900 = vmatprep.subr.bf16.mxu0 %v10438_v48  ;;  %7900 = vmatprep.subr.bf16.mxu1 %v8888_v12 }
0x12ac   :  { %6901 = vmatpush1.bf16.msra.mxu0 %v10444_v9 }
0x12ad   :  { %6902 = vmatprep.subr.bf16.mxu0 %v10450_v32 }
0x12b0   :  { %6903 = vmatpush1.bf16.msra.mxu0 %v10456_v57 }
0x12b1   :  { %6904 = vmatprep.subr.bf16.mxu0 %v10462_v58 }
0x12b4   :  { %6905 = vmatpush1.bf16.msra.mxu0 %v10468_v62 }
0x12b5   :  { %7912 = vmatprep.subr.bf16.mxu0 %v8888_v12 }
0x137a   :  { %v6780_v2 = vpop.f32.mrb[112].mxu0 }
0x137b   :  { %v6787_v45 = vadd.f32 %v6780_v2, %v6282_v52  ;;  %v6782_v54 = vpop.f32.mrb[113].mxu0 }
0x137c   :  { %v6788_v48 = vadd.f32 %v6782_v54, %v6284_v4  ;;  %v6784_v24 = vpop.f32.mrb[114].mxu0 }
0x137d   :  { %v7841_v9 = vmul.f32 -1.442695, %v6787_v45  ;;  %v6785_v5 = vpop.f32.mrb[115].mxu0  ;;  %v8653_v24 = vld [vmem:[%s10640_s8 + $0x18] sm:$0xff]  }
0x137e   :  { %v7842_v15 = vmul.f32 -1.442695, %v6788_v48 }
0x137f   :  { %8716 = vpow2.f32 %v7841_v9 }
0x1380   :  { %8718 = vtanh.f32 %v6788_v48 }
0x1389   :  { %v8717_v32 = vpop.eup %8716 }
0x138a   :  { %v6792_v57 = vadd.f32 1.0, %v8717_v32  ;;  %v8719_v58 = vpop.eup %8718 }
0x138c   :  { %8720 = vrcp.f32 %v6792_v57 }
0x138d   :  { %8722 = vpow2.f32 %v7842_v15 }
0x1396   :  { %v8721_v62 = vpop.eup %8720 }
0x1397   :  { %v6803_v47 = vmul.f32 %v8721_v62, %v8719_v58  ;;  %v8723_v49 = vpop.eup %8722  ;;  %v6802_v37 = vmul.f32 %v8721_v62, %v6732_v13 }
0x1398   :  { %v6799_v50 = vadd.f32 1.0, %v8723_v49 }
0x1399   :  { %6805 = vrot.lane.b32.xlu0 %v6803_v47, %s8887_s7  ;;  %v8654_v47 = vld [vmem:[%s10642_s10] sm:$0xff]  }
0x139a   :  { %8724 = vrcp.f32 %v6799_v50 }
0x13a4   :  { %v8725_v14 = vpop.eup %8724 }
0x140b   :  { %v6806_v25 = vpop.permute.xlu0 %6805 }
0x140c   :  { %v6808_v8 = vadd.f32 %v6806_v25, %v6802_v37 }
0x140e   :  { %8726 = vtanh.f32 %v6808_v8 }
0x1418   :  { %v8727_v11 = vpop.eup %8726 }
0x1419   :  { %v6810_v46 = vmul.f32 %v8727_v11, %v8725_v14  ;;  %v8655_v14 = vld [vmem:[%s10642_s10 + $0x8] sm:$0xff]   ;;  %v7849_v11 = vld [vmem:[%s10641_s9] ss:$0 sm:$0xff] }
0x141b   :  { %v6815_v19 = vpack.c.bf16 %v6810_v46, %v6810_v46  ;;  %v10591_v29 = vmax.f32 %v6735_v51, %v6810_v46 }
0x141d   :  { %6817 = vrot.lane.b32.xlu1 %v6815_v19, %s8887_s7 }
0x148f   :  { %v6818_v23 = vpop.permute.xlu1 %6817 }
0x1490   :  { %7843 = vmatmul.mubr.msk.bf16.vlgmr.msra.gmra.mrb[116].mxu1 %vm374_vm0, %v6818_v23 }
0x1491   :  { %7908 = vmatprep.mubr.msk.bf16.mxu1 %vm8889_vm1, %v8888_v12  ;;  %7901 = vmatpush3.bf16.msra.mxu1 %v8650_v21 }
0x1492   :  { %7902 = vmatprep.subr.bf16.mxu1 %v8888_v12 }
0x1495   :  { %7903 = vmatpush3.bf16.msra.mxu1 %v8651_v10 }
0x1496   :  { %7904 = vmatprep.subr.bf16.mxu1 %v8888_v12 }
0x1499   :  { %7905 = vmatpush3.bf16.msra.mxu1 %v8652_v7 }
0x149a   :  { %7906 = vmatprep.subr.bf16.mxu1 %v8888_v12 }
0x149d   :  { %7907 = vmatpush3.bf16.msra.mxu1 %v8653_v24 }
0x1563   :  { %v6856_v40 = vpop.f32.mrb[116].mxu1 }
0x1564   :  { %v6863_v26 = vadd.f32 %v6856_v40, %v6288_v35  ;;  %v6858_v6 = vpop.f32.mrb[117].mxu1 }
0x1565   :  { %v6864_v30 = vadd.f32 %v6858_v6, %v6290_v36  ;;  %v6860_v17 = vpop.f32.mrb[118].mxu1 }
0x1566   :  { %v7844_v22 = vmul.f32 -1.442695, %v6863_v26  ;;  %v6861_v39 = vpop.f32.mrb[119].mxu1  ;;  %v7855_v26 = vld [vmem:[#allocation4] ss:$0 sm:$0xff] }
0x1567   :  { %v7845_v33 = vmul.f32 -1.442695, %v6864_v30 }
0x1568   :  { %8728 = vpow2.f32 %v7844_v22 }
0x1569   :  { %8730 = vtanh.f32 %v6864_v30 }
0x1572   :  { %v8729_v34 = vpop.eup %8728 }
0x1573   :  { %v6868_v27 = vadd.f32 1.0, %v8729_v34  ;;  %v8731_v44 = vpop.eup %8730 }
0x1575   :  { %8732 = vrcp.f32 %v6868_v27 }
0x1576   :  { %8734 = vpow2.f32 %v7845_v33 }
0x157f   :  { %v8733_v53 = vpop.eup %8732 }
0x1580   :  { %v6879_v28 = vmul.f32 %v8733_v53, %v8731_v44  ;;  %v8735_v63 = vpop.eup %8734  ;;  %v6878_v38 = vmul.f32 %v8733_v53, %v6808_v8 }
0x1581   :  { %v6875_v1 = vadd.f32 1.0, %v8735_v63 }
0x1582   :  { %6881 = vrot.lane.b32.xlu0 %v6879_v28, %s8887_s7 }
0x1583   :  { %8736 = vrcp.f32 %v6875_v1 }
0x158d   :  { %v8737_v56 = vpop.eup %8736 }
0x15f4   :  { %v6882_v55 = vpop.permute.xlu0 %6881 }
0x15f5   :  { %v6884_v3 = vadd.f32 %v6882_v55, %v6878_v38 }
0x15f7   :  { %8738 = vtanh.f32 %v6884_v3 }
0x1601   :  { %v8739_v59 = vpop.eup %8738 }
0x1602   :  { %v6886_v60 = vmul.f32 %v8739_v59, %v8737_v56 }
0x1604   :  { %v6891_v61 = vpack.c.bf16 %v6886_v60, %v6886_v60  ;;  %v6887_v18 = vmax.f32 %v10591_v29, %v6886_v60 }
0x1606   :  { %6893 = vrot.lane.b32.xlu1 %v6891_v61, %s8887_s7 }
0x1678   :  { %v6894_v13 = vpop.permute.xlu1 %6893 }
0x1679   :  { %7846 = vmatmul.mubr.msk.bf16.vlgmr.msra.gmra.mrb[116].mxu0 %vm374_vm0, %v6894_v13 }
0x167a   :  { %7916 = vmatprep.mubr.msk.bf16.mxu0 %vm8889_vm1, %v8888_v12  ;;  %7913 = vmatpush3.bf16.msra.mxu0 %v8654_v47 }
0x167b   :  { %7914 = vmatprep.subr.bf16.mxu0 %v8888_v12 }
0x167e   :  { %7915 = vmatpush3.bf16.msra.mxu0 %v8655_v14 }
0x174c   :  { %v6932_v43 = vpop.f32.mrb[116].mxu0 }
0x174d   :  { %v6939_v31 = vadd.f32 %v6932_v43, %v6292_v20  ;;  %v6934_v51 = vpop.f32.mrb[117].mxu0 }
0x174e   :  { %v6940_v16 = vadd.f32 %v6934_v51, %v6294_v41  ;;  %v6936_v42 = vpop.f32.mrb[118].mxu0 }
0x174f   :  { %v7847_v0 = vmul.f32 -1.442695, %v6939_v31  ;;  %v6937_v52 = vpop.f32.mrb[119].mxu0 }
0x1750   :  { %v7848_v9 = vmul.f32 -1.442695, %v6940_v16 }
0x1751   :  { %8740 = vpow2.f32 %v7847_v0 }
0x1752   :  { %8742 = vtanh.f32 %v6940_v16 }
0x175b   :  { %v8741_v4 = vpop.eup %8740 }
0x175c   :  { %v6944_v2 = vadd.f32 1.0, %v8741_v4  ;;  %v8743_v45 = vpop.eup %8742 }
0x175e   :  { %8744 = vrcp.f32 %v6944_v2 }
0x175f   :  { %8746 = vpow2.f32 %v7848_v9 }
0x1768   :  { %v8745_v54 = vpop.eup %8744 }
0x1769   :  { %v6955_v48 = vmul.f32 %v8745_v54, %v8743_v45  ;;  %v8747_v5 = vpop.eup %8746  ;;  %v6954_v57 = vmul.f32 %v8745_v54, %v6884_v3 }
0x176a   :  { %v6951_v32 = vadd.f32 1.0, %v8747_v5 }
0x176b   :  { %6957 = vrot.lane.b32.xlu0 %v6955_v48, %s8887_s7 }
0x176c   :  { %8748 = vrcp.f32 %v6951_v32 }
0x1776   :  { %v8749_v15 = vpop.eup %8748 }
0x17dd   :  { %v6958_v58 = vpop.permute.xlu0 %6957 }
0x17de   :  { %v6960_v62 = vadd.f32 %v6958_v58, %v6954_v57 }
0x17e0   :  { %8750 = vtanh.f32 %v6960_v62 }
0x17ea   :  { %v8751_v49 = vpop.eup %8750 }
0x17eb   :  { %v6962_v50 = vmul.f32 %v8751_v49, %v8749_v15 }
0x17ed   :  { %v6963_v37 = vmax.f32 %v6887_v18, %v6962_v50 }
0x17ef   :  { %v6964_v25 = vpack.c.bf16 %v6963_v37, %v6963_v37 }
0x17f1   :  { %6981 = vrot.lane.b32.xlu1 %v6964_v25, %s8887_s7 }
0x1863   :  { %v6982_v8 = vpop.permute.xlu1 %6981 }
0x1864   :  { %7909 = vmatmul.mubr.msk.bf16.vlgmr.msra.gmra.mrb[120].mxu1 %vm374_vm0, %v6982_v8 }
0x1937   :  { %v7044_v46 = vpop.f32.mrb[120].mxu1 }
0x1938   :  { %v7045_v19 = vadd.f32 %v7849_v11, %v7044_v46  ;;  %v7910_v29 = vpop.f32.mrb[121].mxu1 }
0x1939   :  { %v7047_v23 = vpop.f32.mrb[122].mxu1 }
0x193a   :  { %v7050_v35 = vmax.f32 %v7045_v19, 0.0  ;;  %v7911_v36 = vpop.f32.mrb[123].mxu1 }
0x193c   :  { %v7051_v40 = vpack.c.bf16 %v7050_v35, %v7050_v35 }
0x193e   :  { %7917 = vmatmul.mubr.msk.bf16.vlgmr.msra.gmra.mrb[120].mxu0 %vm7075_vm2, %v7051_v40 }
0x1a11   :  { %v7113_v6 = vpop.f32.mrb[120].mxu0 }
0x1a12   :  { %v7114_v30 = vadd.f32 %v7855_v26, %v7113_v6  ;;  %v7918_v17 = vpop.f32.mrb[121].mxu0 }
0x1a13   :  { %v7116_v22 = vpop.f32.mrb[122].mxu0 }
0x1a14   :  { %v7859_v39 = vmul.f32 -1.442695, %v7114_v30  ;;  %v7919_v34 = vpop.f32.mrb[123].mxu0 }
0x1a16   :  { %8752 = vpow2.f32 %v7859_v39 }
0x1a20   :  { %v8753_v27 = vpop.eup %8752 }
0x1a21   :  { %v7122_v44 = vadd.f32 1.0, %v8753_v27 }
0x1a23   :  { %8754 = vrcp.f32 %v7122_v44 }
0x1a2d   :  { %v8755_v53 = vpop.eup %8754 }
0x1a2e   :  { %7126 = vst.msk [vmem:[%s10644_s12] sm:$0xff] %vm7125_vm3, %v8755_v53 }
0x1a2f   :  { %7131 = vsyncpa [#allocation6], 1 }
0x1a30   :  { %7132 = vsyncpa [#allocation8], 1 }
0x1a31   :  { %7133 = vsyncpa [#allocation11], 1 }

</bundles_post_ra>
